<compile_context>
chip_gen: v5e
topology: v5e:2x2
jax: 0.10.0
libtpu: 0.0.40
codegen_flags: <defaults>
</compile_context>

<pallas_src>
import functools
import math

import jax
import jax.numpy as jnp
from jax import lax
from jax.experimental import pallas as pl
from jax.experimental.pallas import tpu as pltpu


# ----------------------------------------------------------------------------
# Kernel 1: kernel-matrix ("krn") construction, grid over batch only
# ----------------------------------------------------------------------------
def _krn_kernel(xi_ref, xj_ref, wq_ref, wk_ref, krn_ref, *, n_head, d_embed):
    xi = xi_ref[0]                      # (S, D)  bf16  K source (pos 0..S-1)
    xj = xj_ref[0]                      # (S, D)  bf16  Q source (pos 1..S)
    wq = wq_ref[...]                    # (D, H*D) bf16
    wk = wk_ref[...]                    # (D, H*D) bf16

    # one wide MXU op per projection instead of H narrow ones
    q = jnp.dot(xj, wq, preferred_element_type=jnp.float32)    # (S, H*D) f32
    k = jnp.dot(xi, wk, preferred_element_type=jnp.float32)    # (S, H*D) f32

    S = xi.shape[0]
    D = d_embed
    inv_sqrt_d = 1.0 / math.sqrt(D)
    rows = lax.broadcasted_iota(jnp.int32, (S, S), 0)
    cols = lax.broadcasted_iota(jnp.int32, (S, S), 1)
    causal = cols <= rows

    for h in range(n_head):                                    # static H
        qh = q[:, h * D:(h + 1) * D].astype(jnp.bfloat16)
        kh = k[:, h * D:(h + 1) * D].astype(jnp.bfloat16)
        # contract last dims directly: no explicit transpose of K
        s = lax.dot_general(qh, kh, (((1,), (1,)), ((), ())),
                            preferred_element_type=jnp.float32)
        s = s * inv_sqrt_d
        s = jnp.clip(s, -10.0, 10.0)
        s = jnp.where(causal, s, -jnp.inf)
        m = jnp.max(s, axis=-1, keepdims=True)
        p = jnp.exp(s - m)
        p = p * pl.reciprocal(jnp.sum(p, axis=-1, keepdims=True), approx=True)
        krn_ref[0, h] = p.astype(krn_ref.dtype)


def compute_krn(x_i16, x_j16, wq_wide, wk_wide, n_head):
    B, S, D = x_i16.shape
    HD = wq_wide.shape[1]
    kern = functools.partial(_krn_kernel, n_head=n_head, d_embed=D)
    return pl.pallas_call(
        kern,
        out_shape=jax.ShapeDtypeStruct((B, n_head, S, S), jnp.bfloat16),
        grid=(B,),
        in_specs=[
            pl.BlockSpec((1, S, D), lambda b: (b, 0, 0)),
            pl.BlockSpec((1, S, D), lambda b: (b, 0, 0)),
            pl.BlockSpec((D, HD), lambda b: (0, 0)),
            pl.BlockSpec((D, HD), lambda b: (0, 0)),
        ],
        out_specs=pl.BlockSpec((1, n_head, S, S), lambda b: (b, 0, 0, 0)),
        compiler_params=pltpu.CompilerParams(
            dimension_semantics=("parallel",),
            vmem_limit_bytes=32 * 1024 * 1024),
    )(x_i16, x_j16, wq_wide, wk_wide)


# ----------------------------------------------------------------------------
# Kernel 2: fused GD layers.  grid = (B, n_layer, n_vocab_blocks)
#   - f_k kept resident in VMEM scratch across the layer axis
#   - wte streamed over the vocab axis; ex / denom accumulated in scratch
# ----------------------------------------------------------------------------
def _gd_fused_kernel(e_ref, krn_ref, wte_ref, wot_ref, out_ref,
                     fk_scr, ex_scr, den_scr, *, n_head, d_embed):
    layer = pl.program_id(1)
    vblk = pl.program_id(2)
    n_vblk = pl.num_programs(2)

    @pl.when((layer == 0) & (vblk == 0))
    def _init_fk():
        fk_scr[...] = jnp.zeros_like(fk_scr)

    @pl.when(vblk == 0)
    def _init_acc():
        ex_scr[...] = jnp.zeros_like(ex_scr)
        den_scr[...] = jnp.zeros_like(den_scr)

    # ---- streamed vocab block: R = softmax(wte_blk @ f_k^T, axis=-1) -------
    wte_blk = wte_ref[...]                                    # (Vt, D) bf16
    fk16 = fk_scr[...].astype(jnp.bfloat16)                   # (S, D)
    logits = lax.dot_general(wte_blk, fk16, (((1,), (1,)), ((), ())),
                             preferred_element_type=jnp.float32)   # (Vt, S)
    m = jnp.max(logits, axis=-1, keepdims=True)
    r = jnp.exp(logits - m)
    r = r * pl.reciprocal(jnp.sum(r, axis=-1, keepdims=True), approx=True)
    r16 = r.astype(jnp.bfloat16)

    # ex += R_blk^T @ wte_blk        -> (S, D)
    ex_scr[...] += lax.dot_general(r16, wte_blk, (((0,), (0,)), ((), ())),
                                   preferred_element_type=jnp.float32)
    # denom += column sums of R_blk  -> (S, 128), every lane identical
    ones_blk = jnp.ones((wte_blk.shape[0], den_scr.shape[1]), jnp.bfloat16)
    den_scr[...] += lax.dot_general(r16, ones_blk, (((0,), (0,)), ((), ())),
                                    preferred_element_type=jnp.float32)

    # ---- finalize this layer once the whole vocab has been streamed --------
    @pl.when(vblk == n_vblk - 1)
    def _finalize_layer():
        D = d_embed
        S = fk_scr.shape[0]
        inv_den = pl.reciprocal(den_scr[...], approx=True)[:, 0:1]   # (S, 1)
        exn = ex_scr[...] * inv_den                                   # (S, D)
        vmat = (e_ref[0] - exn).astype(jnp.bfloat16)                  # (S, D)

        # per-head krn @ V, concatenated into a lane-dense (S, H*D) slab
        heads = []
        for h in range(n_head):                                       # static H
            heads.append(jnp.dot(krn_ref[0, h], vmat,
                                 preferred_element_type=jnp.float32))
        slab = jnp.concatenate(heads, axis=-1)                        # (S, H*D)
        row = lax.broadcasted_iota(jnp.int32, (S, 1), 0).astype(jnp.float32)
        slab = slab * pl.reciprocal(row + 1.0, approx=True)           # W_N diag

        # single wide projection: (S, H*D) @ (H*D, D)
        delta = jnp.dot(slab.astype(jnp.bfloat16), wot_ref[...],
                        preferred_element_type=jnp.float32)           # (S, D)
        fk_new = fk_scr[...] + delta
        fk_scr[...] = fk_new
        out_ref[0] = fk_new.astype(out_ref.dtype)


def gd_forward(e, krn, wte16, wot16, n_layer, vocab_tile):
    B, S, D = e.shape
    H = krn.shape[1]
    V = wte16.shape[0]
    assert V % vocab_tile == 0
    n_vblk = V // vocab_tile
    kern = functools.partial(_gd_fused_kernel, n_head=H, d_embed=D)
    return pl.pallas_call(
        kern,
        out_shape=jax.ShapeDtypeStruct((B, S, D), jnp.float32),
        grid=(B, n_layer, n_vblk),
        in_specs=[
            pl.BlockSpec((1, S, D), lambda b, l, v: (b, 0, 0)),          # e
            pl.BlockSpec((1, H, S, S), lambda b, l, v: (b, 0, 0, 0)),    # krn
            pl.BlockSpec((vocab_tile, D), lambda b, l, v: (v, 0)),       # wte
            pl.BlockSpec((H * D, D), lambda b, l, v: (0, 0)),            # W_o^T
        ],
        out_specs=pl.BlockSpec((1, S, D), lambda b, l, v: (b, 0, 0)),
        scratch_shapes=[
            pltpu.VMEM((S, D), jnp.float32),     # resident f_k
            pltpu.VMEM((S, D), jnp.float32),     # ex accumulator
            pltpu.VMEM((S, 128), jnp.float32),   # denom accumulator (col sums)
        ],
        compiler_params=pltpu.CompilerParams(
            dimension_semantics=("parallel", "arbitrary", "arbitrary"),
            vmem_limit_bytes=32 * 1024 * 1024),
    )(e, krn, wte16, wot16)


# ----------------------------------------------------------------------------
# Plain-JAX glue
# ----------------------------------------------------------------------------
def layernorm(x, eps=1e-5):
    # nn.LayerNorm(d, bias=False), default weight=1 (untouched by init).
    mu = jnp.mean(x, axis=-1, keepdims=True)
    var = jnp.mean((x - mu) ** 2, axis=-1, keepdims=True)
    return (x - mu) / jnp.sqrt(var + eps)


def init_params(key, vocab_size, context_size, d_embed, n_head, n_layer):
    k_wte, k_wpe, k_wq, k_wk, k_wo = jax.random.split(key, 5)
    return {
        # tied: wte.weight == lm_head.weight
        "wte": 0.02 * jax.random.normal(k_wte, (vocab_size, d_embed), jnp.float32),
        "wpe": 0.02 * jax.random.normal(k_wpe, (context_size + 1, d_embed), jnp.float32),
        "W_q": 0.02 * jax.random.normal(k_wq, (n_head, d_embed, d_embed), jnp.float32),
        "W_k": 0.02 * jax.random.normal(k_wk, (n_head, d_embed, d_embed), jnp.float32),
        # W_o.weight: (d_embed, d_embed*n_head), std = 0.02/sqrt(2*n_layer)
        "W_o": (0.02 / math.sqrt(2 * n_layer))
        * jax.random.normal(k_wo, (d_embed, d_embed * n_head), jnp.float32),
    }


@functools.partial(jax.jit, static_argnames=("n_layer", "vocab_tile"))
def old_model_forward(params, x, n_layer, vocab_tile=256):
    """Forward (targets=None path). Returns logits of shape (B, 1, V)."""
    B, S = x.shape
    wte, wpe = params["wte"], params["wpe"]
    D = wte.shape[1]
    H = params["W_q"].shape[0]

    # embeddings + LayerNorms (dropout p=0 -> identity)
    e = layernorm(jnp.take(wte, x, axis=0))                      # (B, S, D) f32
    p = layernorm(jnp.take(wpe, jnp.arange(S + 1), axis=0))
    p = jnp.broadcast_to(p, (B, S + 1, D))
    x_i = p[:, :-1, :].astype(jnp.bfloat16)                      # (B, S, D)
    x_j = p[:, 1:, :].astype(jnp.bfloat16)                       # (B, S, D)

    # fold heads into one wide projection weight: (D, H*D)
    wq_wide = jnp.transpose(params["W_q"], (1, 0, 2)).reshape(D, H * D)
    wk_wide = jnp.transpose(params["W_k"], (1, 0, 2)).reshape(D, H * D)
    krn = compute_krn(x_i, x_j,
                      wq_wide.astype(jnp.bfloat16),
                      wk_wide.astype(jnp.bfloat16), H)           # (B,H,S,S) bf16

    # fused GD layers (Pallas)
    wte16 = wte.astype(jnp.bfloat16)                             # (V, D)
    wot16 = params["W_o"].T.astype(jnp.bfloat16)                 # (H*D, D)
    f_k = gd_forward(e, krn, wte16, wot16, n_layer, vocab_tile)  # (B, S, D) f32

    h = layernorm(f_k)                                           # ln_f
    logits = h[:, -1:, :] @ wte.T                                # tied lm_head
    return logits


# ----------------------------------------------------------------------------
# Pure-JAX f32 reference (mirrors the PyTorch forward) for a sanity check
# ----------------------------------------------------------------------------
def reference_forward(params, x, n_layer):
    B, S = x.shape
    wte, wpe = params["wte"], params["wpe"]
    D = wte.shape[1]
    H = params["W_q"].shape[0]

    e = layernorm(jnp.take(wte, x, axis=0))
    p = layernorm(jnp.broadcast_to(jnp.take(wpe, jnp.arange(S + 1), axis=0),
                                   (B, S + 1, D)))
    x_i, x_j = p[:, :-1, :], p[:, 1:, :]

    Q = jnp.einsum("bsd,hde->bhse", x_j, params["W_q"])
    K = jnp.einsum("bsd,hde->bhse", x_i, params["W_k"])
    krn = jnp.einsum("bhqd,bhkd->bhqk", Q, K) / math.sqrt(D)
    krn = jnp.clip(krn, -10.0, 10.0)
    mask = jnp.tril(jnp.ones((S, S), bool))
    krn = jnp.where(mask[None, None], krn, -jnp.inf)
    krn = jax.nn.softmax(krn, axis=-1)

    def step(f_k):
        R = jax.nn.softmax(jnp.einsum("vd,bsd->bvs", wte, f_k), axis=-1)
        ex = jnp.einsum("bvs,vd->bsd", R, wte) / jnp.sum(R, axis=1)[..., None]
        V = (e - ex)[:, None]                                    # (B,1,S,D)
        d = jnp.einsum("bhqk,bzkd->bhqd", krn, V)
        d = d * (1.0 / (jnp.arange(S) + 1.0))[None, None, :, None]
        d = jnp.transpose(d, (0, 2, 1, 3)).reshape(B, S, H * D)
        return d @ params["W_o"].T

    f_k = jnp.zeros_like(e)
    for _ in range(n_layer):
        f_k = f_k + step(f_k)
    return layernorm(f_k)[:, -1:, :] @ wte.T


# ----------------------------------------------------------------------------
if __name__ == "__main__":
    # small but lane-dense config (last dims multiples of 128)
    B, S = 2, 128
    VOCAB, CONTEXT, D, H, N_LAYER = 512, 128, 128, 2, 2
    VOCAB_TILE = 256                                  # exercises vocab streaming

    key = jax.random.PRNGKey(0)
    k_params, k_tokens = jax.random.split(key)
    params = init_params(k_params, VOCAB, CONTEXT, D, H, N_LAYER)
    x = jax.random.randint(k_tokens, (B, S), 0, VOCAB, dtype=jnp.int32)

    logits = old_model_forward(params, x, n_layer=N_LAYER, vocab_tile=VOCAB_TILE)
    logits = jax.block_until_ready(logits)
    assert logits.shape == (B, 1, VOCAB)

    # loose-tolerance sanity check vs f32 reference (kernels use bf16 MXU ops)
    ref = jax.block_until_ready(reference_forward(params, x, N_LAYER))
    err = float(jnp.max(jnp.abs(logits - ref)))
    assert jnp.allclose(logits, ref, atol=5e-2, rtol=5e-2), \
        f"mismatch vs reference, max abs err {err}"

    print("KERNEL_OK")
</pallas_src>

<mosaic_0001>
module attributes {stable_mosaic.version = 11 : i64} {
  func.func @_krn_kernel(%arg0: i32, %arg1: memref<1x128x128xbf16, #tpu.memory_space<vmem>>, %arg2: memref<1x128x128xbf16, #tpu.memory_space<vmem>>, %arg3: memref<128x256xbf16, #tpu.memory_space<vmem>>, %arg4: memref<128x256xbf16, #tpu.memory_space<vmem>>, %arg5: memref<1x2x128x128xbf16, #tpu.memory_space<vmem>>) attributes {dimension_semantics = [#tpu.dimension_semantics<parallel>], iteration_bounds = array<i64: 2>, scalar_prefetch = 0 : i64, scratch_operands = 0 : i64, tpu.core_type = #tpu.core_type<tc>, window_params = [{transform_indices = @transform_0, window_bounds = array<i64: 1, 128, 128>}, {transform_indices = @transform_1, window_bounds = array<i64: 1, 128, 128>}, {pipeline_mode = #tpu.pipeline_mode<synchronous>, transform_indices = @transform_2, window_bounds = array<i64: 128, 256>}, {pipeline_mode = #tpu.pipeline_mode<synchronous>, transform_indices = @transform_3, window_bounds = array<i64: 128, 256>}, {transform_indices = @transform_4, window_bounds = array<i64: 1, 2, 128, 128>}]} {
    %c0 = arith.constant 0 : index
    %c0_0 = arith.constant 0 : index
    %c0_1 = arith.constant 0 : index
    %0 = vector.load %arg1[%c0, %c0_0, %c0_1] : memref<1x128x128xbf16, #tpu.memory_space<vmem>>, vector<1x128x128xbf16>
    %1 = vector.shape_cast %0 : vector<1x128x128xbf16> to vector<128x128xbf16>
    %c0_2 = arith.constant 0 : index
    %c0_3 = arith.constant 0 : index
    %c0_4 = arith.constant 0 : index
    %2 = vector.load %arg2[%c0_2, %c0_3, %c0_4] : memref<1x128x128xbf16, #tpu.memory_space<vmem>>, vector<1x128x128xbf16>
    %3 = vector.shape_cast %2 : vector<1x128x128xbf16> to vector<128x128xbf16>
    %c0_5 = arith.constant 0 : index
    %c0_6 = arith.constant 0 : index
    %4 = vector.load %arg3[%c0_5, %c0_6] : memref<128x256xbf16, #tpu.memory_space<vmem>>, vector<128x256xbf16>
    %c0_7 = arith.constant 0 : index
    %c0_8 = arith.constant 0 : index
    %5 = vector.load %arg4[%c0_7, %c0_8] : memref<128x256xbf16, #tpu.memory_space<vmem>>, vector<128x256xbf16>
    %cst = arith.constant dense<0.000000e+00> : vector<128x256xf32>
    %6 = tpu.matmul %3, %4, %cst {dimension_numbers = #tpu.dot_dimension_numbers<[1], [0], [0], [1], [0, 0, 1, 1], [], []>} : vector<128x128xbf16>, vector<128x256xbf16>, vector<128x256xf32> -> vector<128x256xf32>
    %cst_9 = arith.constant dense<0.000000e+00> : vector<128x256xf32>
    %7 = tpu.matmul %1, %5, %cst_9 {dimension_numbers = #tpu.dot_dimension_numbers<[1], [0], [0], [1], [0, 0, 1, 1], [], []>} : vector<128x128xbf16>, vector<128x256xbf16>, vector<128x256xf32> -> vector<128x256xf32>
    %8 = tpu.iota {dimensions = array<i32: 0>} : vector<128x128xi32>
    %9 = tpu.iota {dimensions = array<i32: 1>} : vector<128x128xi32>
    %10 = arith.cmpi sle, %9, %8 : vector<128x128xi32>
    %11 = vector.extract_strided_slice %6 {offsets = [0, 0], sizes = [128, 128], strides = [1, 1]} : vector<128x256xf32> to vector<128x128xf32>
    %12 = arith.truncf %11 : vector<128x128xf32> to vector<128x128xbf16>
    %13 = vector.extract_strided_slice %7 {offsets = [0, 0], sizes = [128, 128], strides = [1, 1]} : vector<128x256xf32> to vector<128x128xf32>
    %14 = arith.truncf %13 : vector<128x128xf32> to vector<128x128xbf16>
    %cst_10 = arith.constant dense<0.000000e+00> : vector<128x128xf32>
    %15 = tpu.matmul %12, %14, %cst_10 {dimension_numbers = #tpu.dot_dimension_numbers<[1], [1], [0], [0], [0, 0, 1, 0], [], []>} : vector<128x128xbf16>, vector<128x128xbf16>, vector<128x128xf32> -> vector<128x128xf32>
    %cst_11 = arith.constant 0.0883883461 : f32
    %16 = vector.broadcast %cst_11 : f32 to vector<128x128xf32>
    %17 = arith.mulf %15, %16 : vector<128x128xf32>
    %cst_12 = arith.constant -1.000000e+01 : f32
    %cst_13 = arith.constant 1.000000e+01 : f32
    %18 = vector.broadcast %cst_12 : f32 to vector<128x128xf32>
    %19 = arith.maximumf %18, %17 : vector<128x128xf32>
    %20 = vector.broadcast %cst_13 : f32 to vector<128x128xf32>
    %21 = arith.minimumf %20, %19 : vector<128x128xf32>
    %cst_14 = arith.constant 0xFF800000 : f32
    %22 = vector.broadcast %cst_14 : f32 to vector<128x128xf32>
    %23 = arith.select %10, %21, %22 : vector<128x128xi1>, vector<128x128xf32>
    %cst_15 = arith.constant dense<0xFF800000> : vector<128xf32>
    %24 = vector.multi_reduction <maximumf>, %23, %cst_15 [1] : vector<128x128xf32> to vector<128xf32>
    %25 = vector.shape_cast %24 : vector<128xf32> to vector<128x1xf32>
    %26 = vector.broadcast %25 : vector<128x1xf32> to vector<128x128xf32>
    %27 = arith.subf %23, %26 : vector<128x128xf32>
    %28 = math.exp %27 : vector<128x128xf32>
    %cst_16 = arith.constant dense<0.000000e+00> : vector<128xf32>
    %29 = vector.multi_reduction <add>, %28, %cst_16 [1] : vector<128x128xf32> to vector<128xf32>
    %30 = vector.shape_cast %29 : vector<128xf32> to vector<128x1xf32>
    %31 = tpu.reciprocal %30 {approx = true} : vector<128x1xf32> -> vector<128x1xf32>
    %32 = vector.broadcast %31 : vector<128x1xf32> to vector<128x128xf32>
    %33 = arith.mulf %28, %32 : vector<128x128xf32>
    %34 = arith.truncf %33 : vector<128x128xf32> to vector<128x128xbf16>
    %c0_17 = arith.constant 0 : index
    %c0_18 = arith.constant 0 : index
    %c0_19 = arith.constant 0 : index
    %c0_20 = arith.constant 0 : index
    %35 = vector.load %arg5[%c0_17, %c0_18, %c0_19, %c0_20] : memref<1x2x128x128xbf16, #tpu.memory_space<vmem>>, vector<1x1x128x128xbf16>
    %36 = vector.shape_cast %35 : vector<1x1x128x128xbf16> to vector<128x128xbf16>
    %37 = vector.shape_cast %34 : vector<128x128xbf16> to vector<1x1x128x128xbf16>
    tpu.vector_store %arg5[%c0_17, %c0_18, %c0_19, %c0_20], %37 {strides = array<i32>} : memref<1x2x128x128xbf16, #tpu.memory_space<vmem>>, vector<1x1x128x128xbf16>,
    %38 = vector.extract_strided_slice %6 {offsets = [0, 128], sizes = [128, 128], strides = [1, 1]} : vector<128x256xf32> to vector<128x128xf32>
    %39 = arith.truncf %38 : vector<128x128xf32> to vector<128x128xbf16>
    %40 = vector.extract_strided_slice %7 {offsets = [0, 128], sizes = [128, 128], strides = [1, 1]} : vector<128x256xf32> to vector<128x128xf32>
    %41 = arith.truncf %40 : vector<128x128xf32> to vector<128x128xbf16>
    %cst_21 = arith.constant dense<0.000000e+00> : vector<128x128xf32>
    %42 = tpu.matmul %39, %41, %cst_21 {dimension_numbers = #tpu.dot_dimension_numbers<[1], [1], [0], [0], [0, 0, 1, 0], [], []>} : vector<128x128xbf16>, vector<128x128xbf16>, vector<128x128xf32> -> vector<128x128xf32>
    %cst_22 = arith.constant 0.0883883461 : f32
    %43 = vector.broadcast %cst_22 : f32 to vector<128x128xf32>
    %44 = arith.mulf %42, %43 : vector<128x128xf32>
    %cst_23 = arith.constant -1.000000e+01 : f32
    %cst_24 = arith.constant 1.000000e+01 : f32
    %45 = vector.broadcast %cst_23 : f32 to vector<128x128xf32>
    %46 = arith.maximumf %45, %44 : vector<128x128xf32>
    %47 = vector.broadcast %cst_24 : f32 to vector<128x128xf32>
    %48 = arith.minimumf %47, %46 : vector<128x128xf32>
    %cst_25 = arith.constant 0xFF800000 : f32
    %49 = vector.broadcast %cst_25 : f32 to vector<128x128xf32>
    %50 = arith.select %10, %48, %49 : vector<128x128xi1>, vector<128x128xf32>
    %cst_26 = arith.constant dense<0xFF800000> : vector<128xf32>
    %51 = vector.multi_reduction <maximumf>, %50, %cst_26 [1] : vector<128x128xf32> to vector<128xf32>
    %52 = vector.shape_cast %51 : vector<128xf32> to vector<128x1xf32>
    %53 = vector.broadcast %52 : vector<128x1xf32> to vector<128x128xf32>
    %54 = arith.subf %50, %53 : vector<128x128xf32>
    %55 = math.exp %54 : vector<128x128xf32>
    %cst_27 = arith.constant dense<0.000000e+00> : vector<128xf32>
    %56 = vector.multi_reduction <add>, %55, %cst_27 [1] : vector<128x128xf32> to vector<128xf32>
    %57 = vector.shape_cast %56 : vector<128xf32> to vector<128x1xf32>
    %58 = tpu.reciprocal %57 {approx = true} : vector<128x1xf32> -> vector<128x1xf32>
    %59 = vector.broadcast %58 : vector<128x1xf32> to vector<128x128xf32>
    %60 = arith.mulf %55, %59 : vector<128x128xf32>
    %61 = arith.truncf %60 : vector<128x128xf32> to vector<128x128xbf16>
    %c0_28 = arith.constant 0 : index
    %c1 = arith.constant 1 : index
    %c0_29 = arith.constant 0 : index
    %c0_30 = arith.constant 0 : index
    %62 = vector.load %arg5[%c0_28, %c1, %c0_29, %c0_30] : memref<1x2x128x128xbf16, #tpu.memory_space<vmem>>, vector<1x1x128x128xbf16>
    %63 = vector.shape_cast %62 : vector<1x1x128x128xbf16> to vector<128x128xbf16>
    %64 = vector.shape_cast %61 : vector<128x128xbf16> to vector<1x1x128x128xbf16>
    tpu.vector_store %arg5[%c0_28, %c1, %c0_29, %c0_30], %64 {strides = array<i32>} : memref<1x2x128x128xbf16, #tpu.memory_space<vmem>>, vector<1x1x128x128xbf16>,
    return
  }
  func.func @transform_0(%arg0: i32) -> (i32, i32, i32) {
    %c0_i32 = arith.constant 0 : i32
    %c0_i32_0 = arith.constant 0 : i32
    %c0_i32_1 = arith.constant 0 : i32
    return %arg0, %c0_i32, %c0_i32_0 : i32, i32, i32
  }
  func.func @transform_1(%arg0: i32) -> (i32, i32, i32) {
    %c0_i32 = arith.constant 0 : i32
    %c0_i32_0 = arith.constant 0 : i32
    %c0_i32_1 = arith.constant 0 : i32
    return %arg0, %c0_i32, %c0_i32_0 : i32, i32, i32
  }
  func.func @transform_2(%arg0: i32) -> (i32, i32) {
    %c0_i32 = arith.constant 0 : i32
    %c0_i32_0 = arith.constant 0 : i32
    %c0_i32_1 = arith.constant 0 : i32
    return %c0_i32, %c0_i32_0 : i32, i32
  }
  func.func @transform_3(%arg0: i32) -> (i32, i32) {
    %c0_i32 = arith.constant 0 : i32
    %c0_i32_0 = arith.constant 0 : i32
    %c0_i32_1 = arith.constant 0 : i32
    return %c0_i32, %c0_i32_0 : i32, i32
  }
  func.func @transform_4(%arg0: i32) -> (i32, i32, i32, i32) {
    %c0_i32 = arith.constant 0 : i32
    %c0_i32_0 = arith.constant 0 : i32
    %c0_i32_1 = arith.constant 0 : i32
    %c0_i32_2 = arith.constant 0 : i32
    return %arg0, %c0_i32, %c0_i32_0, %c0_i32_1 : i32, i32, i32, i32
  }
}

module attributes {stable_mosaic.version = 11 : i64} {
  func.func @_gd_fused_kernel(%arg0: i32, %arg1: i32, %arg2: i32, %arg3: memref<1x128x128xf32, #tpu.memory_space<vmem>>, %arg4: memref<1x2x128x128xbf16, #tpu.memory_space<vmem>>, %arg5: memref<256x128xbf16, #tpu.memory_space<vmem>>, %arg6: memref<256x128xbf16, #tpu.memory_space<vmem>>, %arg7: memref<1x128x128xf32, #tpu.memory_space<vmem>>, %arg8: memref<128x128xf32, #tpu.memory_space<vmem>>, %arg9: memref<128x128xf32, #tpu.memory_space<vmem>>, %arg10: memref<128x128xf32, #tpu.memory_space<vmem>>) attributes {dimension_semantics = [#tpu.dimension_semantics<parallel>, #tpu.dimension_semantics<arbitrary>, #tpu.dimension_semantics<arbitrary>], iteration_bounds = array<i64: 2, 2, 2>, scalar_prefetch = 0 : i64, scratch_operands = 3 : i64, tpu.core_type = #tpu.core_type<tc>, window_params = [{transform_indices = @transform_0, window_bounds = array<i64: 1, 128, 128>}, {transform_indices = @transform_1, window_bounds = array<i64: 1, 2, 128, 128>}, {transform_indices = @transform_2, window_bounds = array<i64: 256, 128>}, {pipeline_mode = #tpu.pipeline_mode<synchronous>, transform_indices = @transform_3, window_bounds = array<i64: 256, 128>}, {transform_indices = @transform_4, window_bounds = array<i64: 1, 128, 128>}]} {
    %c0_i32 = arith.constant 0 : i32
    %0 = arith.cmpi eq, %arg1, %c0_i32 : i32
    %c0_i32_0 = arith.constant 0 : i32
    %1 = arith.cmpi eq, %arg2, %c0_i32_0 : i32
    %2 = arith.andi %0, %1 : i1
    %3 = arith.extui %2 : i1 to i32
    %c0_i32_1 = arith.constant 0 : i32
    %4 = arith.cmpi ne, %3, %c0_i32_1 : i32
    scf.if %4 {
      %cst_21 = arith.constant 0.000000e+00 : f32
      %35 = vector.broadcast %cst_21 : f32 to vector<128x128xf32>
      %c0_22 = arith.constant 0 : index
      %c0_23 = arith.constant 0 : index
      %36 = vector.load %arg8[%c0_22, %c0_23] : memref<128x128xf32, #tpu.memory_space<vmem>>, vector<128x128xf32>
      tpu.vector_store %arg8[%c0_22, %c0_23], %35 {strides = array<i32>} : memref<128x128xf32, #tpu.memory_space<vmem>>, vector<128x128xf32>,
    } else {
    }
    %c0_i32_2 = arith.constant 0 : i32
    %5 = arith.cmpi eq, %arg2, %c0_i32_2 : i32
    %6 = arith.extui %5 : i1 to i32
    %c0_i32_3 = arith.constant 0 : i32
    %7 = arith.cmpi ne, %6, %c0_i32_3 : i32
    scf.if %7 {
      %cst_21 = arith.constant 0.000000e+00 : f32
      %35 = vector.broadcast %cst_21 : f32 to vector<128x128xf32>
      %c0_22 = arith.constant 0 : index
      %c0_23 = arith.constant 0 : index
      %36 = vector.load %arg9[%c0_22, %c0_23] : memref<128x128xf32, #tpu.memory_space<vmem>>, vector<128x128xf32>
      tpu.vector_store %arg9[%c0_22, %c0_23], %35 {strides = array<i32>} : memref<128x128xf32, #tpu.memory_space<vmem>>, vector<128x128xf32>,
      %cst_24 = arith.constant 0.000000e+00 : f32
      %37 = vector.broadcast %cst_24 : f32 to vector<128x128xf32>
      %c0_25 = arith.constant 0 : index
      %c0_26 = arith.constant 0 : index
      %38 = vector.load %arg10[%c0_25, %c0_26] : memref<128x128xf32, #tpu.memory_space<vmem>>, vector<128x128xf32>
      tpu.vector_store %arg10[%c0_25, %c0_26], %37 {strides = array<i32>} : memref<128x128xf32, #tpu.memory_space<vmem>>, vector<128x128xf32>,
    } else {
    }
    %c0 = arith.constant 0 : index
    %c0_4 = arith.constant 0 : index
    %8 = vector.load %arg5[%c0, %c0_4] : memref<256x128xbf16, #tpu.memory_space<vmem>>, vector<256x128xbf16>
    %c0_5 = arith.constant 0 : index
    %c0_6 = arith.constant 0 : index
    %9 = vector.load %arg8[%c0_5, %c0_6] : memref<128x128xf32, #tpu.memory_space<vmem>>, vector<128x128xf32>
    %10 = arith.truncf %9 : vector<128x128xf32> to vector<128x128xbf16>
    %cst = arith.constant dense<0.000000e+00> : vector<256x128xf32>
    %11 = tpu.matmul %8, %10, %cst {dimension_numbers = #tpu.dot_dimension_numbers<[1], [1], [0], [0], [0, 0, 1, 0], [], []>} : vector<256x128xbf16>, vector<128x128xbf16>, vector<256x128xf32> -> vector<256x128xf32>
    %cst_7 = arith.constant dense<0xFF800000> : vector<256xf32>
    %12 = vector.multi_reduction <maximumf>, %11, %cst_7 [1] : vector<256x128xf32> to vector<256xf32>
    %13 = vector.shape_cast %12 : vector<256xf32> to vector<256x1xf32>
    %14 = vector.broadcast %13 : vector<256x1xf32> to vector<256x128xf32>
    %15 = arith.subf %11, %14 : vector<256x128xf32>
    %16 = math.exp %15 : vector<256x128xf32>
    %cst_8 = arith.constant dense<0.000000e+00> : vector<256xf32>
    %17 = vector.multi_reduction <add>, %16, %cst_8 [1] : vector<256x128xf32> to vector<256xf32>
    %18 = vector.shape_cast %17 : vector<256xf32> to vector<256x1xf32>
    %19 = tpu.reciprocal %18 {approx = true} : vector<256x1xf32> -> vector<256x1xf32>
    %20 = vector.broadcast %19 : vector<256x1xf32> to vector<256x128xf32>
    %21 = arith.mulf %16, %20 : vector<256x128xf32>
    %22 = arith.truncf %21 : vector<256x128xf32> to vector<256x128xbf16>
    %c0_9 = arith.constant 0 : index
    %c0_10 = arith.constant 0 : index
    %23 = vector.load %arg9[%c0_9, %c0_10] : memref<128x128xf32, #tpu.memory_space<vmem>>, vector<128x128xf32>
    %cst_11 = arith.constant dense<0.000000e+00> : vector<128x128xf32>
    %24 = tpu.matmul %22, %8, %cst_11 {dimension_numbers = #tpu.dot_dimension_numbers<[0], [0], [1], [1], [0, 1, 1, 1], [], []>} : vector<256x128xbf16>, vector<256x128xbf16>, vector<128x128xf32> -> vector<128x128xf32>
    %25 = arith.addf %23, %24 : vector<128x128xf32>
    %c0_12 = arith.constant 0 : index
    %c0_13 = arith.constant 0 : index
    %26 = vector.load %arg9[%c0_12, %c0_13] : memref<128x128xf32, #tpu.memory_space<vmem>>, vector<128x128xf32>
    tpu.vector_store %arg9[%c0_12, %c0_13], %25 {strides = array<i32>} : memref<128x128xf32, #tpu.memory_space<vmem>>, vector<128x128xf32>,
    %cst_14 = arith.constant 1.000000e+00 : bf16
    %27 = vector.broadcast %cst_14 : bf16 to vector<256x128xbf16>
    %c0_15 = arith.constant 0 : index
    %c0_16 = arith.constant 0 : index
    %28 = vector.load %arg10[%c0_15, %c0_16] : memref<128x128xf32, #tpu.memory_space<vmem>>, vector<128x128xf32>
    %cst_17 = arith.constant dense<0.000000e+00> : vector<128x128xf32>
    %29 = tpu.matmul %22, %27, %cst_17 {dimension_numbers = #tpu.dot_dimension_numbers<[0], [0], [1], [1], [0, 1, 1, 1], [], []>} : vector<256x128xbf16>, vector<256x128xbf16>, vector<128x128xf32> -> vector<128x128xf32>
    %30 = arith.addf %28, %29 : vector<128x128xf32>
    %c0_18 = arith.constant 0 : index
    %c0_19 = arith.constant 0 : index
    %31 = vector.load %arg10[%c0_18, %c0_19] : memref<128x128xf32, #tpu.memory_space<vmem>>, vector<128x128xf32>
    tpu.vector_store %arg10[%c0_18, %c0_19], %30 {strides = array<i32>} : memref<128x128xf32, #tpu.memory_space<vmem>>, vector<128x128xf32>,
    %c1_i32 = arith.constant 1 : i32
    %32 = arith.cmpi eq, %arg2, %c1_i32 : i32
    %33 = arith.extui %32 : i1 to i32
    %c0_i32_20 = arith.constant 0 : i32
    %34 = arith.cmpi ne, %33, %c0_i32_20 : i32
    scf.if %34 {
      %c0_21 = arith.constant 0 : index
      %c0_22 = arith.constant 0 : index
      %35 = vector.load %arg10[%c0_21, %c0_22] : memref<128x128xf32, #tpu.memory_space<vmem>>, vector<128x128xf32>
      %36 = tpu.reciprocal %35 {approx = true} : vector<128x128xf32> -> vector<128x128xf32>
      %37 = vector.extract_strided_slice %36 {offsets = [0, 0], sizes = [128, 1], strides = [1, 1]} : vector<128x128xf32> to vector<128x1xf32>
      %c0_23 = arith.constant 0 : index
      %c0_24 = arith.constant 0 : index
      %38 = vector.load %arg9[%c0_23, %c0_24] : memref<128x128xf32, #tpu.memory_space<vmem>>, vector<128x128xf32>
      %39 = vector.broadcast %37 : vector<128x1xf32> to vector<128x128xf32>
      %40 = arith.mulf %38, %39 : vector<128x128xf32>
      %c0_25 = arith.constant 0 : index
      %c0_26 = arith.constant 0 : index
      %c0_27 = arith.constant 0 : index
      %41 = vector.load %arg3[%c0_25, %c0_26, %c0_27] : memref<1x128x128xf32, #tpu.memory_space<vmem>>, vector<1x128x128xf32>
      %42 = vector.shape_cast %41 : vector<1x128x128xf32> to vector<128x128xf32>
      %43 = arith.subf %42, %40 : vector<128x128xf32>
      %44 = arith.truncf %43 : vector<128x128xf32> to vector<128x128xbf16>
      %c0_28 = arith.constant 0 : index
      %c0_29 = arith.constant 0 : index
      %c0_30 = arith.constant 0 : index
      %c0_31 = arith.constant 0 : index
      %45 = vector.load %arg4[%c0_28, %c0_29, %c0_30, %c0_31] : memref<1x2x128x128xbf16, #tpu.memory_space<vmem>>, vector<1x1x128x128xbf16>
      %46 = vector.shape_cast %45 : vector<1x1x128x128xbf16> to vector<128x128xbf16>
      %cst_32 = arith.constant dense<0.000000e+00> : vector<128x128xf32>
      %47 = tpu.matmul %46, %44, %cst_32 {dimension_numbers = #tpu.dot_dimension_numbers<[1], [0], [0], [1], [0, 0, 1, 1], [], []>} : vector<128x128xbf16>, vector<128x128xbf16>, vector<128x128xf32> -> vector<128x128xf32>
      %c0_33 = arith.constant 0 : index
      %c1 = arith.constant 1 : index
      %c0_34 = arith.constant 0 : index
      %c0_35 = arith.constant 0 : index
      %48 = vector.load %arg4[%c0_33, %c1, %c0_34, %c0_35] : memref<1x2x128x128xbf16, #tpu.memory_space<vmem>>, vector<1x1x128x128xbf16>
      %49 = vector.shape_cast %48 : vector<1x1x128x128xbf16> to vector<128x128xbf16>
      %cst_36 = arith.constant dense<0.000000e+00> : vector<128x128xf32>
      %50 = tpu.matmul %49, %44, %cst_36 {dimension_numbers = #tpu.dot_dimension_numbers<[1], [0], [0], [1], [0, 0, 1, 1], [], []>} : vector<128x128xbf16>, vector<128x128xbf16>, vector<128x128xf32> -> vector<128x128xf32>
      %51 = tpu.concatenate %47, %50 in 1 : vector<128x128xf32>, vector<128x128xf32> -> vector<128x256xf32>
      %52 = tpu.iota {dimensions = array<i32: 0>} : vector<128x1xi32>
      %53 = arith.sitofp %52 : vector<128x1xi32> to vector<128x1xf32>
      %cst_37 = arith.constant 1.000000e+00 : f32
      %54 = vector.broadcast %cst_37 : f32 to vector<128x1xf32>
      %55 = arith.addf %53, %54 : vector<128x1xf32>
      %56 = tpu.reciprocal %55 {approx = true} : vector<128x1xf32> -> vector<128x1xf32>
      %57 = vector.broadcast %56 : vector<128x1xf32> to vector<128x256xf32>
      %58 = arith.mulf %51, %57 : vector<128x256xf32>
      %59 = arith.truncf %58 : vector<128x256xf32> to vector<128x256xbf16>
      %c0_38 = arith.constant 0 : index
      %c0_39 = arith.constant 0 : index
      %60 = vector.load %arg6[%c0_38, %c0_39] : memref<256x128xbf16, #tpu.memory_space<vmem>>, vector<256x128xbf16>
      %cst_40 = arith.constant dense<0.000000e+00> : vector<128x128xf32>
      %61 = tpu.matmul %59, %60, %cst_40 {dimension_numbers = #tpu.dot_dimension_numbers<[1], [0], [0], [1], [0, 0, 1, 1], [], []>} : vector<128x256xbf16>, vector<256x128xbf16>, vector<128x128xf32> -> vector<128x128xf32>
      %c0_41 = arith.constant 0 : index
      %c0_42 = arith.constant 0 : index
      %62 = vector.load %arg8[%c0_41, %c0_42] : memref<128x128xf32, #tpu.memory_space<vmem>>, vector<128x128xf32>
      %63 = arith.addf %62, %61 : vector<128x128xf32>
      %c0_43 = arith.constant 0 : index
      %c0_44 = arith.constant 0 : index
      %64 = vector.load %arg8[%c0_43, %c0_44] : memref<128x128xf32, #tpu.memory_space<vmem>>, vector<128x128xf32>
      tpu.vector_store %arg8[%c0_43, %c0_44], %63 {strides = array<i32>} : memref<128x128xf32, #tpu.memory_space<vmem>>, vector<128x128xf32>,
      %c0_45 = arith.constant 0 : index
      %c0_46 = arith.constant 0 : index
      %c0_47 = arith.constant 0 : index
      %65 = vector.load %arg7[%c0_45, %c0_46, %c0_47] : memref<1x128x128xf32, #tpu.memory_space<vmem>>, vector<1x128x128xf32>
      %66 = vector.shape_cast %65 : vector<1x128x128xf32> to vector<128x128xf32>
      %67 = vector.shape_cast %63 : vector<128x128xf32> to vector<1x128x128xf32>
      tpu.vector_store %arg7[%c0_45, %c0_46, %c0_47], %67 {strides = array<i32>} : memref<1x128x128xf32, #tpu.memory_space<vmem>>, vector<1x128x128xf32>,
    } else {
    }
    return
  }
  func.func @transform_0(%arg0: i32, %arg1: i32, %arg2: i32) -> (i32, i32, i32) {
    %c0_i32 = arith.constant 0 : i32
    %c0_i32_0 = arith.constant 0 : i32
    %c0_i32_1 = arith.constant 0 : i32
    return %arg0, %c0_i32, %c0_i32_0 : i32, i32, i32
  }
  func.func @transform_1(%arg0: i32, %arg1: i32, %arg2: i32) -> (i32, i32, i32, i32) {
    %c0_i32 = arith.constant 0 : i32
    %c0_i32_0 = arith.constant 0 : i32
    %c0_i32_1 = arith.constant 0 : i32
    %c0_i32_2 = arith.constant 0 : i32
    return %arg0, %c0_i32, %c0_i32_0, %c0_i32_1 : i32, i32, i32, i32
  }
  func.func @transform_2(%arg0: i32, %arg1: i32, %arg2: i32) -> (i32, i32) {
    %c0_i32 = arith.constant 0 : i32
    %c0_i32_0 = arith.constant 0 : i32
    return %arg2, %c0_i32 : i32, i32
  }
  func.func @transform_3(%arg0: i32, %arg1: i32, %arg2: i32) -> (i32, i32) {
    %c0_i32 = arith.constant 0 : i32
    %c0_i32_0 = arith.constant 0 : i32
    %c0_i32_1 = arith.constant 0 : i32
    return %c0_i32, %c0_i32_0 : i32, i32
  }
  func.func @transform_4(%arg0: i32, %arg1: i32, %arg2: i32) -> (i32, i32, i32) {
    %c0_i32 = arith.constant 0 : i32
    %c0_i32_0 = arith.constant 0 : i32
    %c0_i32_1 = arith.constant 0 : i32
    return %arg0, %c0_i32, %c0_i32_0 : i32, i32, i32
  }
}

</mosaic_0001>

<bundles_post_ra>
// kernel: old_model_forward.2
= control target key start
LH: loop header
LB: loop body
LE: loop exit
PB: predicated region body
PF: predicated region fallthrough
CT: control target
= control target key end

     0   :  { %s2031_s15 = smov 0   ;;  %s2702_s0 = inlined_call_operand.vmem [shape: bf16[2,128,128], index: 0, kind: input, shape index: {}]   ;;  %s2703_s1 = inlined_call_operand.vmem [shape: bf16[2,128,128], index: 1, kind: input, shape index: {}]   ;;  %s2704_s2 = inlined_call_operand.vmem [shape: bf16[128,256], index: 2, kind: input, shape index: {}]   ;;  %s2705_s3 = inlined_call_operand.vmem [shape: bf16[128,256], index: 3, kind: input, shape index: {}]   ;;  %s2706_s4 = inlined_call_operand.vmem [shape: bf16[2,2,128,128], index: 4, kind: output, shape index: {}]  }
   0x1 LB: > { %s1447_s16 = sadd.s32 4294967295, %s2004_s15   ;;  %p1451_p0 = scmp.ge.s32.totalorder %s2004_s15, 1  ;;  %s2004_s15 = sphi %s2031_s15, %s14_s15  }
   0x2   : > { %p172_p1 = scmp.lt.s32.totalorder %s2004_s15, 3 }
   0x4   : > { %p173_p2 = pnand %p1451_p0, %p172_p1 }
   0x5   : > { %p203_p3 = scmp.lt.s32.totalorder (!%p173_p2), %s1447_s16, 1 }
   0x6   : > { %176 = sbr.rel (%p173_p2) target bundleno = 941 (0x3ad), region = 36 }
   0xb   : > { %v1548_v0 = vld [vmem:[%s2704_s2 + $0x70] sm:$0xf]  ;;  %v1734_v1 = vld [vmem:[%s2704_s2 + $0x74] sm:$0xf0]  ;;  %v1733_v2 = vld [vmem:[%s2704_s2 + $0x74] sm:$0xf] }
   0xc   : > { %v1549_v3 = vor.u32 %v1734_v1, %v1548_v0  ;;  %v1550_v4 = vld [vmem:[%s2704_s2 + $0x78] sm:$0xf0]  ;;  %v1540_v5 = vld [vmem:[%s2704_s2 + $0x60] sm:$0xf]  ;;  %v1732_v6 = vld [vmem:[%s2704_s2 + $0x64] sm:$0xf0] }
   0xd   : > { %v1553_v7 = vor.u32 %v1733_v2, %v1550_v4  ;;  %v1731_v8 = vld [vmem:[%s2704_s2 + $0x64] sm:$0xf]  ;;  %v1542_v9 = vld [vmem:[%s2704_s2 + $0x68] sm:$0xf0]  ;;  %v1541_v10 = vor.u32 %v1732_v6, %v1540_v5  ;;  %v1532_v12 = vld [vmem:[%s2704_s2 + $0x50] sm:$0xf] }
   0xe   : > { %1846 = vmatpush.bf16.msra.mxu2 %v1549_v3  ;;  %410 = vmatpush.bf16.msra.mxu0 %v1549_v3  ;;  %v1545_v11 = vor.u32 %v1731_v8, %v1542_v9  ;;  %v1730_v13 = vld [vmem:[%s2704_s2 + $0x54] sm:$0xf0]  ;;  %v1729_v14 = vld [vmem:[%s2704_s2 + $0x54] sm:$0xf]  ;;  %v1534_v15 = vld [vmem:[%s2704_s2 + $0x58] sm:$0xf0] }
   0xf   : > { %1854 = vmatpush.bf16.msra.mxu3 %v1553_v7  ;;  %459 = vmatpush.bf16.msra.mxu1 %v1553_v7  ;;  %v1533_v16 = vor.u32 %v1730_v13, %v1532_v12  ;;  %v1537_v17 = vor.u32 %v1729_v14, %v1534_v15  ;;  %v1524_v18 = vld [vmem:[%s2704_s2 + $0x40] sm:$0xf]  ;;  %v1728_v19 = vld [vmem:[%s2704_s2 + $0x44] sm:$0xf0]  ;;  %v1727_v20 = vld [vmem:[%s2704_s2 + $0x44] sm:$0xf] }
  0x10   : > { %v1526_v21 = vld [vmem:[%s2704_s2 + $0x48] sm:$0xf0]  ;;  %v1525_v22 = vor.u32 %v1728_v19, %v1524_v18  ;;  %v1516_v24 = vld [vmem:[%s2704_s2 + $0x30] sm:$0xf]  ;;  %v1726_v25 = vld [vmem:[%s2704_s2 + $0x34] sm:$0xf0] }
  0x11   : > { %v1529_v23 = vor.u32 %v1727_v20, %v1526_v21  ;;  %v1725_v26 = vld [vmem:[%s2704_s2 + $0x34] sm:$0xf]  ;;  %v1518_v27 = vld [vmem:[%s2704_s2 + $0x38] sm:$0xf0]  ;;  %v1517_v28 = vor.u32 %v1726_v25, %v1516_v24  ;;  %v1508_v30 = vld [vmem:[%s2704_s2 + $0x20] sm:$0xf] }
  0x12   : > { %1847 = vmatpush.bf16.msra.mxu2 %v1541_v10  ;;  %411 = vmatpush.bf16.msra.mxu0 %v1541_v10  ;;  %v1521_v29 = vor.u32 %v1725_v26, %v1518_v27  ;;  %v1724_v31 = vld [vmem:[%s2704_s2 + $0x24] sm:$0xf0]  ;;  %v1723_v32 = vld [vmem:[%s2704_s2 + $0x24] sm:$0xf]  ;;  %v1510_v33 = vld [vmem:[%s2704_s2 + $0x28] sm:$0xf0] }
  0x13   : > { %1855 = vmatpush.bf16.msra.mxu3 %v1545_v11  ;;  %460 = vmatpush.bf16.msra.mxu1 %v1545_v11  ;;  %v1509_v34 = vor.u32 %v1724_v31, %v1508_v30  ;;  %v1513_v35 = vor.u32 %v1723_v32, %v1510_v33  ;;  %v1500_v36 = vld [vmem:[%s2704_s2 + $0x10] sm:$0xf]  ;;  %v1722_v37 = vld [vmem:[%s2704_s2 + $0x14] sm:$0xf0]  ;;  %s2708_s16 = smov (!%p203_p3, %s1447_s16), 1 }
  0x14   : > { %v1721_v38 = vld [vmem:[%s2704_s2 + $0x14] sm:$0xf]  ;;  %v1502_v39 = vld [vmem:[%s2704_s2 + $0x18] sm:$0xf0]  ;;  %v1501_v40 = vor.u32 %v1722_v37, %v1500_v36  ;;  %v1492_v41 = vld [vmem:[%s2704_s2] sm:$0xf] }
  0x15   : > { %v1505_v42 = vor.u32 %v1721_v38, %v1502_v39  ;;  %v1720_v43 = vld [vmem:[%s2704_s2 + $0x4] sm:$0xf0]  ;;  %v1719_v44 = vld [vmem:[%s2704_s2 + $0x4] sm:$0xf]  ;;  %s1700_s5 = sshll.u32 %s2708_s16, 6 }
  0x16   : > { %1848 = vmatpush.bf16.msra.mxu2 %v1533_v16  ;;  %412 = vmatpush.bf16.msra.mxu0 %v1533_v16  ;;  %v1494_v45 = vld [vmem:[%s2704_s2 + $0x8] sm:$0xf0]  ;;  %v1644_v46 = vld [vmem:[%s2705_s3 + $0x70] sm:$0xf]  ;;  %v1750_v47 = vld [vmem:[%s2705_s3 + $0x74] sm:$0xf0]  ;;  %v1493_v50 = vor.u32 %v1720_v43, %v1492_v41  ;;  %s2159_s20 = scalar_lea.vmem %s2703_s1, %s1700_s5  ;;  %s2254_s10 = scalar_lea.vmem %s2702_s0, %s1700_s5 }
  0x17   : > { %1856 = vmatpush.bf16.msra.mxu3 %v1537_v17  ;;  %461 = vmatpush.bf16.msra.mxu1 %v1537_v17  ;;  %v1749_v48 = vld [vmem:[%s2705_s3 + $0x74] sm:$0xf]  ;;  %v1646_v49 = vld [vmem:[%s2705_s3 + $0x78] sm:$0xf0]  ;;  %v1497_v51 = vor.u32 %v1719_v44, %v1494_v45  ;;  %v1645_v52 = vor.u32 %v1750_v47, %v1644_v46  ;;  %v1636_v53 = vld [vmem:[%s2705_s3 + $0x60] sm:$0xf] }
  0x18   : > { %v1748_v54 = vld [vmem:[%s2705_s3 + $0x64] sm:$0xf0]  ;;  %v1649_v55 = vor.u32 %v1749_v48, %v1646_v49  ;;  %v1715_v56 = vld [vmem:[%s2159_s20 + $0x20] sm:$0xff]  ;;  %v1638_v58 = vld [vmem:[%s2705_s3 + $0x68] sm:$0xf0]  ;;  %s1702_s5 = sshll.u32 %s2708_s16, 7 }
  0x19   : > { %v1747_v57 = vld [vmem:[%s2705_s3 + $0x64] sm:$0xf]  ;;  %v1637_v59 = vor.u32 %v1748_v54, %v1636_v53  ;;  %v1628_v60 = vld [vmem:[%s2705_s3 + $0x50] sm:$0xf]  ;;  %v1746_v61 = vld [vmem:[%s2705_s3 + $0x54] sm:$0xf0]  ;;  %s2651_s12 = scalar_lea.vmem %s2706_s4, %s1702_s5 }
  0x1a   : > { %1849 = vmatpush.bf16.msra.mxu2 %v1525_v22  ;;  %413 = vmatpush.bf16.msra.mxu0 %v1525_v22  ;;  %v1641_v62 = vor.u32 %v1747_v57, %v1638_v58  ;;  %v1745_v63 = vld [vmem:[%s2705_s3 + $0x54] sm:$0xf]  ;;  %v1630_v0 = vld [vmem:[%s2705_s3 + $0x58] sm:$0xf0]  ;;  %v1629_v1 = vor.u32 %v1746_v61, %v1628_v60  ;;  %v1620_v2 = vld [vmem:[%s2705_s3 + $0x40] sm:$0xf] }
  0x1b   : > { %1857 = vmatpush.bf16.msra.mxu3 %v1529_v23  ;;  %462 = vmatpush.bf16.msra.mxu1 %v1529_v23  ;;  %v1744_v3 = vld [vmem:[%s2705_s3 + $0x44] sm:$0xf0]  ;;  %v1633_v4 = vor.u32 %v1745_v63, %v1630_v0  ;;  %v1743_v5 = vld [vmem:[%s2705_s3 + $0x44] sm:$0xf]  ;;  %v1622_v6 = vld [vmem:[%s2705_s3 + $0x48] sm:$0xf0] }
  0x1c   : > { %v1621_v7 = vor.u32 %v1744_v3, %v1620_v2  ;;  %v1612_v8 = vld [vmem:[%s2705_s3 + $0x30] sm:$0xf]  ;;  %v1742_v9 = vld [vmem:[%s2705_s3 + $0x34] sm:$0xf0]  ;;  %v1625_v10 = vor.u32 %v1743_v5, %v1622_v6  ;;  %v1741_v11 = vld [vmem:[%s2705_s3 + $0x34] sm:$0xf] }
  0x1d   : > { %v1614_v12 = vld [vmem:[%s2705_s3 + $0x38] sm:$0xf0]  ;;  %v1613_v13 = vor.u32 %v1742_v9, %v1612_v8  ;;  %v1604_v14 = vld [vmem:[%s2705_s3 + $0x20] sm:$0xf]  ;;  %v1740_v15 = vld [vmem:[%s2705_s3 + $0x24] sm:$0xf0] }
  0x1e   : > { %1850 = vmatpush.bf16.msra.mxu2 %v1517_v28  ;;  %414 = vmatpush.bf16.msra.mxu0 %v1517_v28  ;;  %v1617_v16 = vor.u32 %v1741_v11, %v1614_v12  ;;  %v1716_v17 = vld [vmem:[%s2159_s20 + $0x28] sm:$0xff]  ;;  %v1605_v18 = vor.u32 %v1740_v15, %v1604_v14  ;;  %v1596_v19 = vld [vmem:[%s2705_s3 + $0x10] sm:$0xf]  ;;  %v1738_v20 = vld [vmem:[%s2705_s3 + $0x14] sm:$0xf0] }
  0x1f   : > { %1858 = vmatpush.bf16.msra.mxu3 %v1521_v29  ;;  %463 = vmatpush.bf16.msra.mxu1 %v1521_v29  ;;  %v1739_v21 = vld [vmem:[%s2705_s3 + $0x24] sm:$0xf]  ;;  %v1597_v22 = vor.u32 %v1738_v20, %v1596_v19  ;;  %v1606_v23 = vld [vmem:[%s2705_s3 + $0x28] sm:$0xf0]  ;;  %v1588_v24 = vld [vmem:[%s2705_s3] sm:$0xf] }
  0x20   : > { %v1609_v25 = vor.u32 %v1739_v21, %v1606_v23  ;;  %v1736_v26 = vld [vmem:[%s2705_s3 + $0x4] sm:$0xf0]  ;;  %v1737_v27 = vld [vmem:[%s2705_s3 + $0x14] sm:$0xf]  ;;  %v1598_v28 = vld [vmem:[%s2705_s3 + $0x18] sm:$0xf0] }
  0x21   : > { %v1601_v29 = vor.u32 %v1737_v27, %v1598_v28  ;;  %v1589_v30 = vor.u32 %v1736_v26, %v1588_v24  ;;  %v1735_v31 = vld [vmem:[%s2705_s3 + $0x4] sm:$0xf]  ;;  %v1590_v32 = vld [vmem:[%s2705_s3 + $0x8] sm:$0xf0]  ;;  %v1705_v38 = vld [vmem:[%s2254_s10 + $0x10] sm:$0xff] }
  0x22   : > { %1851 = vmatpush.bf16.msra.mxu2 %v1509_v34  ;;  %415 = vmatpush.bf16.msra.mxu0 %v1509_v34  ;;  %v1593_v33 = vor.u32 %v1735_v31, %v1590_v32  ;;  %v1717_v34 = vld [vmem:[%s2159_s20 + $0x30] sm:$0xff]  ;;  %v1703_v36 = vld [vmem:[%s2254_s10] sm:$0xff]  ;;  %v1704_v37 = vld [vmem:[%s2254_s10 + $0x8] sm:$0xff] }
  0x23   : > { %1859 = vmatpush.bf16.msra.mxu3 %v1513_v35  ;;  %464 = vmatpush.bf16.msra.mxu1 %v1513_v35  ;;  %v1718_v35 = vld [vmem:[%s2159_s20 + $0x38] sm:$0xff]  ;;  %v1708_v46 = vld [vmem:[%s2254_s10 + $0x28] sm:$0xff]  ;;  %v1709_v53 = vld [vmem:[%s2254_s10 + $0x30] sm:$0xff] }
  0x24   : > { %v1706_v39 = vld [vmem:[%s2254_s10 + $0x18] sm:$0xff]  ;;  %v1711_v9 = vld [vmem:[%s2159_s20] sm:$0xff]  ;;  %v1713_v23 = vld [vmem:[%s2159_s20 + $0x10] sm:$0xff] }
  0x25   : > { %v1710_v60 = vld [vmem:[%s2254_s10 + $0x38] sm:$0xff] }
  0x26   : > { %1852 = vmatpush.bf16.msra.mxu2 %v1501_v40  ;;  %416 = vmatpush.bf16.msra.mxu0 %v1501_v40  ;;  %v1707_v40 = vld [vmem:[%s2254_s10 + $0x20] sm:$0xff] }
  0x27   : > { %1860 = vmatpush.bf16.msra.mxu3 %v1505_v42  ;;  %465 = vmatpush.bf16.msra.mxu1 %v1505_v42 }
  0x2a   : > { %1853 = vmatpush.bf16.msra.mxu2 %v1493_v50  ;;  %417 = vmatpush.bf16.msra.mxu0 %v1493_v50 }
  0x2b   : > { %1861 = vmatpush.bf16.msra.mxu3 %v1497_v51  ;;  %466 = vmatpush.bf16.msra.mxu1 %v1497_v51 }
  0x2d   : > { %438 = vmatmul.bf16.vlgmr.msra.gmra.mxu2 %v1715_v56  ;;  %418 = vmatmul.bf16.vlgmr.msra.gmra.mxu0 %v1711_v9 }
  0x2e   : > { %636 = vmatpush.bf16.msrb.mxu2 %v1645_v52  ;;  %487 = vmatmul.bf16.vlgmr.msra.gmra.mxu3 %v1715_v56 }
  0x2f   : > { %685 = vmatpush.bf16.msrb.mxu3 %v1649_v55  ;;  %467 = vmatmul.bf16.vlgmr.msra.gmra.mxu1 %v1711_v9 }
  0x32   : > { %637 = vmatpush.bf16.msrb.mxu2 %v1637_v59 }
  0x33   : > { %686 = vmatpush.bf16.msrb.mxu3 %v1641_v62 }
  0x36   : > { %638 = vmatpush.bf16.msrb.mxu2 %v1629_v1 }
  0x37   : > { %687 = vmatpush.bf16.msrb.mxu3 %v1633_v4 }
  0x3a   : > { %639 = vmatpush.bf16.msrb.mxu2 %v1621_v7 }
  0x3b   : > { %688 = vmatpush.bf16.msrb.mxu3 %v1625_v10 }
  0x3d   : > { %443 = vmatmul.bf16.gmra.mxu2 %v1716_v17 }
  0x3e   : > { %640 = vmatpush.bf16.msrb.mxu2 %v1613_v13  ;;  %492 = vmatmul.bf16.gmra.mxu3 %v1716_v17 }
  0x3f   : > { %689 = vmatpush.bf16.msrb.mxu3 %v1617_v16  ;;  %v1712_v16 = vld [vmem:[%s2159_s20 + $0x8] sm:$0xff] }
  0x40   : > { %423 = vmatmul.bf16.gmra.mxu0 %v1712_v16  ;;  %472 = vmatmul.bf16.gmra.mxu1 %v1712_v16 }
  0x42   : > { %641 = vmatpush.bf16.msrb.mxu2 %v1605_v18 }
  0x43   : > { %690 = vmatpush.bf16.msrb.mxu3 %v1609_v25 }
  0x46   : > { %642 = vmatpush.bf16.msrb.mxu2 %v1597_v22 }
  0x47   : > { %691 = vmatpush.bf16.msrb.mxu3 %v1601_v29 }
  0x4a   : > { %643 = vmatpush.bf16.msrb.mxu2 %v1589_v30  ;;  %v1714_v30 = vld [vmem:[%s2159_s20 + $0x18] sm:$0xff] }
  0x4b   : > { %692 = vmatpush.bf16.msrb.mxu3 %v1593_v33 }
  0x4d   : > { %448 = vmatmul.bf16.gmra.mxu2 %v1717_v34 }
  0x4e   : > { %497 = vmatmul.bf16.gmra.mxu3 %v1717_v34 }
  0x50   : > { %428 = vmatmul.bf16.gmra.mxu0 %v1713_v23  ;;  %477 = vmatmul.bf16.gmra.mxu1 %v1713_v23 }
  0x5d   : > { %453 = vmatmul.bf16.gmra.mxu2 %v1718_v35 }
  0x5e   : > { %502 = vmatmul.bf16.gmra.mxu3 %v1718_v35 }
  0x60   : > { %433 = vmatmul.bf16.gmra.mxu0 %v1714_v30  ;;  %482 = vmatmul.bf16.gmra.mxu1 %v1714_v30 }
  0x6d   : > { %644 = vmatmul.bf16.vlgmr.msrb.gmra.mxu2 %v1703_v36 }
  0x6e   : > { %693 = vmatmul.bf16.vlgmr.msrb.gmra.mxu3 %v1703_v36 }
  0x7d   : > { %649 = vmatmul.bf16.gmra.mxu2 %v1704_v37 }
  0x7e   : > { %698 = vmatmul.bf16.gmra.mxu3 %v1704_v37 }
  0x8d   : > { %654 = vmatmul.bf16.gmra.mxu2 %v1705_v38 }
  0x8e   : > { %703 = vmatmul.bf16.gmra.mxu3 %v1705_v38 }
  0x9d   : > { %659 = vmatmul.bf16.gmra.mxu2 %v1706_v39 }
  0x9e   : > { %708 = vmatmul.bf16.gmra.mxu3 %v1706_v39 }
  0xaa   : > { %v419_v30 = vpop.f32.mrf.mxu0 }
  0xad   : > { %664 = vmatmul.bf16.gmra.mxu2 %v1707_v40 }
  0xae   : > { %713 = vmatmul.bf16.gmra.mxu3 %v1707_v40 }
  0xb0   : > { %v2261_v41 = vpop.f32.mrf.mxu2 }
  0xb1   : > { %v2263_v42 = vpop.f32.mrf.mxu3 }
  0xb8   : > { %v2265_v43 = vpop.f32.mrf.mxu2 }
  0xb9   : > { %v773_v44 = vpack.c.bf16 %v2265_v43, %v2261_v41  ;;  %v2269_v45 = vpop.f32.mrf.mxu3  ;;  %v734_v41 = vlaneseq }
  0xba   : > { %v1078_v47 = vpack.c.bf16 %v2269_v45, %v2263_v42 }
  0xbb   : > { %v2373_v42 = vshrl.u32 %v734_v41, 7  ;;  %v2375_v43 = vand.u32 127, %v734_v41 }
  0xbd   : > { %669 = vmatmul.bf16.gmra.mxu2 %v1708_v46  ;;  %vm753_vm0 = vcmp.le.s32.totalorder %v2375_v43, %v2373_v42 }
  0xbe   : > { %718 = vmatmul.bf16.gmra.mxu3 %v1708_v46 }
  0xc0   : > { %v2274_v48 = vpop.f32.mrf.mxu2 }
  0xc1   : > { %v2276_v49 = vpop.f32.mrf.mxu3 }
  0xc8   : > { %v2278_v50 = vpop.f32.mrf.mxu2 }
  0xc9   : > { %v774_v51 = vpack.c.bf16 %v2278_v50, %v2274_v48  ;;  %v2282_v52 = vpop.f32.mrf.mxu3 }
  0xca   : > { %v1079_v54 = vpack.c.bf16 %v2282_v52, %v2276_v49 }
  0xcd   : > { %674 = vmatmul.bf16.gmra.mxu2 %v1709_v53 }
  0xce   : > { %723 = vmatmul.bf16.gmra.mxu3 %v1709_v53 }
  0xd0   : > { %v2287_v55 = vpop.f32.mrf.mxu2 }
  0xd1   : > { %v2289_v56 = vpop.f32.mrf.mxu3 }
  0xd8   : > { %v2291_v57 = vpop.f32.mrf.mxu2 }
  0xd9   : > { %v775_v58 = vpack.c.bf16 %v2291_v57, %v2287_v55  ;;  %v2295_v59 = vpop.f32.mrf.mxu3 }
  0xda   : > { %v1080_v61 = vpack.c.bf16 %v2295_v59, %v2289_v56 }
  0xdd   : > { %679 = vmatmul.bf16.gmra.mxu2 %v1710_v60 }
  0xde   : > { %728 = vmatmul.bf16.gmra.mxu3 %v1710_v60 }
  0xe0   : > { %v2300_v62 = vpop.f32.mrf.mxu2 }
  0xe1   : > { %v2302_v63 = vpop.f32.mrf.mxu3 }
  0xe8   : > { %v2304_v0 = vpop.f32.mrf.mxu2 }
  0xe9   : > { %v776_v1 = vpack.c.bf16 %v2304_v0, %v2300_v62  ;;  %v2308_v2 = vpop.f32.mrf.mxu3  ;;  %v737_v62 = vadd.s32 16, %v2373_v42 }
  0xea   : > { %v1081_v3 = vpack.c.bf16 %v2308_v2, %v2302_v63 }
  0xeb   : > { %vm755_vm2 = vcmp.le.s32.totalorder %v2375_v43, %v737_v62 }
  0xf0   : > { %v2312_v4 = vpop.f32.mrf.mxu2 }
  0xf1   : > { %v2314_v5 = vpop.f32.mrf.mxu3 }
  0xf8   : > { %v2316_v6 = vpop.f32.mrf.mxu2 }
  0xf9   : > { %v777_v7 = vpack.c.bf16 %v2316_v6, %v2312_v4  ;;  %v2320_v8 = vpop.f32.mrf.mxu3 }
  0xfa   : > { %v1082_v10 = vpack.c.bf16 %v2320_v8, %v2314_v5 }
 0x100   : > { %v2325_v11 = vpop.f32.mrf.mxu2 }
 0x101   : > { %v2327_v12 = vpop.f32.mrf.mxu3 }
 0x108   : > { %v2329_v13 = vpop.f32.mrf.mxu2 }
 0x109   : > { %v778_v14 = vpack.c.bf16 %v2329_v13, %v2325_v11  ;;  %v2333_v15 = vpop.f32.mrf.mxu3 }
 0x10a   : > { %v1083_v17 = vpack.c.bf16 %v2333_v15, %v2327_v12 }
 0x110   : > { %v655_v18 = vpop.f32.mrf.mxu2 }
 0x111   : > { %v704_v19 = vpop.f32.mrf.mxu3 }
 0x118   : > { %v657_v20 = vpop.f32.mrf.mxu2 }
 0x119   : > { %v779_v21 = vpack.c.bf16 %v657_v20, %v655_v18  ;;  %v706_v22 = vpop.f32.mrf.mxu3 }
 0x11a   : > { %v1084_v24 = vpack.c.bf16 %v706_v22, %v704_v19 }
 0x120   : > { %v660_v25 = vpop.f32.mrf.mxu2 }
 0x121   : > { %v709_v26 = vpop.f32.mrf.mxu3 }
 0x128   : > { %v662_v27 = vpop.f32.mrf.mxu2 }
 0x129   : > { %v780_v28 = vpack.c.bf16 %v662_v27, %v660_v25  ;;  %v711_v29 = vpop.f32.mrf.mxu3 }
 0x12a   : > { %v1085_v31 = vpack.c.bf16 %v711_v29, %v709_v26  ;;  %v468_v29 = vpop.f32.mrf.mxu1 }
 0x130   : > { %v665_v32 = vpop.f32.mrf.mxu2 }
 0x131   : > { %v714_v33 = vpop.f32.mrf.mxu3 }
 0x138   : > { %v667_v34 = vpop.f32.mrf.mxu2 }
 0x139   : > { %v781_v35 = vpack.c.bf16 %v667_v34, %v665_v32  ;;  %v716_v36 = vpop.f32.mrf.mxu3  ;;  %v470_v32 = vpop.f32.mrf.mxu1 }
 0x13a   : > { %v1086_v37 = vpack.c.bf16 %v716_v36, %v714_v33  ;;  %v421_v33 = vpop.f32.mrf.mxu0 }
 0x140   : > { %v670_v38 = vpop.f32.mrf.mxu2 }
 0x141   : > { %v719_v39 = vpop.f32.mrf.mxu3  ;;  %v473_v34 = vpop.f32.mrf.mxu1 }
 0x148   : > { %v672_v40 = vpop.f32.mrf.mxu2 }
 0x149   : > { %v721_v46 = vpop.f32.mrf.mxu3  ;;  %v782_v26 = vpack.c.bf16 %v672_v40, %v670_v38 }
 0x14a   : > { %v1087_v27 = vpack.c.bf16 %v721_v46, %v719_v39 }
 0x150   : > { %v675_v53 = vpop.f32.mrf.mxu2 }
 0x151   : > { %v724_v60 = vpop.f32.mrf.mxu3 }
 0x158   : > { %v677_v9 = vpop.f32.mrf.mxu2 }
 0x159   : > { %v726_v12 = vpop.f32.mrf.mxu3  ;;  %v783_v23 = vpack.c.bf16 %v677_v9, %v675_v53 }
 0x15a   : > { %v1088_v25 = vpack.c.bf16 %v726_v12, %v724_v60  ;;  %v738_v12 = vadd.s32 24, %v2373_v42 }
 0x15c   : > { %vm756_vm3 = vcmp.le.s32.totalorder %v2375_v43, %v738_v12 }
 0x160   : > { %v680_v15 = vpop.f32.mrf.mxu2 }
 0x161   : > { %v729_v16 = vpop.f32.mrf.mxu3 }
 0x168   : > { %v682_v18 = vpop.f32.mrf.mxu2 }
 0x169   : > { %v784_v19 = vpack.c.bf16 %v682_v18, %v680_v15  ;;  %v731_v20 = vpop.f32.mrf.mxu3 }
 0x16a   : > { %v1089_v22 = vpack.c.bf16 %v731_v20, %v729_v16 }
 0x16b   : > { %785 = vmatpush.bf16.xpose.msrb.mxu0 %v784_v19 }
 0x16c   : > { %1090 = vmatpush.bf16.xpose.msrb.mxu1 %v1089_v22 }
 0x173   : > { %786 = vmatpush.bf16.xpose.msrb.mxu0 %v783_v23 }
 0x174   : > { %1091 = vmatpush.bf16.xpose.msrb.mxu1 %v1088_v25 }
 0x17b   : > { %787 = vmatpush.bf16.xpose.msrb.mxu0 %v782_v26  ;;  %v739_v26 = vadd.s32 32, %v2373_v42 }
 0x17c   : > { %1092 = vmatpush.bf16.xpose.msrb.mxu1 %v1087_v27 }
 0x17d   : > { %vm757_vm4 = vcmp.le.s32.totalorder %v2375_v43, %v739_v26 }
 0x183   : > { %788 = vmatpush.bf16.xpose.msrb.mxu0 %v781_v35  ;;  %v424_v35 = vpop.f32.mrf.mxu0 }
 0x184   : > { %1093 = vmatpush.bf16.xpose.msrb.mxu1 %v1086_v37 }
 0x18b   : > { %789 = vmatpush.bf16.xpose.msrb.mxu0 %v780_v28  ;;  %v1074_v28 = vpack.c.bf16 %v470_v32, %v468_v29 }
 0x18c   : > { %1094 = vmatpush.bf16.xpose.msrb.mxu1 %v1085_v31  ;;  %v426_v31 = vpop.f32.mrf.mxu0 }
 0x193   : > { %790 = vmatpush.bf16.xpose.msrb.mxu0 %v779_v21  ;;  %v769_v21 = vpack.c.bf16 %v421_v33, %v419_v30 }
 0x194   : > { %1095 = vmatpush.bf16.xpose.msrb.mxu1 %v1084_v24  ;;  %v475_v24 = vpop.f32.mrf.mxu1  ;;  %v429_v13 = vpop.f32.mrf.mxu0 }
 0x195   : > { %v1075_v11 = vpack.c.bf16 %v475_v24, %v473_v34 }
 0x19b   : > { %791 = vmatpush.bf16.xpose.msrb.mxu0 %v778_v14  ;;  %v770_v14 = vpack.c.bf16 %v426_v31, %v424_v35 }
 0x19c   : > { %1096 = vmatpush.bf16.xpose.msrb.mxu1 %v1083_v17  ;;  %v478_v36 = vpop.f32.mrf.mxu1  ;;  %v431_v4 = vpop.f32.mrf.mxu0 }
 0x1a3   : > { %792 = vmatpush.bf16.xpose.msrb.mxu0 %v777_v7  ;;  %v771_v7 = vpack.c.bf16 %v431_v4, %v429_v13 }
 0x1a4   : > { %1097 = vmatpush.bf16.xpose.msrb.mxu1 %v1082_v10  ;;  %v480_v17 = vpop.f32.mrf.mxu1  ;;  %v434_v5 = vpop.f32.mrf.mxu0 }
 0x1a5   : > { %v1076_v6 = vpack.c.bf16 %v480_v17, %v478_v36  ;;  %v741_v17 = vadd.s32 48, %v2373_v42 }
 0x1a7   : > { %vm759_vm6 = vcmp.le.s32.totalorder %v2375_v43, %v741_v17 }
 0x1aa   : > { %793 = vmatmul.bf16.vlgmr.msrb.gmra.mxu0 %v769_v21  ;;  %v740_v21 = vadd.s32 40, %v2373_v42 }
 0x1ab   : > { %1098 = vmatmul.bf16.vlgmr.msrb.gmra.mxu1 %v1074_v28 }
 0x1ac   : > { %v483_v37 = vpop.f32.mrf.mxu1  ;;  %v436_v10 = vpop.f32.mrf.mxu0  ;;  %vm758_vm5 = vcmp.le.s32.totalorder %v2375_v43, %v740_v21  ;;  %v746_v21 = vadd.s32 88, %v2373_v42 }
 0x1ad   : > { %v772_v39 = vpack.c.bf16 %v436_v10, %v434_v5 }
 0x1ae   : > { %vm764_vm11 = vcmp.le.s32.totalorder %v2375_v43, %v746_v21 }
 0x1b4   : > { %v485_v8 = vpop.f32.mrf.mxu1 }
 0x1b5   : > { %v1077_v38 = vpack.c.bf16 %v485_v8, %v483_v37 }
 0x1ba   : > { %798 = vmatmul.bf16.gmra.mxu0 %v770_v14 }
 0x1bb   : > { %1103 = vmatmul.bf16.gmra.mxu1 %v1075_v11 }
 0x1ca   : > { %803 = vmatmul.bf16.gmra.mxu0 %v771_v7 }
 0x1cb   : > { %1108 = vmatmul.bf16.gmra.mxu1 %v1076_v6 }
 0x1da   : > { %808 = vmatmul.bf16.gmra.mxu0 %v772_v39  ;;  %v742_v39 = vadd.s32 56, %v2373_v42 }
 0x1db   : > { %1113 = vmatmul.bf16.gmra.mxu1 %v1077_v38 }
 0x1dc   : > { %vm760_vm7 = vcmp.le.s32.totalorder %v2375_v43, %v742_v39 }
 0x1ea   : > { %813 = vmatmul.bf16.gmra.mxu0 %v773_v44 }
 0x1eb   : > { %1118 = vmatmul.bf16.gmra.mxu1 %v1078_v47 }
 0x1fa   : > { %818 = vmatmul.bf16.gmra.mxu0 %v774_v51  ;;  %v736_v51 = vadd.s32 8, %v2373_v42 }
 0x1fb   : > { %1123 = vmatmul.bf16.gmra.mxu1 %v1079_v54 }
 0x1fc   : > { %vm754_vm1 = vcmp.le.s32.totalorder %v2375_v43, %v736_v51 }
 0x20a   : > { %823 = vmatmul.bf16.gmra.mxu0 %v775_v58 }
 0x20b   : > { %1128 = vmatmul.bf16.gmra.mxu1 %v1080_v61 }
 0x21a   : > { %828 = vmatmul.bf16.gmra.mxu0 %v776_v1 }
 0x21b   : > { %1133 = vmatmul.bf16.gmra.mxu1 %v1081_v3 }
 0x227   : > { %v794_v44 = vpop.f32.mrf.mxu0 }
 0x228   : > { %v834_v45 = vmul.f32 0.088388346, %v794_v44  ;;  %v1099_v47 = vpop.f32.mrf.mxu1 }
 0x229   : > { %v1139_v49 = vmul.f32 0.088388346, %v1099_v47 }
 0x22a   : > { %v1650_v48 = vclamps-f32 %v834_v45, 10.0 }
 0x22b   : > { %v1666_v54 = vclamps-f32 %v1139_v49, 10.0 }
 0x22c   : > { %v2379_v50 = vsel %vm753_vm0, %v1650_v48, -inf }
 0x22d   : > { %898 = vmax.xlane.f32.xlu0 %v2379_v50  ;;  %v2384_v59 = vsel %vm753_vm0, %v1666_v54, -inf  ;;  %v743_v54 = vadd.s32 64, %v2373_v42 }
 0x22f   : > { %v796_v52 = vpop.f32.mrf.mxu0  ;;  %vm761_vm8 = vcmp.le.s32.totalorder %v2375_v43, %v743_v54 }
 0x230   : > { %v1101_v55 = vpop.f32.mrf.mxu1  ;;  %v835_v58 = vmul.f32 0.088388346, %v796_v52 }
 0x231   : > { %v1140_v56 = vmul.f32 0.088388346, %v1101_v55 }
 0x232   : > { %v1651_v0 = vclamps-f32 %v835_v58, 10.0 }
 0x233   : > { %v1667_v57 = vclamps-f32 %v1140_v56, 10.0 }
 0x234   : > { %v2396_v53 = vsel %vm754_vm1, %v1651_v0, -inf }
 0x235   : > { %v2388_v61 = vsel %vm754_vm1, %v1667_v57, -inf  ;;  %1203 = vmax.xlane.f32.xlu0 %v2384_v59 }
 0x236   : > { %1205 = vmax.xlane.f32.xlu1 %v2388_v61 }
 0x237   : > { %v799_v63 = vpop.f32.mrf.mxu0 }
 0x238   : > { %v836_v1 = vmul.f32 0.088388346, %v799_v63  ;;  %v1104_v2 = vpop.f32.mrf.mxu1 }
 0x239   : > { %v1141_v3 = vmul.f32 0.088388346, %v1104_v2  ;;  %v744_v2 = vadd.s32 72, %v2373_v42 }
 0x23a   : > { %v1652_v40 = vclamps-f32 %v836_v1, 10.0 }
 0x23b   : > { %v1668_v46 = vclamps-f32 %v1141_v3, 10.0  ;;  %vm762_vm9 = vcmp.le.s32.totalorder %v2375_v43, %v744_v2  ;;  %v749_v2 = vadd.s32 112, %v2373_v42 }
 0x23c   : > { %v2398_v60 = vsel %vm755_vm2, %v1652_v40, -inf }
 0x23d   : > { %v2400_v9 = vsel %vm755_vm2, %v1668_v46, -inf  ;;  %900 = vmax.xlane.f32.xlu0 %v2396_v53  ;;  %vm767_vm14 = vcmp.le.s32.totalorder %v2375_v43, %v749_v2 }
 0x23e   : > { %1207 = vmax.xlane.f32.xlu2 %v2400_v9  ;;  %902 = vmax.xlane.f32.xlu1 %v2398_v60 }
 0x23f   : > { %v801_v15 = vpop.f32.mrf.mxu0 }
 0x240   : > { %v837_v16 = vmul.f32 0.088388346, %v801_v15  ;;  %v1106_v18 = vpop.f32.mrf.mxu1 }
 0x241   : > { %v1142_v19 = vmul.f32 0.088388346, %v1106_v18 }
 0x242   : > { %v1653_v20 = vclamps-f32 %v837_v16, 10.0 }
 0x243   : > { %v1669_v22 = vclamps-f32 %v1142_v19, 10.0 }
 0x244   : > { %v2407_v23 = vsel %vm756_vm3, %v1653_v20, -inf  ;;  %v745_v20 = vadd.s32 80, %v2373_v42 }
 0x245   : > { %v2409_v25 = vsel %vm756_vm3, %v1669_v22, -inf }
 0x246   : > { %1209 = vmax.xlane.f32.xlu0 %v2409_v25  ;;  %904 = vmax.xlane.f32.xlu1 %v2407_v23  ;;  %vm763_vm10 = vcmp.le.s32.totalorder %v2375_v43, %v745_v20 }
 0x247   : > { %v804_v27 = vpop.f32.mrf.mxu0 }
 0x248   : > { %v838_v29 = vmul.f32 0.088388346, %v804_v27  ;;  %v1109_v30 = vpop.f32.mrf.mxu1 }
 0x249   : > { %v1143_v32 = vmul.f32 0.088388346, %v1109_v30 }
 0x24a   : > { %v1654_v33 = vclamps-f32 %v838_v29, 10.0 }
 0x24b   : > { %v1670_v34 = vclamps-f32 %v1143_v32, 10.0 }
 0x24c   : > { %v2415_v35 = vsel %vm757_vm4, %v1654_v33, -inf }
 0x24d   : > { %v2417_v28 = vsel %vm757_vm4, %v1670_v34, -inf  ;;  %906 = vmax.xlane.f32.xlu2 %v2415_v35 }
 0x24e   : > { %1211 = vmax.xlane.f32.xlu1 %v2417_v28 }
 0x24f   : > { %v806_v24 = vpop.f32.mrf.mxu0 }
 0x250   : > { %v839_v31 = vmul.f32 0.088388346, %v806_v24  ;;  %v1111_v36 = vpop.f32.mrf.mxu1 }
 0x251   : > { %v1144_v13 = vmul.f32 0.088388346, %v1111_v36 }
 0x252   : > { %v1655_v11 = vclamps-f32 %v839_v31, 10.0 }
 0x253   : > { %v1671_v6 = vclamps-f32 %v1144_v13, 10.0 }
 0x254   : > { %v2423_v14 = vsel %vm758_vm5, %v1655_v11, -inf }
 0x255   : > { %908 = vmax.xlane.f32.xlu2 %v2423_v14  ;;  %v2428_v10 = vsel %vm758_vm5, %v1671_v6, -inf }
 0x257   : > { %v809_v4 = vpop.f32.mrf.mxu0 }
 0x258   : > { %v840_v7 = vmul.f32 0.088388346, %v809_v4  ;;  %v1114_v37 = vpop.f32.mrf.mxu1 }
 0x259   : > { %v1145_v8 = vmul.f32 0.088388346, %v1114_v37 }
 0x25a   : > { %v1656_v5 = vclamps-f32 %v840_v7, 10.0  ;;  %v747_v7 = vadd.s32 96, %v2373_v42 }
 0x25b   : > { %v1672_v44 = vclamps-f32 %v1145_v8, 10.0 }
 0x25c   : > { %v2430_v38 = vsel %vm759_vm6, %v1656_v5, -inf  ;;  %vm765_vm12 = vcmp.le.s32.totalorder %v2375_v43, %v747_v7 }
 0x25d   : > { %1213 = vmax.xlane.f32.xlu2 %v2428_v10  ;;  %910 = vmax.xlane.f32.xlu0 %v2430_v38  ;;  %v2436_v51 = vsel %vm759_vm6, %v1672_v44, -inf }
 0x25f   : > { %v811_v41 = vpop.f32.mrf.mxu0 }
 0x260   : > { %v841_v45 = vmul.f32 0.088388346, %v811_v41  ;;  %v1116_v47 = vpop.f32.mrf.mxu1 }
 0x261   : > { %v1146_v49 = vmul.f32 0.088388346, %v1116_v47 }
 0x262   : > { %v1657_v48 = vclamps-f32 %v841_v45, 10.0 }
 0x263   : > { %v1673_v56 = vclamps-f32 %v1146_v49, 10.0 }
 0x264   : > { %v2438_v52 = vsel %vm760_vm7, %v1657_v48, -inf  ;;  %v748_v48 = vadd.s32 104, %v2373_v42 }
 0x265   : > { %1215 = vmax.xlane.f32.xlu0 %v2436_v51  ;;  %912 = vmax.xlane.f32.xlu1 %v2438_v52  ;;  %v2444_v0 = vsel %vm760_vm7, %v1673_v56, -inf }
 0x266   : > { %vm766_vm13 = vcmp.le.s32.totalorder %v2375_v43, %v748_v48 }
 0x267   : > { %v814_v55 = vpop.f32.mrf.mxu0 }
 0x268   : > { %v842_v57 = vmul.f32 0.088388346, %v814_v55  ;;  %v1119_v58 = vpop.f32.mrf.mxu1 }
 0x269   : > { %v1147_v63 = vmul.f32 0.088388346, %v1119_v58 }
 0x26a   : > { %v1658_v62 = vclamps-f32 %v842_v57, 10.0 }
 0x26b   : > { %v1674_v40 = vclamps-f32 %v1147_v63, 10.0 }
 0x26c   : > { %v2446_v1 = vsel %vm761_vm8, %v1658_v62, -inf }
 0x26d   : > { %1217 = vmax.xlane.f32.xlu1 %v2444_v0  ;;  %914 = vmax.xlane.f32.xlu2 %v2446_v1  ;;  %v2452_v18 = vsel %vm761_vm8, %v1674_v40, -inf }
 0x26f   : > { %v816_v3 = vpop.f32.mrf.mxu0 }
 0x270   : > { %v843_v46 = vmul.f32 0.088388346, %v816_v3  ;;  %v1121_v12 = vpop.f32.mrf.mxu1 }
 0x271   : > { %v1148_v16 = vmul.f32 0.088388346, %v1121_v12 }
 0x272   : > { %v1659_v15 = vclamps-f32 %v843_v46, 10.0 }
 0x273   : > { %v1675_v26 = vclamps-f32 %v1148_v16, 10.0 }
 0x274   : > { %v2454_v19 = vsel %vm762_vm9, %v1659_v15, -inf }
 0x275   : > { %1219 = vmax.xlane.f32.xlu2 %v2452_v18  ;;  %916 = vmax.xlane.f32.xlu0 %v2454_v19  ;;  %v2460_v33 = vsel %vm762_vm9, %v1675_v26, -inf  ;;  %v750_v26 = vadd.s32 120, %v2373_v42 }
 0x277   : > { %v819_v22 = vpop.f32.mrf.mxu0  ;;  %vm768_vm15 = vcmp.le.s32.totalorder %v2375_v43, %v750_v26 }
 0x278   : > { %v844_v27 = vmul.f32 0.088388346, %v819_v22  ;;  %v1124_v29 = vpop.f32.mrf.mxu1 }
 0x279   : > { %v1149_v32 = vmul.f32 0.088388346, %v1124_v29 }
 0x27a   : > { %v1660_v30 = vclamps-f32 %v844_v27, 10.0 }
 0x27b   : > { %v1676_v31 = vclamps-f32 %v1149_v32, 10.0 }
 0x27c   : > { %v2462_v34 = vsel %vm763_vm10, %v1660_v30, -inf }
 0x27d   : > { %1221 = vmax.xlane.f32.xlu0 %v2460_v33  ;;  %918 = vmax.xlane.f32.xlu1 %v2462_v34  ;;  %v2468_v4 = vsel %vm763_vm10, %v1676_v31, -inf }
 0x27f   : > { %v821_v24 = vpop.f32.mrf.mxu0 }
 0x280   : > { %v845_v36 = vmul.f32 0.088388346, %v821_v24  ;;  %v1126_v11 = vpop.f32.mrf.mxu1 }
 0x281   : > { %v1150_v17 = vmul.f32 0.088388346, %v1126_v11 }
 0x282   : > { %v1661_v13 = vclamps-f32 %v845_v36, 10.0 }
 0x283   : > { %v1677_v5 = vclamps-f32 %v1150_v17, 10.0 }
 0x284   : > { %v2470_v6 = vsel %vm764_vm11, %v1661_v13, -inf }
 0x285   : > { %1223 = vmax.xlane.f32.xlu1 %v2468_v4  ;;  %920 = vmax.xlane.f32.xlu2 %v2470_v6  ;;  %v2476_v45 = vsel %vm764_vm11, %v1677_v5, -inf }
 0x287   : > { %v824_v37 = vpop.f32.mrf.mxu0 }
 0x288   : > { %v846_v8 = vmul.f32 0.088388346, %v824_v37  ;;  %v1129_v39 = vpop.f32.mrf.mxu1 }
 0x289   : > { %v1151_v44 = vmul.f32 0.088388346, %v1129_v39 }
 0x28a   : > { %v1662_v41 = vclamps-f32 %v846_v8, 10.0 }
 0x28b   : > { %v1678_v54 = vclamps-f32 %v1151_v44, 10.0 }
 0x28c   : > { %v2478_v47 = vsel %vm765_vm12, %v1662_v41, -inf }
 0x28d   : > { %1225 = vmax.xlane.f32.xlu2 %v2476_v45  ;;  %922 = vmax.xlane.f32.xlu0 %v2478_v47  ;;  %v2484_v62 = vsel %vm765_vm12, %v1678_v54, -inf }
 0x28f   : > { %v826_v49 = vpop.f32.mrf.mxu0 }
 0x290   : > { %v847_v55 = vmul.f32 0.088388346, %v826_v49  ;;  %v1131_v56 = vpop.f32.mrf.mxu1 }
 0x291   : > { %v1152_v58 = vmul.f32 0.088388346, %v1131_v56 }
 0x292   : > { %v1663_v57 = vclamps-f32 %v847_v55, 10.0 }
 0x293   : > { %v1679_v40 = vclamps-f32 %v1152_v58, 10.0 }
 0x294   : > { %v2486_v63 = vsel %vm766_vm13, %v1663_v57, -inf }
 0x295   : > { %1227 = vmax.xlane.f32.xlu0 %v2484_v62  ;;  %924 = vmax.xlane.f32.xlu1 %v2486_v63  ;;  %v2492_v20 = vsel %vm766_vm13, %v1679_v40, -inf }
 0x297   : > { %v829_v3 = vpop.f32.mrf.mxu0 }
 0x298   : > { %v848_v46 = vmul.f32 0.088388346, %v829_v3  ;;  %v1134_v12 = vpop.f32.mrf.mxu1 }
 0x299   : > { %v1153_v16 = vmul.f32 0.088388346, %v1134_v12 }
 0x29a   : > { %v1664_v15 = vclamps-f32 %v848_v46, 10.0 }
 0x29b   : > { %v1680_v29 = vclamps-f32 %v1153_v16, 10.0 }
 0x29c   : > { %v2496_v22 = vsel %vm767_vm14, %v1664_v15, -inf }
 0x29d   : > { %1229 = vmax.xlane.f32.xlu1 %v2492_v20  ;;  %926 = vmax.xlane.f32.xlu2 %v2496_v22  ;;  %v2505_v13 = vsel %vm767_vm14, %v1680_v29, -inf }
 0x29f   : > { %v831_v27 = vpop.f32.mrf.mxu0 }
 0x2a0   : > { %v849_v30 = vmul.f32 0.088388346, %v831_v27  ;;  %v899_v32 = vpop.xlane.xlu0 %898  ;;  %v1136_v21 = vpop.f32.mrf.mxu1 }
 0x2a1   : > { %v930_v24 = vsub.f32 %v2379_v50, %v899_v32  ;;  %v1154_v11 = vmul.f32 0.088388346, %v1136_v21 }
 0x2a2   : > { %v1665_v31 = vclamps-f32 %v849_v30, 10.0 }
 0x2a3   : > { %v946_v36 = vmul.f32 1.442695, %v930_v24  ;;  %v1681_v42 = vclamps-f32 %v1154_v11, 10.0 }
 0x2a4   : > { %v2509_v17 = vsel %vm768_vm15, %v1665_v31, -inf }
 0x2a5   : > { %1870 = vpow2.f32 %v946_v36  ;;  %1231 = vmax.xlane.f32.xlu2 %v2505_v13  ;;  %928 = vmax.xlane.f32.xlu0 %v2509_v17  ;;  %v2520_v44 = vsel %vm768_vm15, %v1681_v42, -inf }
 0x2a8   : > { %v1204_v50 = vpop.xlane.xlu0 %1203 }
 0x2a9   : > { %v1206_v7 = vpop.xlane.xlu1 %1205  ;;  %v1235_v37 = vsub.f32 %v2384_v59, %v1204_v50 }
 0x2aa   : > { %v1236_v5 = vsub.f32 %v2388_v61, %v1206_v7 }
 0x2ab   : > { %v2515_v8 = vpop.eup %1870  ;;  %v1251_v39 = vmul.f32 1.442695, %v1235_v37 }
 0x2ac   : > { %v1253_v41 = vmul.f32 1.442695, %v1236_v5  ;;  %978 = vadd.xlane.f32.xlu1 %v2515_v8 }
 0x2ad   : > { %1872 = vpow2.f32 %v1251_v39  ;;  %1233 = vmax.xlane.f32.xlu0 %v2520_v44 }
 0x2ae   : > { %1874 = vpow2.f32 %v1253_v41 }
 0x2b0   : > { %v901_v48 = vpop.xlane.xlu0 %900 }
 0x2b1   : > { %v931_v49 = vsub.f32 %v2396_v53, %v901_v48  ;;  %v903_v59 = vpop.xlane.xlu1 %902  ;;  %v1208_v54 = vpop.xlane.xlu2 %1207 }
 0x2b2   : > { %v932_v61 = vsub.f32 %v2398_v60, %v903_v59  ;;  %v1237_v43 = vsub.f32 %v2400_v9, %v1208_v54 }
 0x2b3   : > { %v2525_v55 = vpop.eup %1872  ;;  %v948_v56 = vmul.f32 1.442695, %v931_v49 }
 0x2b4   : > { %v2527_v57 = vpop.eup %1874  ;;  %v950_v58 = vmul.f32 1.442695, %v932_v61  ;;  %v1255_v2 = vmul.f32 1.442695, %v1237_v43 }
 0x2b5   : > { %1876 = vpow2.f32 %v948_v56  ;;  %1285 = vadd.xlane.f32.xlu1 %v2527_v57  ;;  %1283 = vadd.xlane.f32.xlu0 %v2525_v55 }
 0x2b6   : > { %1878 = vpow2.f32 %v950_v58 }
 0x2b7   : > { %1880 = vpow2.f32 %v1255_v2 }
 0x2b9   : > { %v1210_v53 = vpop.xlane.xlu0 %1209  ;;  %v905_v3 = vpop.xlane.xlu1 %904 }
 0x2ba   : > { %v1238_v40 = vsub.f32 %v2409_v25, %v1210_v53  ;;  %v933_v60 = vsub.f32 %v2407_v23, %v905_v3 }
 0x2bb   : > { %v2534_v46 = vpop.eup %1876 }
 0x2bc   : > { %v1257_v12 = vmul.f32 1.442695, %v1238_v40  ;;  %v952_v15 = vmul.f32 1.442695, %v933_v60  ;;  %980 = vadd.xlane.f32.xlu2 %v2534_v46  ;;  %v2537_v9 = vpop.eup %1878 }
 0x2bd   : > { %982 = vadd.xlane.f32.xlu0 %v2537_v9  ;;  %v2542_v23 = vpop.eup %1880 }
 0x2be   : > { %1882 = vpow2.f32 %v1257_v12 }
 0x2bf   : > { %1884 = vpow2.f32 %v952_v15 }
 0x2c0   : > { %v907_v16 = vpop.xlane.xlu2 %906 }
 0x2c1   : > { %v1212_v26 = vpop.xlane.xlu1 %1211  ;;  %v934_v27 = vsub.f32 %v2415_v35, %v907_v16 }
 0x2c2   : > { %v1239_v25 = vsub.f32 %v2417_v28, %v1212_v26 }
 0x2c3   : > { %v954_v29 = vmul.f32 1.442695, %v934_v27 }
 0x2c4   : > { %v2544_v30 = vpop.eup %1882  ;;  %v1259_v32 = vmul.f32 1.442695, %v1239_v25  ;;  %1287 = vadd.xlane.f32.xlu2 %v2542_v23 }
 0x2c5   : > { %v2547_v21 = vpop.eup %1884  ;;  %1886 = vpow2.f32 %v954_v29  ;;  %1289 = vadd.xlane.f32.xlu0 %v2544_v30 }
 0x2c6   : > { %1888 = vpow2.f32 %v1259_v32  ;;  %984 = vadd.xlane.f32.xlu1 %v2547_v21 }
 0x2c8   : > { %v909_v24 = vpop.xlane.xlu2 %908 }
 0x2c9   : > { %v935_v35 = vsub.f32 %v2423_v14, %v909_v24 }
 0x2cb   : > { %v2552_v28 = vpop.eup %1886  ;;  %v956_v31 = vmul.f32 1.442695, %v935_v35 }
 0x2cc   : > { %v2554_v36 = vpop.eup %1888  ;;  %986 = vadd.xlane.f32.xlu2 %v2552_v28 }
 0x2cd   : > { %1890 = vpow2.f32 %v956_v31 }
 0x2ce   : > { %1291 = vadd.xlane.f32.xlu1 %v2554_v36 }
 0x2d0   : > { %v1214_v11 = vpop.xlane.xlu2 %1213  ;;  %v911_v42 = vpop.xlane.xlu0 %910 }
 0x2d1   : > { %v1240_v50 = vsub.f32 %v2428_v10, %v1214_v11  ;;  %v936_v7 = vsub.f32 %v2430_v38, %v911_v42 }
 0x2d3   : > { %v2560_v37 = vpop.eup %1890  ;;  %v1261_v5 = vmul.f32 1.442695, %v1240_v50  ;;  %v958_v14 = vmul.f32 1.442695, %v936_v7 }
 0x2d4   : > { %988 = vadd.xlane.f32.xlu0 %v2560_v37 }
 0x2d5   : > { %1892 = vpow2.f32 %v1261_v5 }
 0x2d6   : > { %1894 = vpow2.f32 %v958_v14 }
 0x2d8   : > { %v1216_v39 = vpop.xlane.xlu0 %1215  ;;  %v913_v41 = vpop.xlane.xlu1 %912 }
 0x2d9   : > { %v1241_v48 = vsub.f32 %v2436_v51, %v1216_v39  ;;  %v937_v49 = vsub.f32 %v2438_v52, %v913_v41 }
 0x2db   : > { %v2565_v59 = vpop.eup %1892  ;;  %v1263_v54 = vmul.f32 1.442695, %v1241_v48  ;;  %v960_v10 = vmul.f32 1.442695, %v937_v49 }
 0x2dc   : > { %v2567_v61 = vpop.eup %1894  ;;  %1293 = vadd.xlane.f32.xlu2 %v2565_v59 }
 0x2dd   : > { %1896 = vpow2.f32 %v1263_v54  ;;  %990 = vadd.xlane.f32.xlu1 %v2567_v61 }
 0x2de   : > { %1898 = vpow2.f32 %v960_v10 }
 0x2e0   : > { %v1218_v38 = vpop.xlane.xlu1 %1217  ;;  %v915_v56 = vpop.xlane.xlu2 %914 }
 0x2e1   : > { %v1242_v58 = vsub.f32 %v2444_v0, %v1218_v38  ;;  %v938_v51 = vsub.f32 %v2446_v1, %v915_v56 }
 0x2e3   : > { %v2573_v43 = vpop.eup %1896  ;;  %v1265_v52 = vmul.f32 1.442695, %v1242_v58  ;;  %v962_v2 = vmul.f32 1.442695, %v938_v51 }
 0x2e4   : > { %v2575_v53 = vpop.eup %1898  ;;  %1295 = vadd.xlane.f32.xlu0 %v2573_v43 }
 0x2e5   : > { %1900 = vpow2.f32 %v1265_v52  ;;  %992 = vadd.xlane.f32.xlu2 %v2575_v53 }
 0x2e6   : > { %1902 = vpow2.f32 %v962_v2 }
 0x2e8   : > { %v1220_v3 = vpop.xlane.xlu2 %1219  ;;  %v917_v40 = vpop.xlane.xlu0 %916 }
 0x2e9   : > { %v1243_v60 = vsub.f32 %v2452_v18, %v1220_v3  ;;  %v939_v0 = vsub.f32 %v2454_v19, %v917_v40 }
 0x2eb   : > { %v2581_v12 = vpop.eup %1900  ;;  %v1267_v1 = vmul.f32 1.442695, %v1243_v60  ;;  %v964_v15 = vmul.f32 1.442695, %v939_v0 }
 0x2ec   : > { %v2583_v16 = vpop.eup %1902  ;;  %1297 = vadd.xlane.f32.xlu1 %v2581_v12 }
 0x2ed   : > { %1904 = vpow2.f32 %v1267_v1  ;;  %994 = vadd.xlane.f32.xlu0 %v2583_v16 }
 0x2ee   : > { %1906 = vpow2.f32 %v964_v15 }
 0x2f0   : > { %v1222_v26 = vpop.xlane.xlu0 %1221  ;;  %v919_v27 = vpop.xlane.xlu1 %918 }
 0x2f1   : > { %v1244_v25 = vsub.f32 %v2460_v33, %v1222_v26  ;;  %v940_v18 = vsub.f32 %v2462_v34, %v919_v27 }
 0x2f3   : > { %v2589_v29 = vpop.eup %1904  ;;  %v1269_v19 = vmul.f32 1.442695, %v1244_v25  ;;  %v966_v32 = vmul.f32 1.442695, %v940_v18 }
 0x2f4   : > { %v2591_v24 = vpop.eup %1906  ;;  %1299 = vadd.xlane.f32.xlu2 %v2589_v29 }
 0x2f5   : > { %1908 = vpow2.f32 %v1269_v19  ;;  %996 = vadd.xlane.f32.xlu1 %v2591_v24 }
 0x2f6   : > { %1910 = vpow2.f32 %v966_v32 }
 0x2f8   : > { %v1224_v35 = vpop.xlane.xlu1 %1223  ;;  %v921_v31 = vpop.xlane.xlu2 %920 }
 0x2f9   : > { %v1245_v11 = vsub.f32 %v2468_v4, %v1224_v35  ;;  %v941_v33 = vsub.f32 %v2470_v6, %v921_v31 }
 0x2fb   : > { %v2597_v42 = vpop.eup %1908  ;;  %v1271_v34 = vmul.f32 1.442695, %v1245_v11  ;;  %v968_v50 = vmul.f32 1.442695, %v941_v33 }
 0x2fc   : > { %v2599_v7 = vpop.eup %1910  ;;  %1301 = vadd.xlane.f32.xlu0 %v2597_v42 }
 0x2fd   : > { %1912 = vpow2.f32 %v1271_v34  ;;  %998 = vadd.xlane.f32.xlu2 %v2599_v7 }
 0x2fe   : > { %1914 = vpow2.f32 %v968_v50 }
 0x300   : > { %v1226_v5 = vpop.xlane.xlu2 %1225  ;;  %v923_v14 = vpop.xlane.xlu0 %922 }
 0x301   : > { %v1246_v39 = vsub.f32 %v2476_v45, %v1226_v5  ;;  %v942_v4 = vsub.f32 %v2478_v47, %v923_v14 }
 0x303   : > { %v2605_v41 = vpop.eup %1912  ;;  %v1273_v6 = vmul.f32 1.442695, %v1246_v39  ;;  %v970_v48 = vmul.f32 1.442695, %v942_v4 }
 0x304   : > { %v2607_v49 = vpop.eup %1914  ;;  %1303 = vadd.xlane.f32.xlu1 %v2605_v41 }
 0x305   : > { %1916 = vpow2.f32 %v1273_v6  ;;  %1000 = vadd.xlane.f32.xlu0 %v2607_v49 }
 0x306   : > { %1918 = vpow2.f32 %v970_v48 }
 0x308   : > { %v1228_v54 = vpop.xlane.xlu0 %1227  ;;  %v925_v10 = vpop.xlane.xlu1 %924 }
 0x309   : > { %v1247_v38 = vsub.f32 %v2484_v62, %v1228_v54  ;;  %v943_v45 = vsub.f32 %v2486_v63, %v925_v10 }
 0x30b   : > { %v2613_v56 = vpop.eup %1916  ;;  %v1275_v47 = vmul.f32 1.442695, %v1247_v38  ;;  %v972_v58 = vmul.f32 1.442695, %v943_v45 }
 0x30c   : > { %v2615_v51 = vpop.eup %1918  ;;  %1305 = vadd.xlane.f32.xlu2 %v2613_v56 }
 0x30d   : > { %1920 = vpow2.f32 %v1275_v47  ;;  %1002 = vadd.xlane.f32.xlu1 %v2615_v51 }
 0x30e   : > { %1922 = vpow2.f32 %v972_v58 }
 0x310   : > { %v927_v52 = vpop.xlane.xlu2 %926  ;;  %v1230_v3 = vpop.xlane.xlu1 %1229 }
 0x311   : > { %v944_v2 = vsub.f32 %v2496_v22, %v927_v52  ;;  %v1248_v60 = vsub.f32 %v2492_v20, %v1230_v3 }
 0x313   : > { %v2620_v40 = vpop.eup %1920  ;;  %v974_v62 = vmul.f32 1.442695, %v944_v2  ;;  %v1277_v1 = vmul.f32 1.442695, %v1248_v60 }
 0x314   : > { %v2622_v63 = vpop.eup %1922  ;;  %1307 = vadd.xlane.f32.xlu0 %v2620_v40 }
 0x315   : > { %1004 = vadd.xlane.f32.xlu2 %v2622_v63  ;;  %1924 = vpow2.f32 %v974_v62 }
 0x316   : > { %1926 = vpow2.f32 %v1277_v1 }
 0x318   : > { %v929_v0 = vpop.xlane.xlu0 %928  ;;  %v1232_v26 = vpop.xlane.xlu2 %1231 }
 0x319   : > { %v945_v15 = vsub.f32 %v2509_v17, %v929_v0  ;;  %v1249_v25 = vsub.f32 %v2505_v13, %v1232_v26 }
 0x31b   : > { %v976_v27 = vmul.f32 1.442695, %v945_v15  ;;  %v2628_v22 = vpop.eup %1924  ;;  %v1279_v32 = vmul.f32 1.442695, %v1249_v25 }
 0x31c   : > { %1006 = vadd.xlane.f32.xlu1 %v2628_v22  ;;  %v2633_v35 = vpop.eup %1926 }
 0x31d   : > { %1928 = vpow2.f32 %v976_v27 }
 0x31f   : > { %v979_v18 = vpop.xlane.xlu1 %978 }
 0x320   : > { %v1234_v19 = vpop.xlane.xlu0 %1233 }
 0x321   : > { %v1250_v20 = vsub.f32 %v2520_v44, %v1234_v19 }
 0x323   : > { %v1281_v31 = vmul.f32 1.442695, %v1250_v20  ;;  %v2635_v17 = vpop.eup %1928 }
 0x324   : > { %1309 = vadd.xlane.f32.xlu1 %v2633_v35  ;;  %1008 = vadd.xlane.f32.xlu2 %v2635_v17 }
 0x325   : > { %1930 = vpow2.f32 %v1281_v31 }
 0x326   : > { %1932 = vpow2.f32 %v1279_v32 }
 0x328   : > { %v1286_v11 = vpop.xlane.xlu1 %1285  ;;  %v1284_v13 = vpop.xlane.xlu0 %1283 }
 0x329   : > { %1934 = vrcp.f32 %v1286_v11 }
 0x32a   : > { %1936 = vrcp.f32 %v1284_v13 }
 0x32b   : > { %v2639_v33 = vpop.eup %1930  ;;  %1938 = vrcp.f32 %v979_v18 }
 0x32c   : > { %v2641_v44 = vpop.eup %1932  ;;  %1313 = vadd.xlane.f32.xlu0 %v2639_v33 }
 0x32d   : > { %1311 = vadd.xlane.f32.xlu2 %v2641_v44 }
 0x32f   : > { %v1935_v34 = vpop.eup %1934  ;;  %v981_v50 = vpop.xlane.xlu2 %980 }
 0x330   : > { %v1937_v5 = vpop.eup %1936  ;;  %v1332_v14 = vmul.f32 %v1935_v34, %v2527_v57  ;;  %1940 = vrcp.f32 %v981_v50  ;;  %v983_v4 = vpop.xlane.xlu0 %982 }
 0x331   : > { %v1331_v39 = vmul.f32 %v1937_v5, %v2525_v55  ;;  %v1939_v48 = vpop.eup %1938  ;;  %1942 = vrcp.f32 %v983_v4 }
 0x332   : > { %v1026_v10 = vmul.f32 %v1939_v48, %v2515_v8 }
 0x333   : > { %v1794_v6 = vpack.c.bf16 %v1332_v14, %v1331_v39 }
 0x335   : > { %1838 = vst [vmem:[%s2651_s12 + $0x40] sm:$0xff] %v1794_v6  }
 0x336   : > { %v1941_v54 = vpop.eup %1940 }
 0x337   : > { %v1027_v38 = vmul.f32 %v1941_v54, %v2534_v46  ;;  %v1288_v57 = vpop.xlane.xlu2 %1287  ;;  %v1943_v58 = vpop.eup %1942 }
 0x338   : > { %1944 = vrcp.f32 %v1288_v57  ;;  %v1290_v47 = vpop.xlane.xlu0 %1289  ;;  %v1028_v8 = vmul.f32 %v1943_v58, %v2537_v9 }
 0x339   : > { %v1754_v55 = vpack.c.bf16 %v1027_v38, %v1026_v10  ;;  %v985_v45 = vpop.xlane.xlu1 %984 }
 0x33a   : > { %1946 = vrcp.f32 %v985_v45 }
 0x33b   : > { %1755 = vst [vmem:[%s2651_s12] sm:$0xff] %v1754_v55   ;;  %1948 = vrcp.f32 %v1290_v47 }
 0x33e   : > { %v1945_v52 = vpop.eup %1944 }
 0x33f   : > { %v1333_v3 = vmul.f32 %v1945_v52, %v2542_v23  ;;  %v987_v1 = vpop.xlane.xlu2 %986 }
 0x340   : > { %v1947_v2 = vpop.eup %1946  ;;  %1950 = vrcp.f32 %v987_v1 }
 0x341   : > { %v1949_v62 = vpop.eup %1948  ;;  %v1029_v46 = vmul.f32 %v1947_v2, %v2547_v21  ;;  %v1292_v27 = vpop.xlane.xlu1 %1291 }
 0x342   : > { %v1334_v60 = vmul.f32 %v1949_v62, %v2544_v30 }
 0x343   : > { %v1759_v0 = vpack.c.bf16 %v1029_v46, %v1028_v8 }
 0x344   : > { %v1799_v15 = vpack.c.bf16 %v1334_v60, %v1333_v3 }
 0x345   : > { %1831 = vst [vmem:[%s2651_s12 + $0x8] sm:$0xff] %v1759_v0  }
 0x346   : > { %1839 = vst [vmem:[%s2651_s12 + $0x48] sm:$0xff] %v1799_v15   ;;  %v1951_v25 = vpop.eup %1950 }
 0x347   : > { %v989_v26 = vpop.xlane.xlu0 %988  ;;  %v1030_v23 = vmul.f32 %v1951_v25, %v2552_v28 }
 0x348   : > { %1952 = vrcp.f32 %v989_v26 }
 0x349   : > { %1954 = vrcp.f32 %v1292_v27 }
 0x34e   : > { %v1953_v18 = vpop.eup %1952 }
 0x34f   : > { %v1031_v9 = vmul.f32 %v1953_v18, %v2560_v37  ;;  %v1294_v21 = vpop.xlane.xlu2 %1293  ;;  %v1955_v19 = vpop.eup %1954 }
 0x350   : > { %1956 = vrcp.f32 %v1294_v21  ;;  %v991_v20 = vpop.xlane.xlu1 %990  ;;  %v1335_v31 = vmul.f32 %v1955_v19, %v2554_v36 }
 0x351   : > { %v1764_v30 = vpack.c.bf16 %v1031_v9, %v1030_v23  ;;  %1958 = vrcp.f32 %v991_v20 }
 0x353   : > { %1832 = vst [vmem:[%s2651_s12 + $0x10] sm:$0xff] %v1764_v30  }
 0x356   : > { %v1957_v32 = vpop.eup %1956 }
 0x357   : > { %v1336_v11 = vmul.f32 %v1957_v32, %v2565_v59  ;;  %v1296_v28 = vpop.xlane.xlu0 %1295  ;;  %v1959_v50 = vpop.eup %1958 }
 0x358   : > { %v993_v13 = vpop.xlane.xlu2 %992  ;;  %v1032_v14 = vmul.f32 %v1959_v50, %v2567_v61 }
 0x359   : > { %v1804_v34 = vpack.c.bf16 %v1336_v11, %v1335_v31  ;;  %1960 = vrcp.f32 %v993_v13 }
 0x35a   : > { %1962 = vrcp.f32 %v1296_v28 }
 0x35b   : > { %1840 = vst [vmem:[%s2651_s12 + $0x50] sm:$0xff] %v1804_v34  }
 0x35f   : > { %v1961_v37 = vpop.eup %1960  ;;  %v1298_v5 = vpop.xlane.xlu1 %1297 }
 0x360   : > { %v1033_v39 = vmul.f32 %v1961_v37, %v2575_v53  ;;  %1964 = vrcp.f32 %v1298_v5  ;;  %v1963_v4 = vpop.eup %1962  ;;  %v995_v6 = vpop.xlane.xlu0 %994 }
 0x361   : > { %v1337_v48 = vmul.f32 %v1963_v4, %v2573_v43  ;;  %1966 = vrcp.f32 %v995_v6 }
 0x362   : > { %v1769_v36 = vpack.c.bf16 %v1033_v39, %v1032_v14 }
 0x364   : > { %1833 = vst [vmem:[%s2651_s12 + $0x18] sm:$0xff] %v1769_v36  }
 0x366   : > { %v1965_v59 = vpop.eup %1964 }
 0x367   : > { %v1338_v54 = vmul.f32 %v1965_v59, %v2581_v12  ;;  %v1300_v57 = vpop.xlane.xlu2 %1299  ;;  %v1967_v61 = vpop.eup %1966 }
 0x368   : > { %v997_v10 = vpop.xlane.xlu1 %996  ;;  %v1034_v45 = vmul.f32 %v1967_v61, %v2583_v16 }
 0x369   : > { %v1809_v38 = vpack.c.bf16 %v1338_v54, %v1337_v48  ;;  %1968 = vrcp.f32 %v997_v10 }
 0x36a   : > { %1970 = vrcp.f32 %v1300_v57 }
 0x36b   : > { %1841 = vst [vmem:[%s2651_s12 + $0x58] sm:$0xff] %v1809_v38  }
 0x36f   : > { %v1969_v53 = vpop.eup %1968  ;;  %v1302_v55 = vpop.xlane.xlu0 %1301 }
 0x370   : > { %v1035_v47 = vmul.f32 %v1969_v53, %v2591_v24  ;;  %1972 = vrcp.f32 %v1302_v55  ;;  %v1971_v58 = vpop.eup %1970  ;;  %v999_v12 = vpop.xlane.xlu2 %998 }
 0x371   : > { %v1339_v2 = vmul.f32 %v1971_v58, %v2589_v29  ;;  %1974 = vrcp.f32 %v999_v12 }
 0x372   : > { %v1774_v43 = vpack.c.bf16 %v1035_v47, %v1034_v45 }
 0x374   : > { %1834 = vst [vmem:[%s2651_s12 + $0x20] sm:$0xff] %v1774_v43  }
 0x376   : > { %v1973_v52 = vpop.eup %1972 }
 0x377   : > { %v1340_v3 = vmul.f32 %v1973_v52, %v2597_v42  ;;  %v1304_v46 = vpop.xlane.xlu1 %1303  ;;  %v1975_v16 = vpop.eup %1974 }
 0x378   : > { %v1001_v62 = vpop.xlane.xlu0 %1000  ;;  %v1036_v0 = vmul.f32 %v1975_v16, %v2599_v7 }
 0x379   : > { %v1814_v8 = vpack.c.bf16 %v1340_v3, %v1339_v2  ;;  %1976 = vrcp.f32 %v1001_v62 }
 0x37a   : > { %1978 = vrcp.f32 %v1304_v46 }
 0x37b   : > { %1842 = vst [vmem:[%s2651_s12 + $0x60] sm:$0xff] %v1814_v8  }
 0x37f   : > { %v1977_v24 = vpop.eup %1976  ;;  %v1306_v60 = vpop.xlane.xlu2 %1305 }
 0x380   : > { %v1037_v1 = vmul.f32 %v1977_v24, %v2607_v49  ;;  %1980 = vrcp.f32 %v1306_v60  ;;  %v1979_v15 = vpop.eup %1978  ;;  %v1003_v42 = vpop.xlane.xlu1 %1002 }
 0x381   : > { %v1341_v27 = vmul.f32 %v1979_v15, %v2605_v41  ;;  %1982 = vrcp.f32 %v1003_v42 }
 0x382   : > { %v1779_v29 = vpack.c.bf16 %v1037_v1, %v1036_v0 }
 0x384   : > { %1835 = vst [vmem:[%s2651_s12 + $0x28] sm:$0xff] %v1779_v29  }
 0x386   : > { %v1981_v26 = vpop.eup %1980 }
 0x387   : > { %v1342_v25 = vmul.f32 %v1981_v26, %v2613_v56  ;;  %v1983_v9 = vpop.eup %1982  ;;  %v1308_v20 = vpop.xlane.xlu0 %1307 }
 0x388   : > { %v1005_v18 = vpop.xlane.xlu2 %1004  ;;  %v1038_v49 = vmul.f32 %v1983_v9, %v2615_v51 }
 0x389   : > { %v1819_v23 = vpack.c.bf16 %v1342_v25, %v1341_v27  ;;  %1984 = vrcp.f32 %v1005_v18 }
 0x38a   : > { %1986 = vrcp.f32 %v1308_v20 }
 0x38b   : > { %1843 = vst [vmem:[%s2651_s12 + $0x68] sm:$0xff] %v1819_v23  }
 0x38f   : > { %v1985_v7 = vpop.eup %1984  ;;  %v1007_v30 = vpop.xlane.xlu1 %1006 }
 0x390   : > { %v1039_v21 = vmul.f32 %v1985_v7, %v2622_v63  ;;  %1988 = vrcp.f32 %v1007_v30  ;;  %v1987_v56 = vpop.eup %1986 }
 0x391   : > { %v1343_v51 = vmul.f32 %v1987_v56, %v2620_v40 }
 0x392   : > { %v1784_v19 = vpack.c.bf16 %v1039_v21, %v1038_v49 }
 0x394   : > { %1836 = vst [vmem:[%s2651_s12 + $0x30] sm:$0xff] %v1784_v19  }
 0x396   : > { %v1989_v31 = vpop.eup %1988 }
 0x397   : > { %v1310_v41 = vpop.xlane.xlu1 %1309  ;;  %v1009_v32 = vpop.xlane.xlu2 %1008  ;;  %v1040_v50 = vmul.f32 %v1989_v31, %v2628_v22 }
 0x398   : > { %1990 = vrcp.f32 %v1310_v41 }
 0x399   : > { %1992 = vrcp.f32 %v1009_v32 }
 0x39e   : > { %v1991_v11 = vpop.eup %1990 }
 0x39f   : > { %v1314_v13 = vpop.xlane.xlu0 %1313  ;;  %v1993_v34 = vpop.eup %1992  ;;  %v1344_v63 = vmul.f32 %v1991_v11, %v2633_v35 }
 0x3a0   : > { %v1312_v28 = vpop.xlane.xlu2 %1311  ;;  %1994 = vrcp.f32 %v1314_v13  ;;  %v1041_v37 = vmul.f32 %v1993_v34, %v2635_v17 }
 0x3a1   : > { %1996 = vrcp.f32 %v1312_v28  ;;  %v1824_v5 = vpack.c.bf16 %v1344_v63, %v1343_v51 }
 0x3a2   : > { %v1789_v14 = vpack.c.bf16 %v1041_v37, %v1040_v50 }
 0x3a3   : > { %1844 = vst [vmem:[%s2651_s12 + $0x70] sm:$0xff] %v1824_v5  }
 0x3a4   : > { %1837 = vst [vmem:[%s2651_s12 + $0x38] sm:$0xff] %v1789_v14  }
 0x3a6   : > { %v1995_v39 = vpop.eup %1994 }
 0x3a7   : > { %v1997_v36 = vpop.eup %1996  ;;  %v1346_v4 = vmul.f32 %v1995_v39, %v2639_v33 }
 0x3a8   : > { %v1345_v40 = vmul.f32 %v1997_v36, %v2641_v44 }
 0x3aa   : > { %v1829_v6 = vpack.c.bf16 %v1346_v4, %v1345_v40 }
 0x3ac   : > { %1845 = vst [vmem:[%s2651_s12 + $0x78] sm:$0xff] %v1829_v6  }
 0x3ad PF: > { %s14_s15 = sadd.s32 1, %s2004_s15  }
 0x3ae   : > { %p11_p4 = scmp.ge.s32.totalorder %s14_s15, 4  }
 0x3b0   :  { %13 = sbr.rel (!%p11_p4) target bundleno = 1 (0x1), region = 70 }

// kernel: old_model_forward.3
= control target key start
LH: loop header
LB: loop body
LE: loop exit
PB: predicated region body
PF: predicated region fallthrough
CT: control target
= control target key end

     0   :  { %s2793_s15 = smov 0   ;;  %s2795_s16 = smov 0   ;;  %s3409_s0 = inlined_call_operand.vmem [shape: f32[2,128,128], index: 0, kind: input, shape index: {}]   ;;  %s3410_s1 = inlined_call_operand.vmem [shape: bf16[2,2,128,128], index: 1, kind: input, shape index: {}]   ;;  %s3411_s2 = inlined_call_operand.vmem [shape: bf16[512,128], index: 2, kind: input, shape index: {}]   ;;  %s3412_s3 = inlined_call_operand.vmem [shape: bf16[256,128], index: 3, kind: input, shape index: {}]   ;;  %s3413_s4 = inlined_call_operand.vmem [shape: f32[2,128,128], index: 4, kind: output, shape index: {}]  }
   0x1   :  { %s2797_s17 = smov 0   ;;  %s2799_s18 = smov 0  }
   0x2   :  { %s2801_s19 = smov 0   ;;  %s2803_s20 = smov 0  }
   0x3   :  { %s2805_s21 = smov 0  }
   0x4 LB: > { %s26_s22 = sadd.s32 1, %s2749_s18  ;;  %s29_s23 = sadd.s32 1, %s2753_s19  ;;  %s2761_s21 = sphi %s2805_s21, %s14_s21   ;;  %s2757_s20 = sphi %s2803_s20, %s3419_s20   ;;  %s2753_s19 = sphi %s2801_s19, %s3418_s19   ;;  %s2749_s18 = sphi %s2799_s18, %s3417_s18   ;;  %s2745_s17 = sphi %s2797_s17, %s3416_s17   ;;  %s2741_s16 = sphi %s2795_s16, %s3415_s16   ;;  %s2737_s15 = sphi %s2793_s15, %s3414_s15  }
   0x5   : > { %p27_p0 = scmp.ge.s32.totalorder %s26_s22, 2  ;;  %p2104_p1 = scmp.ge.s32.totalorder %s2761_s21, 1 }
   0x6   : > { %p202_p2 = scmp.lt.s32.totalorder %s2761_s21, 9  ;;  %s33_s24 = sadd.s32 1, %s2757_s20 }
   0x7   : > { %s3421_s22 = smov (%p27_p0, %s26_s22), 0  ;;  %s3423_s23 = smov (!%p27_p0, %s29_s23), %s2753_s19 }
   0x8   : > { %p203_p3 = pnand %p2104_p1, %p202_p2  ;;  %p31_p4 = scmp.ge.s32.totalorder %s3423_s23, 2 }
   0x9   : > { %p238_p6 = scmp.lt.s32.totalorder (!%p203_p3), %s2745_s17, 1  ;;  %s2109_s25 = sshll.u32 (!%p203_p3), %s2737_s15, 5 }
   0xa   : > { %s3425_s23 = smov (%p31_p4, %s3423_s23), 0  ;;  %s3427_s24 = smov (!%p31_p4, %s33_s24), %s2757_s20 }
   0xb   : > { %p35_p5 = scmp.ge.s32.totalorder %s3427_s24, 2  ;;  %206 = sbr.rel (%p203_p3) target bundleno = 1830 (0x726), region = 36 }
   0xc   : > { %p249_p7 = scmp.lt.s32.totalorder (!%p203_p3), %s2109_s25, 63  ;;  %p260_p8 = scmp.eq.s32.totalorder (!%p203_p3), %s2741_s16, 0 }
   0xd   : > { %s3429_s24 = smov (%p35_p5, %s3427_s24), 0  ;;  %p261_p9 = scmp.eq.s32.totalorder (!%p203_p3), %s2737_s15, 0 }
   0xf   : > { %p262_p10 = pnand (!%p203_p3), %p261_p9, %p260_p8 }
  0x10   : > { %s3431_s17 = smov (!%p238_p6, %s2745_s17), 1  ;;  %s3433_s25 = smov (!%p249_p7, %s2109_s25), 63 }
  0x11   : > { %s2325_s26 = sshll.u32 %s3431_s17, 7  ;;  %s2110_s7 = sshll.u32 %s3433_s25, 2 }
  0x12   : > { %s2845_s29 = scalar_lea.vmem %s3409_s0, %s2325_s26  ;;  %s2850_s6 = scalar_lea.vmem %s3410_s1, %s2325_s26 }
  0x13   : > { %s2855_s10 = scalar_lea.vmem %s3413_s4, %s2325_s26  ;;  %s2860_s13 = scalar_lea.vmem %s3411_s2, %s2110_s7 }
  0x14   : > { %265 = sbr.rel (%p262_p10) target bundleno = 42 (0x2a), region = 40 }
  0x19   : > { %v2763_v0 = vmov 0.0  }
  0x1a   : > { %266 = vst [vmem:[#allocation2 + $0x30] sm:$0xff] %v2763_v0 }
  0x1b   : > { %267 = vst [vmem:[#allocation2] sm:$0xff] %v2763_v0 }
  0x1c   : > { %268 = vst [vmem:[#allocation2 + $0x58] sm:$0xff] %v2763_v0 }
  0x1d   : > { %269 = vst [vmem:[#allocation2 + $0x18] sm:$0xff] %v2763_v0 }
  0x1e   : > { %270 = vst [vmem:[#allocation2 + $0x50] sm:$0xff] %v2763_v0 }
  0x1f   : > { %271 = vst [vmem:[#allocation2 + $0x68] sm:$0xff] %v2763_v0 }
  0x20   : > { %272 = vst [vmem:[#allocation2 + $0x8] sm:$0xff] %v2763_v0 }
  0x21   : > { %273 = vst [vmem:[#allocation2 + $0x48] sm:$0xff] %v2763_v0 }
  0x22   : > { %274 = vst [vmem:[#allocation2 + $0x40] sm:$0xff] %v2763_v0 }
  0x23   : > { %275 = vst [vmem:[#allocation2 + $0x20] sm:$0xff] %v2763_v0 }
  0x24   : > { %276 = vst [vmem:[#allocation2 + $0x10] sm:$0xff] %v2763_v0 }
  0x25   : > { %277 = vst [vmem:[#allocation2 + $0x38] sm:$0xff] %v2763_v0 }
  0x26   : > { %278 = vst [vmem:[#allocation2 + $0x60] sm:$0xff] %v2763_v0 }
  0x27   : > { %279 = vst [vmem:[#allocation2 + $0x70] sm:$0xff] %v2763_v0 }
  0x28   : > { %280 = vst [vmem:[#allocation2 + $0x78] sm:$0xff] %v2763_v0 }
  0x29   : > { %281 = vst [vmem:[#allocation2 + $0x28] sm:$0xff] %v2763_v0 }
  0x2a PF: > { %p2113_p11 = scmp.ne.s32.totalorder %s2737_s15, 0 }
  0x2c   : > { %284 = sbr.rel (%p2113_p11) target bundleno = 82 (0x52), region = 44 }
  0x31   : > { %v2764_v1 = vmov 0.0  }
  0x32   : > { %285 = vst [vmem:[#allocation3 + $0x28] sm:$0xff] %v2764_v1 }
  0x33   : > { %286 = vst [vmem:[#allocation3 + $0x68] sm:$0xff] %v2764_v1 }
  0x34   : > { %287 = vst [vmem:[#allocation3 + $0x10] sm:$0xff] %v2764_v1 }
  0x35   : > { %288 = vst [vmem:[#allocation3 + $0x40] sm:$0xff] %v2764_v1 }
  0x36   : > { %289 = vst [vmem:[#allocation3 + $0x48] sm:$0xff] %v2764_v1 }
  0x37   : > { %290 = vst [vmem:[#allocation3 + $0x30] sm:$0xff] %v2764_v1 }
  0x38   : > { %291 = vst [vmem:[#allocation3 + $0x70] sm:$0xff] %v2764_v1 }
  0x39   : > { %292 = vst [vmem:[#allocation3 + $0x38] sm:$0xff] %v2764_v1 }
  0x3a   : > { %293 = vst [vmem:[#allocation3 + $0x20] sm:$0xff] %v2764_v1 }
  0x3b   : > { %294 = vst [vmem:[#allocation3 + $0x78] sm:$0xff] %v2764_v1 }
  0x3c   : > { %295 = vst [vmem:[#allocation3 + $0x18] sm:$0xff] %v2764_v1 }
  0x3d   : > { %296 = vst [vmem:[#allocation3 + $0x58] sm:$0xff] %v2764_v1 }
  0x3e   : > { %297 = vst [vmem:[#allocation3] sm:$0xff] %v2764_v1 }
  0x3f   : > { %298 = vst [vmem:[#allocation3 + $0x8] sm:$0xff] %v2764_v1 }
  0x40   : > { %299 = vst [vmem:[#allocation3 + $0x60] sm:$0xff] %v2764_v1 }
  0x41   : > { %300 = vst [vmem:[#allocation3 + $0x50] sm:$0xff] %v2764_v1 }
  0x42   : > { %301 = vst [vmem:[#allocation4 + $0x8] sm:$0xff] %v2764_v1 }
  0x43   : > { %302 = vst [vmem:[#allocation4] sm:$0xff] %v2764_v1 }
  0x44   : > { %303 = vst [vmem:[#allocation4 + $0x48] sm:$0xff] %v2764_v1 }
  0x45   : > { %304 = vst [vmem:[#allocation4 + $0x60] sm:$0xff] %v2764_v1 }
  0x46   : > { %305 = vst [vmem:[#allocation4 + $0x68] sm:$0xff] %v2764_v1 }
  0x47   : > { %306 = vst [vmem:[#allocation4 + $0x18] sm:$0xff] %v2764_v1 }
  0x48   : > { %307 = vst [vmem:[#allocation4 + $0x10] sm:$0xff] %v2764_v1 }
  0x49   : > { %308 = vst [vmem:[#allocation4 + $0x38] sm:$0xff] %v2764_v1 }
  0x4a   : > { %309 = vst [vmem:[#allocation4 + $0x40] sm:$0xff] %v2764_v1 }
  0x4b   : > { %310 = vst [vmem:[#allocation4 + $0x28] sm:$0xff] %v2764_v1 }
  0x4c   : > { %311 = vst [vmem:[#allocation4 + $0x70] sm:$0xff] %v2764_v1 }
  0x4d   : > { %312 = vst [vmem:[#allocation4 + $0x20] sm:$0xff] %v2764_v1 }
  0x4e   : > { %313 = vst [vmem:[#allocation4 + $0x58] sm:$0xff] %v2764_v1 }
  0x4f   : > { %314 = vst [vmem:[#allocation4 + $0x30] sm:$0xff] %v2764_v1 }
  0x50   : > { %315 = vst [vmem:[#allocation4 + $0x50] sm:$0xff] %v2764_v1 }
  0x51   : > { %316 = vst [vmem:[#allocation4 + $0x78] sm:$0xff] %v2764_v1 }
  0x52 PF: > { %v363_v2 = vld [vmem:[#allocation2 + $0x78] sm:$0xff]  ;;  %v364_v3 = vld [vmem:[#allocation2 + $0x28] sm:$0xff]  ;;  %v361_v5 = vld [vmem:[#allocation2 + $0x60] sm:$0xff]  ;;  %p2178_p12 = scmp.ne.s32.totalorder %s2737_s15, 1 }
  0x53   : > { %v372_v4 = vpack.c.bf16 %v364_v3, %v363_v2  ;;  %v362_v6 = vld [vmem:[#allocation2 + $0x70] sm:$0xff]  ;;  %v360_v9 = vld [vmem:[#allocation2 + $0x38] sm:$0xff]  ;;  %v357_v11 = vld [vmem:[#allocation2 + $0x40] sm:$0xff] }
  0x54   : > { %v371_v7 = vpack.c.bf16 %v362_v6, %v361_v5  ;;  %v359_v8 = vld [vmem:[#allocation2 + $0x10] sm:$0xff]  ;;  %v358_v12 = vld [vmem:[#allocation2 + $0x20] sm:$0xff]  ;;  %v355_v14 = vld [vmem:[#allocation2 + $0x8] sm:$0xff] }
  0x55   : > { %469 = vmatpush.bf16.xpose.msra.mxu0 %v372_v4  ;;  %2376 = vmatpush.bf16.xpose.msra.mxu2 %v372_v4  ;;  %v370_v10 = vpack.c.bf16 %v360_v9, %v359_v8  ;;  %v369_v13 = vpack.c.bf16 %v358_v12, %v357_v11  ;;  %v356_v15 = vld [vmem:[#allocation2 + $0x48] sm:$0xff]  ;;  %v353_v17 = vld [vmem:[#allocation2 + $0x50] sm:$0xff]  ;;  %v351_v20 = vld [vmem:[#allocation2 + $0x58] sm:$0xff] }
  0x56   : > { %v368_v16 = vpack.c.bf16 %v356_v15, %v355_v14  ;;  %v354_v18 = vld [vmem:[#allocation2 + $0x68] sm:$0xff]  ;;  %v352_v21 = vld [vmem:[#allocation2 + $0x18] sm:$0xff]  ;;  %v349_v23 = vld [vmem:[#allocation2 + $0x30] sm:$0xff] }
  0x57   : > { %v367_v19 = vpack.c.bf16 %v354_v18, %v353_v17  ;;  %v366_v22 = vpack.c.bf16 %v352_v21, %v351_v20  ;;  %v350_v24 = vld [vmem:[#allocation2] sm:$0xff]  ;;  %v2865_v27 = vld [vmem:[%s2860_s13 + $0x58] sm:$0xff]  ;;  %v2329_v28 = vld [vmem:[%s2860_s13 + $0x8] sm:$0xff] }
  0x58   : > { %v365_v25 = vpack.c.bf16 %v350_v24, %v349_v23  ;;  %v2328_v26 = vld [vmem:[%s2860_s13] sm:$0xff]  ;;  %v2330_v30 = vld [vmem:[%s2860_s13 + $0x10] sm:$0xff]  ;;  %v2341_v31 = vld [vmem:[%s2860_s13 + $0x68] sm:$0xff] }
  0x59   : > { %v2340_v29 = vld [vmem:[%s2860_s13 + $0x60] sm:$0xff]  ;;  %v2331_v32 = vld [vmem:[%s2860_s13 + $0x18] sm:$0xff]  ;;  %v2334_v35 = vld [vmem:[%s2860_s13 + $0x30] sm:$0xff] }
  0x5a   : > { %v2332_v33 = vld [vmem:[%s2860_s13 + $0x20] sm:$0xff]  ;;  %v2335_v34 = vld [vmem:[%s2860_s13 + $0x38] sm:$0xff]  ;;  %v2333_v36 = vld [vmem:[%s2860_s13 + $0x28] sm:$0xff] }
  0x5b   : > { %910 = vmatpush.bf16.msra.mxu1 %v2335_v34  ;;  %2384 = vmatpush.bf16.msra.mxu3 %v2335_v34  ;;  %v2342_v37 = vld [vmem:[%s2860_s13 + $0x70] sm:$0xff]  ;;  %v2336_v38 = vld [vmem:[%s2860_s13 + $0x40] sm:$0xff]  ;;  %v2343_v42 = vld [vmem:[%s2860_s13 + $0x78] sm:$0xff] }
  0x5c   : > { %v2337_v44 = vld [vmem:[%s2860_s13 + $0x48] sm:$0xff]  ;;  %v2338_v48 = vld [vmem:[%s2860_s13 + $0x50] sm:$0xff] }
  0x5d   : > { %470 = vmatpush.bf16.xpose.msra.mxu0 %v371_v7  ;;  %2377 = vmatpush.bf16.xpose.msra.mxu2 %v371_v7 }
  0x5f   : > { %911 = vmatpush.bf16.msra.mxu1 %v2334_v35  ;;  %2385 = vmatpush.bf16.msra.mxu3 %v2334_v35 }
  0x63   : > { %912 = vmatpush.bf16.msra.mxu1 %v2333_v36  ;;  %2386 = vmatpush.bf16.msra.mxu3 %v2333_v36 }
  0x65   : > { %471 = vmatpush.bf16.xpose.msra.mxu0 %v370_v10  ;;  %2378 = vmatpush.bf16.xpose.msra.mxu2 %v370_v10 }
  0x67   : > { %913 = vmatpush.bf16.msra.mxu1 %v2332_v33  ;;  %2387 = vmatpush.bf16.msra.mxu3 %v2332_v33 }
  0x6b   : > { %914 = vmatpush.bf16.msra.mxu1 %v2331_v32  ;;  %2388 = vmatpush.bf16.msra.mxu3 %v2331_v32 }
  0x6d   : > { %472 = vmatpush.bf16.xpose.msra.mxu0 %v369_v13  ;;  %2379 = vmatpush.bf16.xpose.msra.mxu2 %v369_v13 }
  0x6f   : > { %915 = vmatpush.bf16.msra.mxu1 %v2330_v30  ;;  %2389 = vmatpush.bf16.msra.mxu3 %v2330_v30 }
  0x73   : > { %916 = vmatpush.bf16.msra.mxu1 %v2329_v28  ;;  %2390 = vmatpush.bf16.msra.mxu3 %v2329_v28 }
  0x75   : > { %473 = vmatpush.bf16.xpose.msra.mxu0 %v368_v16  ;;  %2380 = vmatpush.bf16.xpose.msra.mxu2 %v368_v16 }
  0x77   : > { %917 = vmatpush.bf16.msra.mxu1 %v2328_v26  ;;  %2391 = vmatpush.bf16.msra.mxu3 %v2328_v26 }
  0x7b   : > { %2392 = vmatpush.bf16.msrb.mxu3 %v2343_v42 }
  0x7d   : > { %474 = vmatpush.bf16.xpose.msra.mxu0 %v367_v19  ;;  %2381 = vmatpush.bf16.xpose.msra.mxu2 %v367_v19 }
  0x7f   : > { %2393 = vmatpush.bf16.msrb.mxu3 %v2342_v37 }
  0x83   : > { %2394 = vmatpush.bf16.msrb.mxu3 %v2341_v31 }
  0x85   : > { %475 = vmatpush.bf16.xpose.msra.mxu0 %v366_v22  ;;  %2382 = vmatpush.bf16.xpose.msra.mxu2 %v366_v22 }
  0x87   : > { %2395 = vmatpush.bf16.msrb.mxu3 %v2340_v29 }
  0x8b   : > { %2396 = vmatpush.bf16.msrb.mxu3 %v2865_v27 }
  0x8d   : > { %476 = vmatpush.bf16.xpose.msra.mxu0 %v365_v25  ;;  %2383 = vmatpush.bf16.xpose.msra.mxu2 %v365_v25 }
  0x8f   : > { %2397 = vmatpush.bf16.msrb.mxu3 %v2338_v48 }
  0x93   : > { %2398 = vmatpush.bf16.msrb.mxu3 %v2337_v44 }
  0x94   : > { %477 = vmatmul.bf16.vlgmr.msra.gmra.mxu0 %v2328_v26  ;;  %532 = vmatmul.bf16.vlgmr.msra.gmra.mxu2 %v2865_v27 }
  0x95   : > { %959 = vmatpush.bf16.msrb.mxu2 %v2343_v42 }
  0x97   : > { %2399 = vmatpush.bf16.msrb.mxu3 %v2336_v38 }
  0x99   : > { %960 = vmatpush.bf16.msrb.mxu2 %v2342_v37 }
  0x9d   : > { %961 = vmatpush.bf16.msrb.mxu2 %v2341_v31 }
  0xa1   : > { %962 = vmatpush.bf16.msrb.mxu2 %v2340_v29 }
  0xa4   : > { %482 = vmatmul.bf16.gmra.mxu0 %v2329_v28  ;;  %537 = vmatmul.bf16.gmra.mxu2 %v2340_v29 }
  0xa5   : > { %963 = vmatpush.bf16.msrb.mxu2 %v2865_v27 }
  0xa9   : > { %964 = vmatpush.bf16.msrb.mxu2 %v2338_v48 }
  0xad   : > { %965 = vmatpush.bf16.msrb.mxu2 %v2337_v44 }
  0xb1   : > { %966 = vmatpush.bf16.msrb.mxu2 %v2336_v38 }
  0xb4   : > { %487 = vmatmul.bf16.gmra.mxu0 %v2330_v30  ;;  %542 = vmatmul.bf16.gmra.mxu2 %v2341_v31 }
  0xc4   : > { %492 = vmatmul.bf16.gmra.mxu0 %v2331_v32  ;;  %547 = vmatmul.bf16.gmra.mxu2 %v2342_v37 }
  0xd4   : > { %497 = vmatmul.bf16.gmra.mxu0 %v2332_v33  ;;  %552 = vmatmul.bf16.gmra.mxu2 %v2343_v42 }
  0xe4   : > { %502 = vmatmul.bf16.gmra.mxu0 %v2333_v36 }
  0xf4   : > { %507 = vmatmul.bf16.gmra.mxu0 %v2334_v35 }
 0x104   : > { %512 = vmatmul.bf16.gmra.mxu0 %v2335_v34 }
 0x111   : > { %v2879_v39 = vpop.f32.mrf.mxu0 }
 0x112   : > { %558 = vmax.xlane.f32.xlu0 %v2879_v39 }
 0x114   : > { %517 = vmatmul.bf16.gmra.mxu0 %v2336_v38 }
 0x117   : > { %v2882_v40 = vpop.f32.mrf.mxu2 }
 0x118   : > { %602 = vmax.xlane.f32.xlu2 %v2882_v40 }
 0x119   : > { %v2885_v41 = vpop.f32.mrf.mxu0 }
 0x11a   : > { %560 = vmax.xlane.f32.xlu0 %v2885_v41 }
 0x11f   : > { %v2889_v43 = vpop.f32.mrf.mxu2 }
 0x121   : > { %v2892_v45 = vpop.f32.mrf.mxu0 }
 0x122   : > { %604 = vmax.xlane.f32.xlu0 %v2889_v43  ;;  %562 = vmax.xlane.f32.xlu1 %v2892_v45 }
 0x124   : > { %522 = vmatmul.bf16.gmra.mxu0 %v2337_v44 }
 0x127   : > { %v2896_v46 = vpop.f32.mrf.mxu2 }
 0x129   : > { %v2898_v47 = vpop.f32.mrf.mxu0 }
 0x12a   : > { %606 = vmax.xlane.f32.xlu0 %v2896_v46  ;;  %564 = vmax.xlane.f32.xlu1 %v2898_v47 }
 0x12f   : > { %v2905_v49 = vpop.f32.mrf.mxu2 }
 0x131   : > { %v2907_v50 = vpop.f32.mrf.mxu0 }
 0x132   : > { %608 = vmax.xlane.f32.xlu1 %v2905_v49  ;;  %566 = vmax.xlane.f32.xlu2 %v2907_v50 }
 0x134   : > { %527 = vmatmul.bf16.gmra.mxu0 %v2338_v48 }
 0x137   : > { %v2911_v51 = vpop.f32.mrf.mxu2 }
 0x139   : > { %v2913_v52 = vpop.f32.mrf.mxu0 }
 0x13a   : > { %610 = vmax.xlane.f32.xlu1 %v2911_v51  ;;  %568 = vmax.xlane.f32.xlu2 %v2913_v52 }
 0x13f   : > { %v2917_v53 = vpop.f32.mrf.mxu2 }
 0x141   : > { %v2919_v54 = vpop.f32.mrf.mxu0 }
 0x142   : > { %612 = vmax.xlane.f32.xlu2 %v2917_v53  ;;  %570 = vmax.xlane.f32.xlu0 %v2919_v54 }
 0x147   : > { %v2973_v20 = vpop.f32.mrf.mxu2 }
 0x149   : > { %v2923_v55 = vpop.f32.mrf.mxu0 }
 0x14a   : > { %572 = vmax.xlane.f32.xlu1 %v2923_v55 }
 0x14f   : > { %v2987_v29 = vpop.f32.mrf.mxu2 }
 0x151   : > { %v2926_v56 = vpop.f32.mrf.mxu0 }
 0x152   : > { %574 = vmax.xlane.f32.xlu2 %v2926_v56 }
 0x157   : > { %v3003_v36 = vpop.f32.mrf.mxu2 }
 0x159   : > { %v2929_v57 = vpop.f32.mrf.mxu0 }
 0x15a   : > { %576 = vmax.xlane.f32.xlu0 %v2929_v57 }
 0x161   : > { %v2932_v58 = vpop.f32.mrf.mxu0 }
 0x162   : > { %578 = vmax.xlane.f32.xlu1 %v2932_v58 }
 0x169   : > { %v2935_v59 = vpop.f32.mrf.mxu0 }
 0x16a   : > { %580 = vmax.xlane.f32.xlu2 %v2935_v59 }
 0x171   : > { %v2938_v60 = vpop.f32.mrf.mxu0 }
 0x172   : > { %582 = vmax.xlane.f32.xlu0 %v2938_v60 }
 0x179   : > { %v2941_v61 = vpop.f32.mrf.mxu0 }
 0x17a   : > { %584 = vmax.xlane.f32.xlu1 %v2941_v61 }
 0x181   : > { %v2944_v62 = vpop.f32.mrf.mxu0 }
 0x182   : > { %586 = vmax.xlane.f32.xlu2 %v2944_v62 }
 0x185   : > { %v559_v63 = vpop.xlane.xlu0 %558 }
 0x186   : > { %v622_v0 = vsub.f32 %v2879_v39, %v559_v63 }
 0x188   : > { %v654_v1 = vmul.f32 1.442695, %v622_v0 }
 0x189   : > { %v2948_v2 = vpop.f32.mrf.mxu0 }
 0x18a   : > { %2512 = vpow2.f32 %v654_v1  ;;  %588 = vmax.xlane.f32.xlu0 %v2948_v2 }
 0x18b   : > { %v2965_v13 = vpop.xlane.xlu2 %602 }
 0x18d   : > { %v561_v3 = vpop.xlane.xlu0 %560 }
 0x18e   : > { %v623_v4 = vsub.f32 %v2885_v41, %v561_v3 }
 0x190   : > { %v2952_v5 = vpop.eup %2512  ;;  %v656_v6 = vmul.f32 1.442695, %v623_v4 }
 0x191   : > { %718 = vadd.xlane.f32.xlu2 %v2952_v5  ;;  %v2955_v7 = vpop.f32.mrf.mxu0 }
 0x192   : > { %2514 = vpow2.f32 %v656_v6  ;;  %590 = vmax.xlane.f32.xlu1 %v2955_v7 }
 0x195   : > { %v563_v8 = vpop.xlane.xlu1 %562  ;;  %v2984_v26 = vpop.xlane.xlu0 %604 }
 0x196   : > { %v624_v9 = vsub.f32 %v2892_v45, %v563_v8 }
 0x198   : > { %v2959_v10 = vpop.eup %2514  ;;  %v658_v11 = vmul.f32 1.442695, %v624_v9 }
 0x199   : > { %720 = vadd.xlane.f32.xlu0 %v2959_v10  ;;  %v2962_v12 = vpop.f32.mrf.mxu0 }
 0x19a   : > { %592 = vmax.xlane.f32.xlu2 %v2962_v12  ;;  %2516 = vpow2.f32 %v658_v11 }
 0x19d   : > { %v565_v14 = vpop.xlane.xlu1 %564  ;;  %v2997_v34 = vpop.xlane.xlu0 %606 }
 0x19e   : > { %v625_v15 = vsub.f32 %v2898_v47, %v565_v14 }
 0x1a0   : > { %v660_v16 = vmul.f32 1.442695, %v625_v15  ;;  %v2968_v17 = vpop.eup %2516 }
 0x1a1   : > { %722 = vadd.xlane.f32.xlu0 %v2968_v17  ;;  %v2971_v18 = vpop.f32.mrf.mxu0 }
 0x1a2   : > { %2518 = vpow2.f32 %v660_v16 }
 0x1a5   : > { %v567_v19 = vpop.xlane.xlu2 %566  ;;  %v2980_v23 = vpop.xlane.xlu1 %608 }
 0x1a6   : > { %v626_v22 = vsub.f32 %v2907_v50, %v567_v19 }
 0x1a8   : > { %v2975_v21 = vpop.eup %2518  ;;  %v662_v27 = vmul.f32 1.442695, %v626_v22 }
 0x1a9   : > { %724 = vadd.xlane.f32.xlu1 %v2975_v21  ;;  %594 = vmax.xlane.f32.xlu0 %v2971_v18  ;;  %v2982_v24 = vpop.f32.mrf.mxu0 }
 0x1aa   : > { %2520 = vpow2.f32 %v662_v27 }
 0x1ad   : > { %v569_v25 = vpop.xlane.xlu2 %568  ;;  %v2991_v31 = vpop.xlane.xlu1 %610 }
 0x1ae   : > { %v627_v28 = vsub.f32 %v2913_v52, %v569_v25  ;;  %v3014_v52 = vpop.f32.mrf.mxu2 }
 0x1b0   : > { %v664_v30 = vmul.f32 1.442695, %v627_v28  ;;  %v2995_v33 = vpop.eup %2520 }
 0x1b1   : > { %616 = vmax.xlane.f32.xlu0 %v2987_v29  ;;  %596 = vmax.xlane.f32.xlu1 %v2982_v24  ;;  %v2993_v32 = vpop.f32.mrf.mxu0 }
 0x1b2   : > { %2522 = vpow2.f32 %v664_v30 }
 0x1b5   : > { %v3005_v37 = vpop.xlane.xlu2 %612  ;;  %v571_v41 = vpop.xlane.xlu0 %570 }
 0x1b6   : > { %v628_v45 = vsub.f32 %v2919_v54, %v571_v41 }
 0x1b8   : > { %v2999_v35 = vpop.eup %2522  ;;  %v666_v50 = vmul.f32 1.442695, %v628_v45 }
 0x1b9   : > { %728 = vadd.xlane.f32.xlu2 %v2999_v35  ;;  %726 = vadd.xlane.f32.xlu1 %v2995_v33  ;;  %v3008_v44 = vpop.f32.mrf.mxu0 }
 0x1bd   : > { %v573_v38 = vpop.xlane.xlu1 %572 }
 0x1be   : > { %v629_v39 = vsub.f32 %v2923_v55, %v573_v38 }
 0x1c0   : > { %v668_v42 = vmul.f32 1.442695, %v629_v39 }
 0x1c1   : > { %598 = vmax.xlane.f32.xlu1 %v2993_v32  ;;  %600 = vmax.xlane.f32.xlu2 %v3008_v44 }
 0x1c2   : > { %2524 = vpow2.f32 %v668_v42 }
 0x1c5   : > { %v575_v47 = vpop.xlane.xlu2 %574 }
 0x1c6   : > { %v630_v48 = vsub.f32 %v2926_v56, %v575_v47 }
 0x1c8   : > { %v3016_v63 = vpop.eup %2524  ;;  %v670_v55 = vmul.f32 1.442695, %v630_v48 }
 0x1c9   : > { %732 = vadd.xlane.f32.xlu0 %v3016_v63  ;;  %620 = vmax.xlane.f32.xlu1 %v3014_v52 }
 0x1ca   : > { %2526 = vpow2.f32 %v670_v55  ;;  %614 = vmax.xlane.f32.xlu2 %v2973_v20 }
 0x1cb   : > { %2528 = vpow2.f32 %v666_v50 }
 0x1cd   : > { %v577_v0 = vpop.xlane.xlu0 %576 }
 0x1ce   : > { %v631_v54 = vsub.f32 %v2929_v57, %v577_v0 }
 0x1d0   : > { %v3022_v1 = vpop.eup %2526  ;;  %v672_v56 = vmul.f32 1.442695, %v631_v54 }
 0x1d1   : > { %v3024_v3 = vpop.eup %2528  ;;  %734 = vadd.xlane.f32.xlu0 %v3022_v1 }
 0x1d2   : > { %2530 = vpow2.f32 %v672_v56  ;;  %730 = vadd.xlane.f32.xlu2 %v3024_v3 }
 0x1d5   : > { %v579_v4 = vpop.xlane.xlu1 %578 }
 0x1d6   : > { %v632_v6 = vsub.f32 %v2932_v58, %v579_v4 }
 0x1d8   : > { %v3029_v8 = vpop.eup %2530  ;;  %v674_v9 = vmul.f32 1.442695, %v632_v6 }
 0x1d9   : > { %618 = vmax.xlane.f32.xlu0 %v3003_v36  ;;  %736 = vadd.xlane.f32.xlu1 %v3029_v8 }
 0x1da   : > { %2532 = vpow2.f32 %v674_v9 }
 0x1dd   : > { %v581_v57 = vpop.xlane.xlu2 %580 }
 0x1de   : > { %v633_v11 = vsub.f32 %v2935_v59, %v581_v57 }
 0x1e0   : > { %v3034_v14 = vpop.eup %2532  ;;  %v676_v15 = vmul.f32 1.442695, %v633_v11 }
 0x1e1   : > { %738 = vadd.xlane.f32.xlu1 %v3034_v14 }
 0x1e2   : > { %2534 = vpow2.f32 %v676_v15 }
 0x1e5   : > { %v583_v16 = vpop.xlane.xlu0 %582 }
 0x1e6   : > { %v634_v58 = vsub.f32 %v2938_v60, %v583_v16 }
 0x1e8   : > { %v3038_v19 = vpop.eup %2534  ;;  %v678_v22 = vmul.f32 1.442695, %v634_v58 }
 0x1e9   : > { %740 = vadd.xlane.f32.xlu2 %v3038_v19 }
 0x1ea   : > { %2536 = vpow2.f32 %v678_v22 }
 0x1ed   : > { %v585_v25 = vpop.xlane.xlu1 %584 }
 0x1ee   : > { %v635_v27 = vsub.f32 %v2941_v61, %v585_v25 }
 0x1f0   : > { %v3042_v28 = vpop.eup %2536  ;;  %v680_v59 = vmul.f32 1.442695, %v635_v27 }
 0x1f1   : > { %742 = vadd.xlane.f32.xlu2 %v3042_v28 }
 0x1f2   : > { %2538 = vpow2.f32 %v680_v59 }
 0x1f5   : > { %v587_v30 = vpop.xlane.xlu2 %586 }
 0x1f6   : > { %v636_v38 = vsub.f32 %v2944_v62, %v587_v30 }
 0x1f8   : > { %v3046_v39 = vpop.eup %2538  ;;  %v682_v60 = vmul.f32 1.442695, %v636_v38 }
 0x1f9   : > { %744 = vadd.xlane.f32.xlu0 %v3046_v39 }
 0x1fa   : > { %2540 = vpow2.f32 %v682_v60 }
 0x1fd   : > { %v589_v41 = vpop.xlane.xlu0 %588 }
 0x1fe   : > { %v637_v42 = vsub.f32 %v2948_v2, %v589_v41 }
 0x200   : > { %v3050_v45 = vpop.eup %2540  ;;  %v684_v61 = vmul.f32 1.442695, %v637_v42 }
 0x201   : > { %746 = vadd.xlane.f32.xlu1 %v3050_v45 }
 0x202   : > { %2542 = vpow2.f32 %v684_v61 }
 0x204   : > { %v719_v47 = vpop.xlane.xlu2 %718 }
 0x205   : > { %v591_v48 = vpop.xlane.xlu1 %590 }
 0x206   : > { %v638_v50 = vsub.f32 %v2955_v7, %v591_v48 }
 0x208   : > { %v3054_v62 = vpop.eup %2542  ;;  %v686_v55 = vmul.f32 1.442695, %v638_v50 }
 0x209   : > { %748 = vadd.xlane.f32.xlu2 %v3054_v62 }
 0x20a   : > { %2544 = vpow2.f32 %v686_v55 }
 0x20b   : > { %2546 = vrcp.f32 %v719_v47 }
 0x20c   : > { %v721_v0 = vpop.xlane.xlu0 %720 }
 0x20d   : > { %2548 = vrcp.f32 %v721_v0  ;;  %v593_v2 = vpop.xlane.xlu2 %592 }
 0x20e   : > { %v639_v54 = vsub.f32 %v2962_v12, %v593_v2 }
 0x210   : > { %v3058_v56 = vpop.eup %2544  ;;  %v688_v4 = vmul.f32 1.442695, %v639_v54 }
 0x211   : > { %v2547_v6 = vpop.eup %2546  ;;  %750 = vadd.xlane.f32.xlu0 %v3058_v56 }
 0x212   : > { %2550 = vpow2.f32 %v688_v4  ;;  %v3062_v9 = vmul.f32 %v2547_v6, %v2952_v5 }
 0x213   : > { %v2549_v7 = vpop.eup %2548 }
 0x214   : > { %v3065_v57 = vmul.f32 %v2549_v7, %v2959_v10  ;;  %v723_v11 = vpop.xlane.xlu0 %722 }
 0x215   : > { %2552 = vrcp.f32 %v723_v11 }
 0x216   : > { %v846_v15 = vpack.c.bf16 %v3065_v57, %v3062_v9 }
 0x218   : > { %v3069_v16 = vpop.eup %2550 }
 0x219   : > { %752 = vadd.xlane.f32.xlu1 %v3069_v16 }
 0x21b   : > { %v2553_v5 = vpop.eup %2552 }
 0x21c   : > { %v725_v12 = vpop.xlane.xlu1 %724  ;;  %v595_v58 = vpop.xlane.xlu0 %594  ;;  %v3074_v10 = vmul.f32 %v2553_v5, %v2968_v17 }
 0x21d   : > { %2554 = vrcp.f32 %v725_v12  ;;  %v640_v22 = vsub.f32 %v2971_v18, %v595_v58  ;;  %v644_v18 = vsub.f32 %v2882_v40, %v2965_v13  ;;  %v646_v12 = vsub.f32 %v2896_v46, %v2997_v34 }
 0x21e   : > { %v649_v34 = vsub.f32 %v2917_v53, %v3005_v37 }
 0x21f   : > { %v690_v25 = vmul.f32 1.442695, %v640_v22  ;;  %v702_v58 = vmul.f32 1.442695, %v646_v12 }
 0x221   : > { %2556 = vpow2.f32 %v690_v25 }
 0x223   : > { %v2555_v27 = vpop.eup %2554 }
 0x224   : > { %v3077_v59 = vmul.f32 %v2555_v27, %v2975_v21  ;;  %v597_v30 = vpop.xlane.xlu1 %596  ;;  %v698_v21 = vmul.f32 1.442695, %v644_v18  ;;  %v3092_v50 = vpop.xlane.xlu0 %616 }
 0x225   : > { %v641_v38 = vsub.f32 %v2982_v24, %v597_v30  ;;  %v647_v24 = vsub.f32 %v2905_v49, %v2980_v23 }
 0x226   : > { %v847_v60 = vpack.c.bf16 %v3077_v59, %v3074_v10 }
 0x227   : > { %v3082_v41 = vpop.eup %2556  ;;  %v692_v42 = vmul.f32 1.442695, %v641_v38  ;;  %v704_v0 = vmul.f32 1.442695, %v647_v24 }
 0x228   : > { %754 = vadd.xlane.f32.xlu2 %v3082_v41 }
 0x229   : > { %2558 = vpow2.f32 %v692_v42 }
 0x22c   : > { %v729_v17 = vpop.xlane.xlu2 %728  ;;  %v727_v61 = vpop.xlane.xlu1 %726 }
 0x22d   : > { %2560 = vrcp.f32 %v729_v17  ;;  %v651_v17 = vsub.f32 %v2987_v29, %v3092_v50 }
 0x22e   : > { %2562 = vrcp.f32 %v727_v61 }
 0x22f   : > { %v3087_v47 = vpop.eup %2558  ;;  %2564 = vpow2.f32 %v698_v21  ;;  %v712_v29 = vmul.f32 1.442695, %v651_v17 }
 0x230   : > { %756 = vadd.xlane.f32.xlu0 %v3087_v47  ;;  %2566 = vpow2.f32 %v704_v0 }
 0x233   : > { %v2561_v48 = vpop.eup %2560 }
 0x234   : > { %v2563_v55 = vpop.eup %2562  ;;  %v3095_v40 = vmul.f32 %v2561_v48, %v2999_v35  ;;  %v599_v13 = vpop.xlane.xlu1 %598  ;;  %v645_v35 = vsub.f32 %v2889_v43, %v2984_v26  ;;  %v648_v43 = vsub.f32 %v2911_v51, %v2991_v31  ;;  %v708_v31 = vmul.f32 1.442695, %v649_v34 }
 0x235   : > { %v601_v2 = vpop.xlane.xlu2 %600  ;;  %v3098_v54 = vmul.f32 %v2563_v55, %v2995_v33  ;;  %v642_v4 = vsub.f32 %v2993_v32, %v599_v13  ;;  %v3104_v11 = vpop.eup %2564 }
 0x236   : > { %v643_v49 = vsub.f32 %v3008_v44, %v601_v2  ;;  %v700_v33 = vmul.f32 1.442695, %v645_v35  ;;  %v3112_v25 = vpop.eup %2566  ;;  %v706_v30 = vmul.f32 1.442695, %v648_v43 }
 0x237   : > { %v694_v23 = vmul.f32 1.442695, %v642_v4  ;;  %v848_v7 = vpack.c.bf16 %v3095_v40, %v3098_v54 }
 0x238   : > { %v696_v6 = vmul.f32 1.442695, %v643_v49  ;;  %762 = vadd.xlane.f32.xlu0 %v3104_v11 }
 0x239   : > { %2568 = vpow2.f32 %v694_v23 }
 0x23a   : > { %2570 = vpow2.f32 %v696_v6 }
 0x23b   : > { %2572 = vpow2.f32 %v700_v33 }
 0x23c   : > { %v733_v32 = vpop.xlane.xlu0 %732  ;;  %v621_v5 = vpop.xlane.xlu1 %620  ;;  %2574 = vpow2.f32 %v702_v58 }
 0x23d   : > { %v615_v44 = vpop.xlane.xlu2 %614 }
 0x23e   : > { %v650_v22 = vsub.f32 %v2973_v20, %v615_v44  ;;  %v653_v20 = vsub.f32 %v3014_v52, %v621_v5 }
 0x23f   : > { %v3114_v27 = vpop.eup %2568 }
 0x240   : > { %v710_v26 = vmul.f32 1.442695, %v650_v22  ;;  %v3118_v46 = vpop.eup %2570  ;;  %758 = vadd.xlane.f32.xlu1 %v3114_v27  ;;  %768 = vadd.xlane.f32.xlu0 %v3112_v25  ;;  %v716_v42 = vmul.f32 1.442695, %v653_v20 }
 0x241   : > { %760 = vadd.xlane.f32.xlu2 %v3118_v46  ;;  %v3126_v18 = vpop.eup %2572 }
 0x242   : > { %2576 = vpow2.f32 %v710_v26  ;;  %v3128_v53 = vpop.eup %2574 }
 0x243   : > { %2578 = vrcp.f32 %v733_v32 }
 0x244   : > { %v735_v51 = vpop.xlane.xlu0 %734 }
 0x245   : > { %v731_v38 = vpop.xlane.xlu2 %730 }
 0x246   : > { %2580 = vrcp.f32 %v731_v38 }
 0x247   : > { %2582 = vpow2.f32 %v706_v30 }
 0x248   : > { %v3130_v37 = vpop.eup %2576  ;;  %2584 = vpow2.f32 %v708_v31  ;;  %764 = vadd.xlane.f32.xlu1 %v3126_v18 }
 0x249   : > { %v2579_v52 = vpop.eup %2578  ;;  %2586 = vpow2.f32 %v716_v42  ;;  %766 = vadd.xlane.f32.xlu2 %v3128_v53  ;;  %774 = vadd.xlane.f32.xlu0 %v3130_v37 }
 0x24a   : > { %2588 = vrcp.f32 %v735_v51  ;;  %v3138_v48 = vmul.f32 %v2579_v52, %v3016_v63 }
 0x24c   : > { %v2581_v61 = vpop.eup %2580  ;;  %v619_v21 = vpop.xlane.xlu0 %618 }
 0x24d   : > { %v737_v24 = vpop.xlane.xlu1 %736  ;;  %v3141_v55 = vmul.f32 %v2581_v61, %v3024_v3  ;;  %v652_v0 = vsub.f32 %v3003_v36, %v619_v21  ;;  %v3144_v13 = vpop.eup %2582 }
 0x24e   : > { %2590 = vrcp.f32 %v737_v24  ;;  %v3146_v50 = vpop.eup %2584 }
 0x24f   : > { %v714_v2 = vmul.f32 1.442695, %v652_v0  ;;  %v849_v4 = vpack.c.bf16 %v3138_v48, %v3141_v55  ;;  %v3150_v49 = vpop.eup %2586 }
 0x250   : > { %v2589_v23 = vpop.eup %2588  ;;  %770 = vadd.xlane.f32.xlu1 %v3144_v13 }
 0x251   : > { %2592 = vpow2.f32 %v714_v2  ;;  %772 = vadd.xlane.f32.xlu2 %v3146_v50  ;;  %780 = vadd.xlane.f32.xlu0 %v3150_v49  ;;  %v3156_v63 = vmul.f32 %v2589_v23, %v3022_v1 }
 0x252   : > { %2594 = vpow2.f32 %v712_v29 }
 0x254   : > { %v2591_v36 = vpop.eup %2590 }
 0x255   : > { %v3159_v3 = vmul.f32 %v2591_v36, %v3029_v8  ;;  %v739_v32 = vpop.xlane.xlu1 %738 }
 0x256   : > { %2596 = vrcp.f32 %v739_v32 }
 0x257   : > { %v850_v6 = vpack.c.bf16 %v3159_v3, %v3156_v63  ;;  %v3163_v35 = vpop.eup %2592 }
 0x258   : > { %v3165_v12 = vpop.eup %2594 }
 0x259   : > { %776 = vadd.xlane.f32.xlu1 %v3165_v12  ;;  %778 = vadd.xlane.f32.xlu2 %v3163_v35 }
 0x25c   : > { %v741_v33 = vpop.xlane.xlu2 %740  ;;  %v2597_v1 = vpop.eup %2596 }
 0x25d   : > { %2598 = vrcp.f32 %v741_v33  ;;  %v3170_v8 = vmul.f32 %v2597_v1, %v3034_v14 }
 0x263   : > { %v2599_v44 = vpop.eup %2598 }
 0x264   : > { %v3173_v58 = vmul.f32 %v2599_v44, %v3038_v19  ;;  %v743_v5 = vpop.xlane.xlu2 %742 }
 0x265   : > { %2600 = vrcp.f32 %v743_v5 }
 0x266   : > { %v851_v22 = vpack.c.bf16 %v3173_v58, %v3170_v8 }
 0x26b   : > { %v2601_v26 = vpop.eup %2600 }
 0x26c   : > { %v745_v43 = vpop.xlane.xlu0 %744  ;;  %v3178_v20 = vmul.f32 %v2601_v26, %v3042_v28 }
 0x26d   : > { %2602 = vrcp.f32 %v745_v43 }
 0x273   : > { %v2603_v34 = vpop.eup %2602 }
 0x274   : > { %v3181_v30 = vmul.f32 %v2603_v34, %v3046_v39  ;;  %v747_v19 = vpop.xlane.xlu1 %746 }
 0x275   : > { %2604 = vrcp.f32 %v747_v19 }
 0x276   : > { %v852_v14 = vpack.c.bf16 %v3181_v30, %v3178_v20 }
 0x27b   : > { %v2605_v31 = vpop.eup %2604 }
 0x27c   : > { %v749_v51 = vpop.xlane.xlu2 %748  ;;  %v3186_v42 = vmul.f32 %v2605_v31, %v3050_v45 }
 0x27d   : > { %2606 = vrcp.f32 %v749_v51 }
 0x283   : > { %v2607_v38 = vpop.eup %2606 }
 0x284   : > { %v3189_v52 = vmul.f32 %v2607_v38, %v3054_v62  ;;  %v751_v39 = vpop.xlane.xlu0 %750 }
 0x285   : > { %2608 = vrcp.f32 %v751_v39 }
 0x286   : > { %v853_v28 = vpack.c.bf16 %v3189_v52, %v3186_v42 }
 0x28b   : > { %v2609_v61 = vpop.eup %2608 }
 0x28c   : > { %v753_v17 = vpop.xlane.xlu1 %752  ;;  %v830_v24 = vmul.f32 %v2609_v61, %v3058_v56 }
 0x28d   : > { %2610 = vrcp.f32 %v753_v17 }
 0x293   : > { %v2611_v21 = vpop.eup %2610 }
 0x294   : > { %v831_v0 = vmul.f32 %v2611_v21, %v3069_v16 }
 0x296   : > { %v3195_v29 = vpack.c.bf16 %v831_v0, %v830_v24 }
 0x298   : > { %2488 = vxpose.binary.xlu1.c.b16.start [1/16] %v3195_v29, %v846_v15, 128 }
 0x29b   : > { %v755_v45 = vpop.xlane.xlu2 %754 }
 0x29c   : > { %2612 = vrcp.f32 %v755_v45 }
 0x2a2   : > { %v2613_v2 = vpop.eup %2612 }
 0x2a3   : > { %v757_v62 = vpop.xlane.xlu0 %756  ;;  %v832_v36 = vmul.f32 %v2613_v2, %v3082_v41 }
 0x2a4   : > { %2614 = vrcp.f32 %v757_v62 }
 0x2aa   : > { %v2615_v23 = vpop.eup %2614 }
 0x2ab   : > { %v833_v32 = vmul.f32 %v2615_v23, %v3087_v47  ;;  %v763_v56 = vpop.xlane.xlu0 %762 }
 0x2ad   : > { %v3203_v33 = vpack.c.bf16 %v833_v32, %v832_v36 }
 0x2af   : > { %2489 = vxpose.binary.xlu1.c.b16.cont [2/16] %v3203_v33, %v847_v60, 128 }
 0x2b3   : > { %v759_v9 = vpop.xlane.xlu1 %758  ;;  %v769_v57 = vpop.xlane.xlu0 %768 }
 0x2b4   : > { %2616 = vrcp.f32 %v759_v9  ;;  %v761_v15 = vpop.xlane.xlu2 %760 }
 0x2b5   : > { %2618 = vrcp.f32 %v761_v15 }
 0x2ba   : > { %v2617_v16 = vpop.eup %2616 }
 0x2bb   : > { %v834_v1 = vmul.f32 %v2617_v16, %v3114_v27  ;;  %v765_v44 = vpop.xlane.xlu1 %764  ;;  %v2619_v41 = vpop.eup %2618 }
 0x2bc   : > { %v767_v5 = vpop.xlane.xlu2 %766  ;;  %v835_v47 = vmul.f32 %v2619_v41, %v3118_v46  ;;  %v775_v43 = vpop.xlane.xlu0 %774  ;;  %2620 = vrcp.f32 %v765_v44  ;;  %v864_v41 = vld [vmem:[#allocation3 + $0x10] sm:$0xff] }
 0x2bd   : > { %2622 = vrcp.f32 %v763_v56 }
 0x2be   : > { %v856_v26 = vpack.c.bf16 %v835_v47, %v834_v1 }
 0x2c0   : > { %2490 = vxpose.binary.xlu1.c.b16.cont [3/16] %v856_v26, %v848_v7, 128 }
 0x2c2   : > { %v2621_v60 = vpop.eup %2620 }
 0x2c3   : > { %v771_v10 = vpop.xlane.xlu1 %770  ;;  %v2623_v19 = vpop.eup %2622  ;;  %v837_v27 = vmul.f32 %v2621_v60, %v3126_v18 }
 0x2c4   : > { %v773_v59 = vpop.xlane.xlu2 %772  ;;  %v781_v34 = vpop.xlane.xlu0 %780  ;;  %v836_v46 = vmul.f32 %v2623_v19, %v3104_v11 }
 0x2c5   : > { %2624 = vrcp.f32 %v781_v34 }
 0x2c6   : > { %v857_v38 = vpack.c.bf16 %v837_v27, %v836_v46  ;;  %v866_v27 = vld [vmem:[#allocation3 + $0x48] sm:$0xff] }
 0x2cb   : > { %v2625_v40 = vpop.eup %2624 }
 0x2cc   : > { %v777_v51 = vpop.xlane.xlu1 %776  ;;  %v779_v31 = vpop.xlane.xlu2 %778  ;;  %v845_v39 = vmul.f32 %v2625_v40, %v3150_v49 }
 0x2cd   : > { %2626 = vrcp.f32 %v777_v51 }
 0x2ce   : > { %2628 = vrcp.f32 %v779_v31 }
 0x2cf   : > { %2630 = vrcp.f32 %v775_v43 }
 0x2d0   : > { %2632 = vrcp.f32 %v771_v10  ;;  %2491 = vxpose.binary.xlu1.c.b16.cont [4/16] %v857_v38, %v849_v4, 128  ;;  %v865_v10 = vld [vmem:[#allocation3 + $0x40] sm:$0xff] }
 0x2d1   : > { %2634 = vrcp.f32 %v773_v59 }
 0x2d2   : > { %2636 = vrcp.f32 %v767_v5 }
 0x2d3   : > { %v2627_v54 = vpop.eup %2626  ;;  %2638 = vrcp.f32 %v769_v57  ;;  %v863_v57 = vld [vmem:[#allocation3 + $0x68] sm:$0xff] }
 0x2d4   : > { %v2629_v7 = vpop.eup %2628  ;;  %v843_v21 = vmul.f32 %v2627_v54, %v3165_v12 }
 0x2d5   : > { %v844_v18 = vmul.f32 %v2629_v7, %v3163_v35  ;;  %v2631_v17 = vpop.eup %2630 }
 0x2d6   : > { %v2633_v11 = vpop.eup %2632  ;;  %v842_v45 = vmul.f32 %v2631_v17, %v3130_v37 }
 0x2d7   : > { %v861_v61 = vpack.c.bf16 %v845_v39, %v844_v18  ;;  %v2635_v24 = vpop.eup %2634  ;;  %v840_v4 = vmul.f32 %v2633_v11, %v3144_v13  ;;  %v868_v39 = vld [vmem:[#allocation3 + $0x70] sm:$0xff] }
 0x2d8   : > { %v2637_v0 = vpop.eup %2636  ;;  %v860_v55 = vpack.c.bf16 %v843_v21, %v842_v45  ;;  %v841_v62 = vmul.f32 %v2635_v24, %v3146_v50  ;;  %v869_v24 = vld [vmem:[#allocation3 + $0x38] sm:$0xff] }
 0x2d9   : > { %2403 = vmatpush.lsf.bf16.msrb.mxu1 %v861_v61  ;;  %v2639_v48 = vpop.eup %2638  ;;  %v838_v35 = vmul.f32 %v2637_v0, %v3128_v53 }
 0x2da   : > { %v839_v49 = vmul.f32 %v2639_v48, %v3112_v25  ;;  %v859_v2 = vpack.c.bf16 %v841_v62, %v840_v4  ;;  %v870_v4 = vld [vmem:[#allocation3 + $0x20] sm:$0xff] }
 0x2dc   : > { %v858_v23 = vpack.c.bf16 %v839_v49, %v838_v35 }
 0x2dd   : > { %2404 = vmatpush.lsf.bf16.msrb.mxu1 %v860_v55 }
 0x2e0   : > { %2492 = vxpose.binary.xlu1.c.b16.cont [5/16] %v858_v23, %v850_v6, 128  ;;  %v2765_v6 = vmov 1065369472  }
 0x2e1   : > { %2405 = vmatpush.lsf.bf16.msrb.mxu1 %v859_v2 }
 0x2e5   : > { %2406 = vmatpush.lsf.bf16.msrb.mxu1 %v858_v23 }
 0x2e9   : > { %2407 = vmatpush.lsf.bf16.msrb.mxu1 %v857_v38  ;;  %v867_v38 = vld [vmem:[#allocation3 + $0x30] sm:$0xff] }
 0x2ed   : > { %2408 = vmatpush.lsf.bf16.msrb.mxu1 %v856_v26 }
 0x2f0   : > { %2493 = vxpose.binary.xlu1.c.b16.cont [6/16] %v859_v2, %v851_v22, 128 }
 0x2f1   : > { %2409 = vmatpush.lsf.bf16.msrb.mxu1 %v3203_v33 }
 0x2f5   : > { %2410 = vmatpush.lsf.bf16.msrb.mxu1 %v3195_v29  ;;  %v862_v29 = vld [vmem:[#allocation3 + $0x28] sm:$0xff] }
 0x2f7   : > { %2411 = vllmr.16.mxu1 }
 0x300   : > { %2494 = vxpose.binary.xlu1.c.b16.cont [7/16] %v860_v55, %v852_v14, 128 }
 0x310   : > { %2495 = vxpose.binary.xlu1.c.b16.end [8/16] %v861_v61, %v853_v28, 128 }
 0x34c   : > { %v3241_v25 = vpop.trf.xlu1 }
 0x34d   : > { %918 = vmatmul.bf16.vlgmr.msra.gmra.mxu1 %v3241_v25 }
 0x34e   : > { %1105 = vmatpush.bf16.msra.mxu1 %v2765_v6 }
 0x352   : > { %1106 = vmatpush.bf16.msra.mxu1 %v2765_v6 }
 0x354   : > { %v2497_v53 = vpop.trf.xlu1 }
 0x355   : > { %967 = vmatmul.bf16.vlgmr.msrb.gmra.mxu2 %v2497_v53 }
 0x356   : > { %1107 = vmatpush.bf16.msra.mxu1 %v2765_v6 }
 0x35a   : > { %1108 = vmatpush.bf16.msra.mxu1 %v2765_v6 }
 0x35c   : > { %v3244_v37 = vpop.trf.xlu1 }
 0x35d   : > { %923 = vmatmul.bf16.gmra.mxu1 %v3244_v37 }
 0x35e   : > { %1109 = vmatpush.bf16.msra.mxu1 %v2765_v6 }
 0x362   : > { %1110 = vmatpush.bf16.msra.mxu1 %v2765_v6 }
 0x364   : > { %v2499_v13 = vpop.trf.xlu1 }
 0x365   : > { %972 = vmatmul.bf16.gmra.mxu2 %v2499_v13 }
 0x366   : > { %1111 = vmatpush.bf16.msra.mxu1 %v2765_v6 }
 0x36a   : > { %1112 = vmatpush.bf16.msra.mxu1 %v2765_v6 }
 0x36c   : > { %v3247_v50 = vpop.trf.xlu1 }
 0x36d   : > { %928 = vmatmul.bf16.gmra.mxu1 %v3247_v50 }
 0x374   : > { %v2501_v63 = vpop.trf.xlu1 }
 0x375   : > { %977 = vmatmul.bf16.gmra.mxu2 %v2501_v63  ;;  %v872_v63 = vld [vmem:[#allocation3 + $0x18] sm:$0xff] }
 0x37c   : > { %v3250_v3 = vpop.trf.xlu1 }
 0x37d   : > { %933 = vmatmul.bf16.gmra.mxu1 %v3250_v3 }
 0x384   : > { %v2503_v12 = vpop.trf.xlu1 }
 0x385   : > { %982 = vmatmul.bf16.gmra.mxu2 %v2503_v12 }
 0x38c   : > { %v3253_v8 = vpop.trf.xlu1 }
 0x38d   : > { %938 = vmatmul.bf16.gmra.mxu1 %v3253_v8 }
 0x394   : > { %v2505_v58 = vpop.trf.xlu1 }
 0x395   : > { %987 = vmatmul.bf16.gmra.mxu2 %v2505_v58 }
 0x39c   : > { %v3256_v22 = vpop.trf.xlu1 }
 0x39d   : > { %943 = vmatmul.bf16.vlgmr.msra.gmra.mxu3 %v3256_v22  ;;  %2412 = vmatmul.lmr.bf16.vlgmr.msra.gmra.16.mxu1 }
 0x39e   : > { %1056 = vmatpush.bf16.msra.mxu3 %v2765_v6 }
 0x3a2   : > { %1057 = vmatpush.bf16.msra.mxu3 %v2765_v6 }
 0x3a4   : > { %v2507_v20 = vpop.trf.xlu1 }
 0x3a5   : > { %992 = vmatmul.bf16.gmra.mxu2 %v2507_v20  ;;  %2413 = vmatmul.lmr.bf16.gmra.16.mxu1 }
 0x3a6   : > { %1058 = vmatpush.bf16.msra.mxu3 %v2765_v6 }
 0x3aa   : > { %1059 = vmatpush.bf16.msra.mxu3 %v2765_v6 }
 0x3ac   : > { %v3259_v30 = vpop.trf.xlu1 }
 0x3ad   : > { %948 = vmatmul.bf16.gmra.mxu3 %v3259_v30  ;;  %2414 = vmatmul.lmr.bf16.gmra.16.mxu1 }
 0x3ae   : > { %1060 = vmatpush.bf16.msra.mxu3 %v2765_v6 }
 0x3b2   : > { %1061 = vmatpush.bf16.msra.mxu3 %v2765_v6 }
 0x3b4   : > { %v2509_v14 = vpop.trf.xlu1 }
 0x3b5   : > { %2415 = vmatmul.lmr.bf16.gmra.16.mxu1 }
 0x3b6   : > { %1062 = vmatpush.bf16.msra.mxu3 %v2765_v6 }
 0x3ba   : > { %1063 = vmatpush.bf16.msra.mxu3 %v2765_v6 }
 0x3bc   : > { %v3262_v42 = vpop.trf.xlu1 }
 0x3bd   : > { %953 = vmatmul.bf16.gmra.mxu3 %v3262_v42  ;;  %2416 = vmatmul.lmr.bf16.gmra.16.mxu1 }
 0x3c4   : > { %v2511_v33 = vpop.trf.xlu1 }
 0x3c5   : > { %2417 = vmatmul.lmr.bf16.gmra.16.mxu1 }
 0x3ca   : > { %v919_v52 = vpop.f32.mrf.mxu1 }
 0x3cd   : > { %997 = vmatmul.bf16.vlgmr.msrb.gmra.mxu3 %v2509_v14  ;;  %2418 = vmatmul.lmr.bf16.gmra.16.mxu1  ;;  %v873_v14 = vld [vmem:[#allocation3 + $0x58] sm:$0xff] }
 0x3d2   : > { %v921_v28 = vpop.f32.mrf.mxu1 }
 0x3d5   : > { %2419 = vmatmul.lmr.bf16.gmra.16.mxu1 }
 0x3d8   : > { %v968_v36 = vpop.f32.mrf.mxu2 }
 0x3d9   : > { %v969_v32 = vadd.f32 %v968_v36, %v919_v52 }
 0x3da   : > { %v924_v56 = vpop.f32.mrf.mxu1 }
 0x3db   : > { %v1008_v9 = vadd.f32 %v969_v32, %v862_v29 }
 0x3dd   : > { %1024 = vst [vmem:[#allocation3 + $0x28] sm:$0xff] %v1008_v9  ;;  %1002 = vmatmul.bf16.gmra.mxu3 %v2511_v33  ;;  %2420 = vmatmul.lmr.bf16.gmra.16.mxu1 }
 0x3e0   : > { %v970_v15 = vpop.f32.mrf.mxu2 }
 0x3e1   : > { %v971_v16 = vadd.f32 %v970_v15, %v921_v28 }
 0x3e2   : > { %v926_v44 = vpop.f32.mrf.mxu1 }
 0x3e3   : > { %v1009_v1 = vadd.f32 %v971_v16, %v863_v57 }
 0x3e5   : > { %1025 = vst [vmem:[#allocation3 + $0x68] sm:$0xff] %v1009_v1  ;;  %2421 = vmatmul.lmr.bf16.gmra.16.mxu1 }
 0x3e8   : > { %v973_v5 = vpop.f32.mrf.mxu2 }
 0x3e9   : > { %v974_v47 = vadd.f32 %v973_v5, %v924_v56  ;;  %v874_v56 = vld [vmem:[#allocation3] sm:$0xff] }
 0x3ea   : > { %v929_v26 = vpop.f32.mrf.mxu1  ;;  %v876_v5 = vld [vmem:[#allocation3 + $0x60] sm:$0xff] }
 0x3eb   : > { %v1010_v43 = vadd.f32 %v974_v47, %v864_v41 }
 0x3ed   : > { %1026 = vst [vmem:[#allocation3 + $0x10] sm:$0xff] %v1010_v43  ;;  %1064 = vmatmul.bf16.vlgmr.msra.gmra.mxu3 %v3241_v25  ;;  %2422 = vmatmul.lmr.bf16.gmra.16.mxu1  ;;  %v871_v25 = vld [vmem:[#allocation3 + $0x78] sm:$0xff] }
 0x3f0   : > { %v975_v59 = vpop.f32.mrf.mxu2 }
 0x3f1   : > { %v976_v60 = vadd.f32 %v975_v59, %v926_v44 }
 0x3f2   : > { %v931_v19 = vpop.f32.mrf.mxu1 }
 0x3f3   : > { %v1011_v34 = vadd.f32 %v976_v60, %v865_v10 }
 0x3f5   : > { %1027 = vst [vmem:[#allocation3 + $0x40] sm:$0xff] %v1011_v34  ;;  %2423 = vmatmul.lmr.bf16.gmra.16.mxu1 }
 0x3f8   : > { %v978_v51 = vpop.f32.mrf.mxu2 }
 0x3f9   : > { %v979_v31 = vadd.f32 %v978_v51, %v929_v26 }
 0x3fa   : > { %v934_v54 = vpop.f32.mrf.mxu1 }
 0x3fb   : > { %v1012_v46 = vadd.f32 %v979_v31, %v866_v27  ;;  %v1040_v27 = vld [vmem:[#allocation4 + $0x8] sm:$0xff] }
 0x3fd   : > { %1028 = vst [vmem:[#allocation3 + $0x48] sm:$0xff] %v1012_v46  ;;  %1069 = vmatmul.bf16.gmra.mxu3 %v3244_v37  ;;  %2424 = vmatmul.lmr.bf16.gmra.16.mxu1 }
 0x400   : > { %v980_v40 = vpop.f32.mrf.mxu2 }
 0x401   : > { %v981_v7 = vadd.f32 %v980_v40, %v931_v19 }
 0x402   : > { %v936_v61 = vpop.f32.mrf.mxu1 }
 0x403   : > { %v1013_v18 = vadd.f32 %v981_v7, %v867_v38  ;;  %v1041_v38 = vld [vmem:[#allocation4] sm:$0xff] }
 0x405   : > { %1029 = vst [vmem:[#allocation3 + $0x30] sm:$0xff] %v1013_v18  ;;  %2425 = vmatmul.lmr.bf16.gmra.16.mxu1  ;;  %v1042_v18 = vld [vmem:[#allocation4 + $0x48] sm:$0xff] }
 0x408   : > { %v983_v17 = vpop.f32.mrf.mxu2 }
 0x409   : > { %v984_v11 = vadd.f32 %v983_v17, %v934_v54 }
 0x40a   : > { %v939_v55 = vpop.f32.mrf.mxu1 }
 0x40b   : > { %v1014_v21 = vadd.f32 %v984_v11, %v868_v39 }
 0x40d   : > { %1030 = vst [vmem:[#allocation3 + $0x70] sm:$0xff] %v1014_v21  ;;  %1074 = vmatmul.bf16.gmra.mxu3 %v3247_v50  ;;  %2426 = vmatmul.lmr.bf16.gmra.16.mxu1  ;;  %v1043_v21 = vld [vmem:[#allocation4 + $0x60] sm:$0xff] }
 0x410   : > { %v985_v0 = vpop.f32.mrf.mxu2 }
 0x411   : > { %v986_v45 = vadd.f32 %v985_v0, %v936_v61 }
 0x412   : > { %v941_v2 = vpop.f32.mrf.mxu1 }
 0x413   : > { %v1015_v48 = vadd.f32 %v986_v45, %v869_v24 }
 0x415   : > { %1031 = vst [vmem:[#allocation3 + $0x38] sm:$0xff] %v1015_v48  ;;  %2427 = vmatmul.lmr.bf16.gmra.16.mxu1 }
 0x418   : > { %v988_v62 = vpop.f32.mrf.mxu2 }
 0x419   : > { %v989_v35 = vadd.f32 %v988_v62, %v939_v55  ;;  %v1044_v55 = vld [vmem:[#allocation4 + $0x68] sm:$0xff] }
 0x41a   : > { %v1114_v9 = vpop.f32.mrf.mxu1 }
 0x41b   : > { %v1016_v49 = vadd.f32 %v989_v35, %v870_v4 }
 0x41d   : > { %1032 = vst [vmem:[#allocation3 + $0x20] sm:$0xff] %v1016_v49  ;;  %1079 = vmatmul.bf16.gmra.mxu3 %v3250_v3 }
 0x420   : > { %v944_v23 = vpop.f32.mrf.mxu3  ;;  %v990_v53 = vpop.f32.mrf.mxu2 }
 0x421   : > { %v991_v37 = vadd.f32 %v990_v53, %v941_v2  ;;  %v1045_v2 = vld [vmem:[#allocation4 + $0x18] sm:$0xff] }
 0x422   : > { %v1116_v44 = vpop.f32.mrf.mxu1 }
 0x423   : > { %v1017_v13 = vadd.f32 %v991_v37, %v871_v25  ;;  %v1046_v37 = vld [vmem:[#allocation4 + $0x10] sm:$0xff] }
 0x425   : > { %1033 = vst [vmem:[#allocation3 + $0x78] sm:$0xff] %v1017_v13 }
 0x428   : > { %v946_v50 = vpop.f32.mrf.mxu3  ;;  %v993_v6 = vpop.f32.mrf.mxu2 }
 0x429   : > { %v994_v12 = vadd.f32 %v993_v6, %v944_v23 }
 0x42a   : > { %v1119_v26 = vpop.f32.mrf.mxu1 }
 0x42b   : > { %v1018_v58 = vadd.f32 %v994_v12, %v872_v63  ;;  %v1047_v12 = vld [vmem:[#allocation4 + $0x38] sm:$0xff] }
 0x42d   : > { %1034 = vst [vmem:[#allocation3 + $0x18] sm:$0xff] %v1018_v58  ;;  %1084 = vmatmul.bf16.gmra.mxu3 %v3253_v8  ;;  %v875_v8 = vld [vmem:[#allocation3 + $0x8] sm:$0xff] }
 0x430   : > { %v949_v20 = vpop.f32.mrf.mxu3  ;;  %v995_v52 = vpop.f32.mrf.mxu2 }
 0x431   : > { %v996_v28 = vadd.f32 %v995_v52, %v946_v50 }
 0x432   : > { %v1121_v34 = vpop.f32.mrf.mxu1 }
 0x433   : > { %v1019_v3 = vadd.f32 %v996_v28, %v873_v14  ;;  %v1048_v28 = vld [vmem:[#allocation4 + $0x40] sm:$0xff] }
 0x435   : > { %1035 = vst [vmem:[#allocation3 + $0x58] sm:$0xff] %v1019_v3 }
 0x438   : > { %v951_v29 = vpop.f32.mrf.mxu3 }
 0x43d   : > { %1089 = vmatmul.bf16.gmra.mxu3 %v3256_v22 }
 0x440   : > { %v954_v36 = vpop.f32.mrf.mxu3 }
 0x448   : > { %v956_v32 = vpop.f32.mrf.mxu3 }
 0x44d   : > { %1094 = vmatmul.bf16.gmra.mxu3 %v3259_v30  ;;  %v877_v30 = vld [vmem:[#allocation3 + $0x50] sm:$0xff] }
 0x450   : > { %v998_v33 = vpop.f32.mrf.mxu3 }
 0x451   : > { %v999_v57 = vadd.f32 %v998_v33, %v949_v20 }
 0x453   : > { %v1020_v15 = vadd.f32 %v999_v57, %v874_v56  ;;  %v1049_v56 = vld [vmem:[#allocation4 + $0x28] sm:$0xff] }
 0x455   : > { %1036 = vst [vmem:[#allocation3] sm:$0xff] %v1020_v15 }
 0x458   : > { %v1000_v16 = vpop.f32.mrf.mxu3 }
 0x459   : > { %v1001_v1 = vadd.f32 %v1000_v16, %v951_v29 }
 0x45b   : > { %v1021_v41 = vadd.f32 %v1001_v1, %v875_v8  ;;  %v1050_v8 = vld [vmem:[#allocation4 + $0x70] sm:$0xff] }
 0x45d   : > { %1037 = vst [vmem:[#allocation3 + $0x8] sm:$0xff] %v1021_v41  ;;  %1099 = vmatmul.bf16.gmra.mxu3 %v3262_v42  ;;  %v1124_v42 = vpop.f32.mrf.mxu1  ;;  %v1051_v41 = vld [vmem:[#allocation4 + $0x20] sm:$0xff] }
 0x460   : > { %v1003_v22 = vpop.f32.mrf.mxu3 }
 0x461   : > { %v1004_v47 = vadd.f32 %v1003_v22, %v954_v36 }
 0x463   : > { %v1022_v43 = vadd.f32 %v1004_v47, %v876_v5 }
 0x465   : > { %1038 = vst [vmem:[#allocation3 + $0x60] sm:$0xff] %v1022_v43  ;;  %v1126_v17 = vpop.f32.mrf.mxu1 }
 0x468   : > { %v1005_v10 = vpop.f32.mrf.mxu3 }
 0x469   : > { %v1006_v59 = vadd.f32 %v1005_v10, %v956_v32 }
 0x46b   : > { %v1023_v60 = vadd.f32 %v1006_v59, %v877_v30 }
 0x46d   : > { %1039 = vst [vmem:[#allocation3 + $0x50] sm:$0xff] %v1023_v60  ;;  %v1129_v45 = vpop.f32.mrf.mxu1 }
 0x470   : > { %v1065_v19 = vpop.f32.mrf.mxu3 }
 0x471   : > { %v1115_v51 = vadd.f32 %v1114_v9, %v1065_v19 }
 0x473   : > { %v1154_v31 = vadd.f32 %v1115_v51, %v1040_v27 }
 0x475   : > { %1170 = vst [vmem:[#allocation4 + $0x8] sm:$0xff] %v1154_v31  ;;  %v1131_v35 = vpop.f32.mrf.mxu1 }
 0x478   : > { %v1067_v46 = vpop.f32.mrf.mxu3 }
 0x479   : > { %v1117_v40 = vadd.f32 %v1116_v44, %v1067_v46  ;;  %v1054_v46 = vld [vmem:[#allocation4 + $0x50] sm:$0xff] }
 0x47b   : > { %v1155_v54 = vadd.f32 %v1117_v40, %v1041_v38 }
 0x47d   : > { %1171 = vst [vmem:[#allocation4] sm:$0xff] %v1155_v54  ;;  %v1134_v13 = vpop.f32.mrf.mxu1 }
 0x480   : > { %v1070_v7 = vpop.f32.mrf.mxu3 }
 0x481   : > { %v1120_v39 = vadd.f32 %v1119_v26, %v1070_v7  ;;  %v1052_v26 = vld [vmem:[#allocation4 + $0x58] sm:$0xff] }
 0x482   : > { %v1055_v7 = vld [vmem:[#allocation4 + $0x78] sm:$0xff] }
 0x483   : > { %v1156_v11 = vadd.f32 %v1120_v39, %v1042_v18 }
 0x485   : > { %1172 = vst [vmem:[#allocation4 + $0x48] sm:$0xff] %v1156_v11  ;;  %v1136_v20 = vpop.f32.mrf.mxu1 }
 0x488   : > { %v1072_v61 = vpop.f32.mrf.mxu3 }
 0x489   : > { %v1122_v24 = vadd.f32 %v1121_v34, %v1072_v61  ;;  %v1053_v34 = vld [vmem:[#allocation4 + $0x30] sm:$0xff] }
 0x48b   : > { %v1157_v0 = vadd.f32 %v1122_v24, %v1043_v21 }
 0x48d   : > { %1173 = vst [vmem:[#allocation4 + $0x60] sm:$0xff] %v1157_v0  ;;  %v1139_v36 = vpop.f32.mrf.mxu1 }
 0x490   : > { %v1075_v48 = vpop.f32.mrf.mxu3 }
 0x491   : > { %v1125_v4 = vadd.f32 %v1124_v42, %v1075_v48 }
 0x493   : > { %v1158_v62 = vadd.f32 %v1125_v4, %v1044_v55 }
 0x495   : > { %1174 = vst [vmem:[#allocation4 + $0x68] sm:$0xff] %v1158_v62  ;;  %v1141_v57 = vpop.f32.mrf.mxu1 }
 0x498   : > { %v1077_v49 = vpop.f32.mrf.mxu3 }
 0x499   : > { %v1127_v23 = vadd.f32 %v1126_v17, %v1077_v49 }
 0x49b   : > { %v1159_v25 = vadd.f32 %v1127_v23, %v1045_v2 }
 0x49d   : > { %1175 = vst [vmem:[#allocation4 + $0x18] sm:$0xff] %v1159_v25  ;;  %v1144_v5 = vpop.f32.mrf.mxu1 }
 0x4a0   : > { %v1080_v53 = vpop.f32.mrf.mxu3 }
 0x4a1   : > { %v1130_v50 = vadd.f32 %v1129_v45, %v1080_v53 }
 0x4a3   : > { %v1160_v63 = vadd.f32 %v1130_v50, %v1046_v37 }
 0x4a5   : > { %1176 = vst [vmem:[#allocation4 + $0x10] sm:$0xff] %v1160_v63  ;;  %v1146_v10 = vpop.f32.mrf.mxu1 }
 0x4a8   : > { %v1082_v6 = vpop.f32.mrf.mxu3 }
 0x4a9   : > { %v1132_v58 = vadd.f32 %v1131_v35, %v1082_v6 }
 0x4ab   : > { %v1161_v14 = vadd.f32 %v1132_v58, %v1047_v12 }
 0x4ad   : > { %1177 = vst [vmem:[#allocation4 + $0x38] sm:$0xff] %v1161_v14  ;;  %v1149_v51 = vpop.f32.mrf.mxu1 }
 0x4b0   : > { %v1085_v52 = vpop.f32.mrf.mxu3 }
 0x4b1   : > { %v1135_v3 = vadd.f32 %v1134_v13, %v1085_v52 }
 0x4b3   : > { %v1162_v29 = vadd.f32 %v1135_v3, %v1048_v28 }
 0x4b5   : > { %1178 = vst [vmem:[#allocation4 + $0x40] sm:$0xff] %v1162_v29  ;;  %v1151_v40 = vpop.f32.mrf.mxu1 }
 0x4b8   : > { %v1087_v32 = vpop.f32.mrf.mxu3 }
 0x4b9   : > { %v1137_v33 = vadd.f32 %v1136_v20, %v1087_v32 }
 0x4bb   : > { %v1163_v9 = vadd.f32 %v1137_v33, %v1049_v56 }
 0x4bd   : > { %1179 = vst [vmem:[#allocation4 + $0x28] sm:$0xff] %v1163_v9 }
 0x4c0   : > { %v1090_v15 = vpop.f32.mrf.mxu3 }
 0x4c1   : > { %v1140_v16 = vadd.f32 %v1139_v36, %v1090_v15 }
 0x4c3   : > { %v1164_v1 = vadd.f32 %v1140_v16, %v1050_v8 }
 0x4c5   : > { %1180 = vst [vmem:[#allocation4 + $0x70] sm:$0xff] %v1164_v1 }
 0x4c8   : > { %v1092_v44 = vpop.f32.mrf.mxu3 }
 0x4c9   : > { %v1142_v22 = vadd.f32 %v1141_v57, %v1092_v44 }
 0x4cb   : > { %v1165_v47 = vadd.f32 %v1142_v22, %v1051_v41 }
 0x4cd   : > { %1181 = vst [vmem:[#allocation4 + $0x20] sm:$0xff] %v1165_v47 }
 0x4d0   : > { %v1095_v43 = vpop.f32.mrf.mxu3 }
 0x4d1   : > { %v1145_v30 = vadd.f32 %v1144_v5, %v1095_v43 }
 0x4d3   : > { %v1166_v59 = vadd.f32 %v1145_v30, %v1052_v26 }
 0x4d5   : > { %1182 = vst [vmem:[#allocation4 + $0x58] sm:$0xff] %v1166_v59 }
 0x4d8   : > { %v1097_v60 = vpop.f32.mrf.mxu3 }
 0x4d9   : > { %v1147_v19 = vadd.f32 %v1146_v10, %v1097_v60 }
 0x4db   : > { %v1167_v27 = vadd.f32 %v1147_v19, %v1053_v34 }
 0x4dd   : > { %1183 = vst [vmem:[#allocation4 + $0x30] sm:$0xff] %v1167_v27 }
 0x4e0   : > { %v1100_v31 = vpop.f32.mrf.mxu3 }
 0x4e1   : > { %v1150_v38 = vadd.f32 %v1149_v51, %v1100_v31 }
 0x4e3   : > { %v1168_v42 = vadd.f32 %v1150_v38, %v1054_v46 }
 0x4e5   : > { %1184 = vst [vmem:[#allocation4 + $0x50] sm:$0xff] %v1168_v42 }
 0x4e8   : > { %v1102_v54 = vpop.f32.mrf.mxu3 }
 0x4e9   : > { %v1152_v18 = vadd.f32 %v1151_v40, %v1102_v54  ;;  %1189 = sbr.rel (%p2178_p12) target bundleno = 1830 (0x726), region = 48 }
 0x4eb   : > { %v1169_v39 = vadd.f32 %v1152_v18, %v1055_v7 }
 0x4ed   : > { %1185 = vst [vmem:[#allocation4 + $0x78] sm:$0xff] %v1169_v39 }
 0x4ee   : > { %v1204_v17 = vld [vmem:[#allocation4 + $0x50] sm:$0xff]  ;;  %v1202_v11 = vld [vmem:[#allocation4 + $0x58] sm:$0xff]  ;;  %v2766_v21 = vmov 0   ;;  %v1201_v45 = vld [vmem:[#allocation4 + $0x20] sm:$0xff] }
 0x4ef   : > { %v1200_v61 = vld [vmem:[#allocation4 + $0x70] sm:$0xff]  ;;  %2642 = vset.pattern.permute.xlu2 %v2766_v21  ;;  %2641 = vset.pattern.permute.xlu1 %v2766_v21  ;;  %2643 = vrcp.f32 %v1204_v17  ;;  %v1198_v62 = vld [vmem:[#allocation4 + $0x40] sm:$0xff]  ;;  %v1199_v49 = vld [vmem:[#allocation4 + $0x28] sm:$0xff] }
 0x4f0   : > { %2640 = vset.pattern.permute.xlu0 %v2766_v21  ;;  %2645 = vrcp.f32 %v1202_v11  ;;  %v1203_v0 = vld [vmem:[#allocation4 + $0x30] sm:$0xff]  ;;  %v1197_v53 = vld [vmem:[#allocation4 + $0x38] sm:$0xff]  ;;  %v1194_v13 = vld [vmem:[#allocation4 + $0x68] sm:$0xff] }
 0x4f1   : > { %2647 = vrcp.f32 %v1200_v61  ;;  %v1196_v23 = vld [vmem:[#allocation4 + $0x10] sm:$0xff]  ;;  %v1195_v63 = vld [vmem:[#allocation4 + $0x18] sm:$0xff]  ;;  %v1192_v12 = vld [vmem:[#allocation4 + $0x48] sm:$0xff] }
 0x4f2   : > { %v1193_v20 = vld [vmem:[#allocation4 + $0x60] sm:$0xff]  ;;  %v1190_v52 = vld [vmem:[#allocation4 + $0x8] sm:$0xff]  ;;  %v1237_v16 = vld [vmem:[#allocation3 + $0x50] sm:$0xff] }
 0x4f3   : > { %v1191_v3 = vld [vmem:[#allocation4] sm:$0xff]  ;;  %v1235_v44 = vld [vmem:[#allocation3 + $0x8] sm:$0xff]  ;;  %v1348_v41 = vld [vmem:[%s2845_s29 + $0x70] sm:$0xff] }
 0x4f4   : > { %v1205_v24 = vld [vmem:[#allocation4 + $0x78] sm:$0xff]  ;;  %v1236_v15 = vld [vmem:[#allocation3 + $0x60] sm:$0xff]  ;;  %v1347_v59 = vld [vmem:[%s2845_s29 + $0x68] sm:$0xff] }
 0x4f5   : > { %v2644_v48 = vpop.eup %2643  ;;  %2649 = vrcp.f32 %v1205_v24  ;;  %v1234_v5 = vld [vmem:[#allocation3] sm:$0xff]  ;;  %v1349_v22 = vld [vmem:[%s2845_s29 + $0x78] sm:$0xff]  ;;  %v1344_v40 = vld [vmem:[%s2845_s29 + $0x50] sm:$0xff] }
 0x4f6   : > { %v2646_v55 = vpop.eup %2645  ;;  %1310 = vperm.xlu0 %2640, %v2644_v48   ;;  %2651 = vrcp.f32 %v1203_v0  ;;  %v1232_v30 = vld [vmem:[#allocation3 + $0x18] sm:$0xff]  ;;  %v1346_v51 = vld [vmem:[%s2845_s29 + $0x60] sm:$0xff]  ;;  %v1343_v48 = vld [vmem:[%s2845_s29 + $0x48] sm:$0xff] }
 0x4f7   : > { %v2648_v4 = vpop.eup %2647  ;;  %1300 = vperm.xlu1 %2641, %v2646_v55   ;;  %2653 = vrcp.f32 %v1201_v45  ;;  %v1233_v10 = vld [vmem:[#allocation3 + $0x58] sm:$0xff]  ;;  %v1230_v7 = vld [vmem:[#allocation3 + $0x20] sm:$0xff] }
 0x4f8   : > { %1290 = vperm.xlu2 %2642, %v2648_v4   ;;  %2655 = vrcp.f32 %v1198_v62  ;;  %v1345_v54 = vld [vmem:[%s2845_s29 + $0x58] sm:$0xff]  ;;  %v1342_v4 = vld [vmem:[%s2845_s29 + $0x40] sm:$0xff]  ;;  %v1228_v62 = vld [vmem:[#allocation3 + $0x70] sm:$0xff] }
 0x4f9   : > { %2657 = vrcp.f32 %v1199_v49  ;;  %v1231_v39 = vld [vmem:[#allocation3 + $0x78] sm:$0xff] }
 0x4fa   : > { %2659 = vrcp.f32 %v1196_v23  ;;  %v1229_v23 = vld [vmem:[#allocation3 + $0x38] sm:$0xff] }
 0x4fb   : > { %v2650_v35 = vpop.eup %2649  ;;  %2661 = vrcp.f32 %v1197_v53  ;;  %v1226_v53 = vld [vmem:[#allocation3 + $0x48] sm:$0xff] }
 0x4fc   : > { %v2652_v2 = vpop.eup %2651  ;;  %2663 = vrcp.f32 %v1194_v13  ;;  %v1227_v13 = vld [vmem:[#allocation3 + $0x30] sm:$0xff] }
 0x4fd   : > { %v2654_v25 = vpop.eup %2653  ;;  %2665 = vrcp.f32 %v1195_v63 }
 0x4fe   : > { %1315 = vperm.xlu0 %2640, %v2650_v35   ;;  %v2656_v37 = vpop.eup %2655  ;;  %2667 = vrcp.f32 %v1192_v12 }
 0x4ff   : > { %1305 = vperm.xlu1 %2641, %v2652_v2   ;;  %v2658_v50 = vpop.eup %2657  ;;  %2669 = vrcp.f32 %v1193_v20 }
 0x500   : > { %1295 = vperm.xlu2 %2642, %v2654_v25   ;;  %v2660_v6 = vpop.eup %2659  ;;  %2671 = vrcp.f32 %v1190_v52 }
 0x501   : > { %v2662_v58 = vpop.eup %2661  ;;  %2673 = vrcp.f32 %v1191_v3 }
 0x502   : > { %v2664_v14 = vpop.eup %2663 }
 0x503   : > { %v2666_v28 = vpop.eup %2665 }
 0x504   : > { %v2668_v29 = vpop.eup %2667 }
 0x505   : > { %v2670_v36 = vpop.eup %2669 }
 0x506   : > { %1280 = vperm.xlu0 %2640, %v2656_v37   ;;  %v2672_v32 = vpop.eup %2671  ;;  %v1340_v37 = vld [vmem:[%s2845_s29 + $0x30] sm:$0xff] }
 0x507   : > { %1285 = vperm.xlu1 %2641, %v2658_v50   ;;  %v2674_v56 = vpop.eup %2673  ;;  %v1341_v50 = vld [vmem:[%s2845_s29 + $0x38] sm:$0xff] }
 0x508   : > { %1270 = vperm.xlu2 %2642, %v2660_v6  }
 0x50e   : > { %1275 = vperm.xlu0 %2640, %v2662_v58  }
 0x50f   : > { %1260 = vperm.xlu1 %2641, %v2664_v14   ;;  %v1338_v14 = vld [vmem:[%s2845_s29 + $0x20] sm:$0xff] }
 0x510   : > { %1265 = vperm.xlu2 %2642, %v2666_v28  }
 0x516   : > { %1250 = vperm.xlu0 %2640, %v2668_v29  }
 0x517   : > { %1255 = vperm.xlu1 %2641, %v2670_v36   ;;  %v1339_v36 = vld [vmem:[%s2845_s29 + $0x28] sm:$0xff] }
 0x518   : > { %1240 = vperm.xlu2 %2642, %v2672_v32  }
 0x51e   : > { %1245 = vperm.xlu0 %2640, %v2674_v56  }
 0x552   : > { %v1291_v33 = vpop.permute.xlu2 %1290 }
 0x553   : > { %v1328_v31 = vmul.f32 %v1291_v33, %v1232_v30  ;;  %v1224_v33 = vld [vmem:[#allocation3 + $0x10] sm:$0xff] }
 0x555   : > { %v1360_v61 = vsub.f32 %v1344_v40, %v1328_v31  ;;  %v2345_v40 = vld [vmem:[%s2850_s6 + $0x8] sm:$0xff] }
 0x55a   : > { %v1296_v8 = vpop.permute.xlu2 %1295 }
 0x55b   : > { %v1329_v46 = vmul.f32 %v1296_v8, %v1233_v10  ;;  %v1223_v10 = vld [vmem:[#allocation3 + $0x68] sm:$0xff] }
 0x55d   : > { %v1361_v21 = vsub.f32 %v1345_v54, %v1329_v46  ;;  %v2353_v54 = vld [vmem:[%s2850_s6 + $0x48] sm:$0xff] }
 0x55f   : > { %v1371_v2 = vpack.c.bf16 %v1361_v21, %v1360_v61  ;;  %v2356_v61 = vld [vmem:[%s2850_s6 + $0x60] sm:$0xff]  ;;  %v2367_v21 = vld [vmem:[%s3412_s3 + $0x38] sm:$0xff] }
 0x560   : > { %1842 = vmatpush.bf16.msra.mxu2 %v2367_v21 }
 0x562   : > { %v1271_v17 = vpop.permute.xlu2 %1270 }
 0x563   : > { %v1324_v25 = vmul.f32 %v1271_v17, %v1228_v62  ;;  %v2355_v17 = vld [vmem:[%s2850_s6 + $0x58] sm:$0xff]  ;;  %v2373_v62 = vld [vmem:[%s3412_s3 + $0x68] sm:$0xff] }
 0x565   : > { %v1356_v28 = vsub.f32 %v1340_v37, %v1324_v25  ;;  %v2350_v25 = vld [vmem:[%s2850_s6 + $0x30] sm:$0xff] }
 0x566   : > { %v2362_v37 = vld [vmem:[%s3412_s3 + $0x10] sm:$0xff] }
 0x568   : > { %v1311_v9 = vpop.permute.xlu0 %1310 }
 0x569   : > { %v1301_v57 = vpop.permute.xlu1 %1300  ;;  %v1332_v1 = vmul.f32 %v1311_v9, %v1236_v15  ;;  %v1336_v15 = vld [vmem:[%s2845_s29 + $0x10] sm:$0xff] }
 0x56a   : > { %v1330_v19 = vmul.f32 %v1301_v57, %v1234_v5  ;;  %v1266_v20 = vpop.permute.xlu2 %1265  ;;  %v1225_v57 = vld [vmem:[#allocation3 + $0x40] sm:$0xff] }
 0x56b   : > { %v1364_v34 = vsub.f32 %v1348_v41, %v1332_v1  ;;  %v1323_v3 = vmul.f32 %v1266_v20, %v1227_v13  ;;  %v2370_v13 = vld [vmem:[%s3412_s3 + $0x50] sm:$0xff]  ;;  %v2351_v20 = vld [vmem:[%s2850_s6 + $0x38] sm:$0xff] }
 0x56c   : > { %v1362_v18 = vsub.f32 %v1346_v51, %v1330_v19 }
 0x56d   : > { %v1355_v9 = vsub.f32 %v1339_v36, %v1323_v3 }
 0x570   : > { %v1316_v47 = vpop.permute.xlu0 %1315 }
 0x571   : > { %v1333_v43 = vmul.f32 %v1316_v47, %v1237_v16  ;;  %v1306_v26 = vpop.permute.xlu1 %1305  ;;  %v1337_v16 = vld [vmem:[%s2845_s29 + $0x18] sm:$0xff]  ;;  %v1222_v47 = vld [vmem:[#allocation3 + $0x28] sm:$0xff] }
 0x572   : > { %v1331_v60 = vmul.f32 %v1306_v26, %v1235_v44 }
 0x573   : > { %v1365_v27 = vsub.f32 %v1349_v22, %v1333_v43  ;;  %v1241_v43 = vpop.permute.xlu2 %1240 }
 0x574   : > { %v1363_v38 = vsub.f32 %v1347_v59, %v1331_v60  ;;  %v1318_v59 = vmul.f32 %v1241_v43, %v1222_v47  ;;  %v1334_v60 = vld [vmem:[%s2845_s29] sm:$0xff] }
 0x575   : > { %v1373_v42 = vpack.c.bf16 %v1365_v27, %v1364_v34  ;;  %v1335_v34 = vld [vmem:[%s2845_s29 + $0x8] sm:$0xff] }
 0x576   : > { %v1372_v45 = vpack.c.bf16 %v1363_v38, %v1362_v18  ;;  %v1350_v51 = vsub.f32 %v1334_v60, %v1318_v59  ;;  %v2344_v38 = vld [vmem:[%s2850_s6] sm:$0xff]  ;;  %v2354_v18 = vld [vmem:[%s2850_s6 + $0x50] sm:$0xff] }
 0x577   : > { %1438 = vmatpush.bf16.msra.mxu0 %v1373_v42  ;;  %1552 = vmatpush.bf16.msra.mxu1 %v1373_v42  ;;  %v2352_v42 = vld [vmem:[%s2850_s6 + $0x40] sm:$0xff] }
 0x578   : > { %v1281_v11 = vpop.permute.xlu0 %1280 }
 0x579   : > { %v1286_v24 = vpop.permute.xlu1 %1285  ;;  %v1326_v0 = vmul.f32 %v1281_v11, %v1230_v7  ;;  %v2346_v7 = vld [vmem:[%s2850_s6 + $0x10] sm:$0xff]  ;;  %v2348_v11 = vld [vmem:[%s2850_s6 + $0x20] sm:$0xff] }
 0x57a   : > { %v1327_v55 = vmul.f32 %v1286_v24, %v1231_v39  ;;  %v2347_v39 = vld [vmem:[%s2850_s6 + $0x18] sm:$0xff] }
 0x57b   : > { %1439 = vmatpush.bf16.msra.mxu0 %v1372_v45  ;;  %1553 = vmatpush.bf16.msra.mxu1 %v1372_v45  ;;  %v1358_v49 = vsub.f32 %v1342_v4, %v1326_v0  ;;  %v2375_v24 = vld [vmem:[%s3412_s3 + $0x78] sm:$0xff]  ;;  %v2366_v0 = vld [vmem:[%s3412_s3 + $0x30] sm:$0xff]  ;;  %v2365_v4 = vld [vmem:[%s3412_s3 + $0x28] sm:$0xff] }
 0x57c   : > { %v1359_v35 = vsub.f32 %v1343_v48, %v1327_v55  ;;  %1891 = vmatpush.bf16.msra.mxu3 %v2375_v24  ;;  %v2374_v45 = vld [vmem:[%s3412_s3 + $0x70] sm:$0xff]  ;;  %1843 = vmatpush.bf16.msra.mxu2 %v2366_v0  ;;  %v2349_v48 = vld [vmem:[%s2850_s6 + $0x28] sm:$0xff] }
 0x57d   : > { %v2357_v55 = vld [vmem:[%s2850_s6 + $0x68] sm:$0xff] }
 0x57e   : > { %v1370_v58 = vpack.c.bf16 %v1359_v35, %v1358_v49  ;;  %v2364_v35 = vld [vmem:[%s3412_s3 + $0x20] sm:$0xff] }
 0x57f   : > { %1440 = vmatpush.bf16.msra.mxu0 %v1371_v2  ;;  %1554 = vmatpush.bf16.msra.mxu1 %v1371_v2  ;;  %v2372_v49 = vld [vmem:[%s3412_s3 + $0x60] sm:$0xff]  ;;  %v2363_v2 = vld [vmem:[%s3412_s3 + $0x18] sm:$0xff] }
 0x580   : > { %v1276_v63 = vpop.permute.xlu0 %1275  ;;  %1892 = vmatpush.bf16.msra.mxu3 %v2374_v45  ;;  %1844 = vmatpush.bf16.msra.mxu2 %v2365_v4 }
 0x581   : > { %v1325_v6 = vmul.f32 %v1276_v63, %v1229_v23  ;;  %v1261_v12 = vpop.permute.xlu1 %1260  ;;  %v2371_v23 = vld [vmem:[%s3412_s3 + $0x58] sm:$0xff]  ;;  %v2369_v63 = vld [vmem:[%s3412_s3 + $0x48] sm:$0xff] }
 0x582   : > { %v1322_v52 = vmul.f32 %v1261_v12, %v1226_v53  ;;  %v2358_v53 = vld [vmem:[%s2850_s6 + $0x70] sm:$0xff]  ;;  %v2368_v12 = vld [vmem:[%s3412_s3 + $0x40] sm:$0xff] }
 0x583   : > { %v1357_v29 = vsub.f32 %v1341_v50, %v1325_v6  ;;  %1441 = vmatpush.bf16.msra.mxu0 %v1370_v58  ;;  %1555 = vmatpush.bf16.msra.mxu1 %v1370_v58  ;;  %v2361_v50 = vld [vmem:[%s3412_s3 + $0x8] sm:$0xff]  ;;  %v2360_v6 = vld [vmem:[%s3412_s3] sm:$0xff]  ;;  %v1601_v58 = vlaneseq }
 0x584   : > { %v1354_v32 = vsub.f32 %v1338_v14, %v1322_v52  ;;  %1893 = vmatpush.bf16.msra.mxu3 %v2373_v62  ;;  %1845 = vmatpush.bf16.msra.mxu2 %v2364_v35  ;;  %v2359_v14 = vld [vmem:[%s2850_s6 + $0x78] sm:$0xff] }
 0x585   : > { %v1369_v56 = vpack.c.bf16 %v1357_v29, %v1356_v28  ;;  %v3354_v52 = vshrl.u32 %v1601_v58, 7 }
 0x586   : > { %v1368_v41 = vpack.c.bf16 %v1355_v9, %v1354_v32 }
 0x587   : > { %1442 = vmatpush.bf16.msra.mxu0 %v1369_v56  ;;  %1556 = vmatpush.bf16.msra.mxu1 %v1369_v56  ;;  %v1603_v28 = vadd.s32 8, %v3354_v52  ;;  %v1618_v3 = vcvt.s32.f32 %v3354_v52  ;;  %v1604_v9 = vadd.s32 16, %v3354_v52  ;;  %v1608_v45 = vadd.s32 48, %v3354_v52 }
 0x588   : > { %v1251_v8 = vpop.permute.xlu0 %1250  ;;  %1894 = vmatpush.bf16.msra.mxu3 %v2372_v49  ;;  %1846 = vmatpush.bf16.msra.mxu2 %v2363_v2 }
 0x589   : > { %v1256_v1 = vpop.permute.xlu1 %1255  ;;  %v1320_v44 = vmul.f32 %v1251_v8, %v1224_v33  ;;  %v1619_v29 = vcvt.s32.f32 %v1603_v28  ;;  %v1634_v36 = vadd.f32 1.0, %v1618_v3  ;;  %v1624_v62 = vcvt.s32.f32 %v1608_v45 }
 0x58a   : > { %v1321_v5 = vmul.f32 %v1256_v1, %v1225_v57  ;;  %v1605_v57 = vadd.s32 24, %v3354_v52 }
 0x58b   : > { %v1352_v22 = vsub.f32 %v1336_v15, %v1320_v44  ;;  %1443 = vmatpush.bf16.msra.mxu0 %v1368_v41  ;;  %1557 = vmatpush.bf16.msra.mxu1 %v1368_v41  ;;  %v1635_v32 = vadd.f32 1.0, %v1619_v29  ;;  %2675 = vrcp.f32 %v1634_v36 }
 0x58c   : > { %v1353_v26 = vsub.f32 %v1337_v16, %v1321_v5  ;;  %1895 = vmatpush.bf16.msra.mxu3 %v2371_v23  ;;  %1847 = vmatpush.bf16.msra.mxu2 %v2362_v37  ;;  %v1620_v16 = vcvt.s32.f32 %v1604_v9  ;;  %v1621_v41 = vcvt.s32.f32 %v1605_v57 }
 0x58d   : > { %2677 = vrcp.f32 %v1635_v32 }
 0x58e   : > { %v1367_v30 = vpack.c.bf16 %v1353_v26, %v1352_v22  ;;  %v1637_v59 = vadd.f32 1.0, %v1621_v41 }
 0x590   : > { %1444 = vmatpush.bf16.msra.mxu0 %v1367_v30  ;;  %1558 = vmatpush.bf16.msra.mxu1 %v1367_v30  ;;  %v1246_v19 = vpop.permute.xlu0 %1245 }
 0x591   : > { %v1319_v27 = vmul.f32 %v1246_v19, %v1223_v10  ;;  %1896 = vmatpush.bf16.msra.mxu3 %v2370_v13  ;;  %1848 = vmatpush.bf16.msra.mxu2 %v2361_v50  ;;  %v2676_v15 = vpop.eup %2675  ;;  %v1636_v10 = vadd.f32 1.0, %v1620_v16  ;;  %v1606_v19 = vadd.s32 32, %v3354_v52 }
 0x593   : > { %v1351_v31 = vsub.f32 %v1335_v34, %v1319_v27  ;;  %v2678_v8 = vpop.eup %2677  ;;  %2679 = vrcp.f32 %v1636_v10  ;;  %v1607_v27 = vadd.s32 40, %v3354_v52 }
 0x594   : > { %2681 = vrcp.f32 %v1637_v59 }
 0x595   : > { %v1366_v46 = vpack.c.bf16 %v1351_v31, %v1350_v51  ;;  %1897 = vmatpush.bf16.msra.mxu3 %v2369_v63  ;;  %1849 = vmatpush.bf16.msra.mxu2 %v2360_v6  ;;  %v1640_v63 = vadd.f32 1.0, %v1624_v62 }
 0x597   : > { %1445 = vmatpush.bf16.msra.mxu0 %v1366_v46  ;;  %1559 = vmatpush.bf16.msra.mxu1 %v1366_v46  ;;  %v1622_v46 = vcvt.s32.f32 %v1606_v19 }
 0x599   : > { %1898 = vmatpush.bf16.msra.mxu3 %v2368_v12  ;;  %v2680_v51 = vpop.eup %2679 }
 0x59a   : > { %1446 = vmatmul.bf16.vlgmr.msra.gmra.mxu0 %v2344_v38  ;;  %1560 = vmatmul.bf16.vlgmr.msra.gmra.mxu1 %v2352_v42  ;;  %v2682_v31 = vpop.eup %2681 }
 0x5aa   : > { %1451 = vmatmul.bf16.gmra.mxu0 %v2345_v40  ;;  %1565 = vmatmul.bf16.gmra.mxu1 %v2353_v54  ;;  %v1623_v40 = vcvt.s32.f32 %v1607_v27 }
 0x5ac   : > { %v1639_v21 = vadd.f32 1.0, %v1623_v40 }
 0x5ba   : > { %1456 = vmatmul.bf16.gmra.mxu0 %v2346_v7  ;;  %1570 = vmatmul.bf16.gmra.mxu1 %v2354_v18 }
 0x5ca   : > { %1461 = vmatmul.bf16.gmra.mxu0 %v2347_v39  ;;  %1575 = vmatmul.bf16.gmra.mxu1 %v2355_v17 }
 0x5da   : > { %1466 = vmatmul.bf16.gmra.mxu0 %v2348_v11  ;;  %1580 = vmatmul.bf16.gmra.mxu1 %v2356_v61  ;;  %v1638_v61 = vadd.f32 1.0, %v1622_v46 }
 0x5dc   : > { %2683 = vrcp.f32 %v1638_v61 }
 0x5dd   : > { %2685 = vrcp.f32 %v1639_v21 }
 0x5de   : > { %2687 = vrcp.f32 %v1640_v63 }
 0x5ea   : > { %1471 = vmatmul.bf16.gmra.mxu0 %v2349_v48  ;;  %1585 = vmatmul.bf16.gmra.mxu1 %v2357_v55  ;;  %v1609_v48 = vadd.s32 56, %v3354_v52  ;;  %v2684_v55 = vpop.eup %2683 }
 0x5eb   : > { %v2686_v4 = vpop.eup %2685 }
 0x5ec   : > { %v1625_v2 = vcvt.s32.f32 %v1609_v48  ;;  %v2688_v28 = vpop.eup %2687 }
 0x5ee   : > { %v1641_v6 = vadd.f32 1.0, %v1625_v2 }
 0x5f0   : > { %2689 = vrcp.f32 %v1641_v6 }
 0x5f6   : > { %v2690_v3 = vpop.eup %2689 }
 0x5fa   : > { %1476 = vmatmul.bf16.gmra.mxu0 %v2350_v25  ;;  %1590 = vmatmul.bf16.gmra.mxu1 %v2358_v53 }
 0x60a   : > { %1481 = vmatmul.bf16.gmra.mxu0 %v2351_v20  ;;  %1595 = vmatmul.bf16.gmra.mxu1 %v2359_v14  ;;  %v1610_v20 = vadd.s32 64, %v3354_v52  ;;  %v1611_v14 = vadd.s32 72, %v3354_v52 }
 0x60c   : > { %v1626_v29 = vcvt.s32.f32 %v1610_v20 }
 0x617   : > { %v1447_v56 = vpop.f32.mrf.mxu0  ;;  %v1561_v33 = vpop.f32.mrf.mxu1 }
 0x618   : > { %v1666_v5 = vmul.f32 %v2676_v15, %v1447_v56  ;;  %v1667_v22 = vmul.f32 %v2676_v15, %v1561_v33  ;;  %v1627_v56 = vcvt.s32.f32 %v1611_v14 }
 0x61f   : > { %v1449_v1 = vpop.f32.mrf.mxu0  ;;  %v1563_v44 = vpop.f32.mrf.mxu1 }
 0x620   : > { %v1668_v47 = vmul.f32 %v2678_v8, %v1449_v1  ;;  %v1669_v43 = vmul.f32 %v2678_v8, %v1563_v44  ;;  %v1642_v1 = vadd.f32 1.0, %v1626_v29  ;;  %v1643_v44 = vadd.f32 1.0, %v1627_v56 }
 0x622   : > { %v1698_v26 = vpack.c.bf16 %v1668_v47, %v1666_v5  ;;  %v1699_v30 = vpack.c.bf16 %v1669_v43, %v1667_v22  ;;  %2691 = vrcp.f32 %v1642_v1  ;;  %v1612_v22 = vadd.s32 80, %v3354_v52 }
 0x623   : > { %2693 = vrcp.f32 %v1643_v44  ;;  %v1613_v47 = vadd.s32 88, %v3354_v52 }
 0x624   : > { %1850 = vmatmul.bf16.vlgmr.msra.gmra.mxu2 %v1698_v26  ;;  %1899 = vmatmul.bf16.vlgmr.msra.gmra.mxu3 %v1699_v30  ;;  %v1628_v30 = vcvt.s32.f32 %v1612_v22 }
 0x627   : > { %v1452_v60 = vpop.f32.mrf.mxu0  ;;  %v1566_v34 = vpop.f32.mrf.mxu1 }
 0x628   : > { %v1670_v54 = vmul.f32 %v2680_v51, %v1452_v60  ;;  %v1671_v7 = vmul.f32 %v2680_v51, %v1566_v34  ;;  %v2692_v43 = vpop.eup %2691  ;;  %v1629_v60 = vcvt.s32.f32 %v1613_v47 }
 0x629   : > { %v2694_v26 = vpop.eup %2693 }
 0x62f   : > { %v1454_v38 = vpop.f32.mrf.mxu0  ;;  %v1568_v42 = vpop.f32.mrf.mxu1 }
 0x630   : > { %v1672_v18 = vmul.f32 %v2682_v31, %v1454_v38  ;;  %v1673_v39 = vmul.f32 %v2682_v31, %v1568_v42  ;;  %v1644_v38 = vadd.f32 1.0, %v1628_v30  ;;  %v1645_v42 = vadd.f32 1.0, %v1629_v60  ;;  %v1941_v60 = vld [vmem:[#allocation2] sm:$0xff] }
 0x632   : > { %v1700_v17 = vpack.c.bf16 %v1672_v18, %v1670_v54  ;;  %v1701_v11 = vpack.c.bf16 %v1673_v39, %v1671_v7  ;;  %2695 = vrcp.f32 %v1644_v38  ;;  %v1614_v7 = vadd.s32 96, %v3354_v52 }
 0x633   : > { %2697 = vrcp.f32 %v1645_v42  ;;  %v1615_v18 = vadd.s32 104, %v3354_v52 }
 0x634   : > { %1855 = vmatmul.bf16.gmra.mxu2 %v1700_v17  ;;  %1904 = vmatmul.bf16.gmra.mxu3 %v1701_v11  ;;  %v1630_v11 = vcvt.s32.f32 %v1614_v7 }
 0x637   : > { %v1457_v24 = vpop.f32.mrf.mxu0  ;;  %v1571_v0 = vpop.f32.mrf.mxu1 }
 0x638   : > { %v1674_v23 = vmul.f32 %v2684_v55, %v1457_v24  ;;  %v1675_v25 = vmul.f32 %v2684_v55, %v1571_v0  ;;  %v2696_v39 = vpop.eup %2695  ;;  %v1631_v24 = vcvt.s32.f32 %v1615_v18 }
 0x639   : > { %v2698_v17 = vpop.eup %2697 }
 0x63f   : > { %v1459_v35 = vpop.f32.mrf.mxu0  ;;  %v1573_v49 = vpop.f32.mrf.mxu1 }
 0x640   : > { %v1676_v53 = vmul.f32 %v2686_v4, %v1459_v35  ;;  %v1677_v37 = vmul.f32 %v2686_v4, %v1573_v49  ;;  %v1646_v35 = vadd.f32 1.0, %v1630_v11  ;;  %v1647_v49 = vadd.f32 1.0, %v1631_v24  ;;  %v1944_v11 = vld [vmem:[#allocation2 + $0x50] sm:$0xff] }
 0x642   : > { %v1702_v13 = vpack.c.bf16 %v1676_v53, %v1674_v23  ;;  %v1703_v50 = vpack.c.bf16 %v1677_v37, %v1675_v25  ;;  %2699 = vrcp.f32 %v1646_v35  ;;  %v1616_v25 = vadd.s32 112, %v3354_v52  ;;  %v1946_v35 = vld [vmem:[#allocation2 + $0x8] sm:$0xff] }
 0x643   : > { %2701 = vrcp.f32 %v1647_v49  ;;  %v1617_v53 = vadd.s32 120, %v3354_v52 }
 0x644   : > { %1860 = vmatmul.bf16.gmra.mxu2 %v1702_v13  ;;  %1909 = vmatmul.bf16.gmra.mxu3 %v1703_v50  ;;  %v1632_v50 = vcvt.s32.f32 %v1616_v25 }
 0x647   : > { %v1462_v12 = vpop.f32.mrf.mxu0  ;;  %v1576_v58 = vpop.f32.mrf.mxu1 }
 0x648   : > { %v1678_v33 = vmul.f32 %v2688_v28, %v1462_v12  ;;  %v1679_v9 = vmul.f32 %v2688_v28, %v1576_v58  ;;  %v2700_v37 = vpop.eup %2699  ;;  %v1633_v12 = vcvt.s32.f32 %v1617_v53  ;;  %v1947_v53 = vld [vmem:[#allocation2 + $0x48] sm:$0xff] }
 0x649   : > { %v2702_v13 = vpop.eup %2701 }
 0x64f   : > { %v1464_v36 = vpop.f32.mrf.mxu0  ;;  %v1578_v32 = vpop.f32.mrf.mxu1 }
 0x650   : > { %v1680_v57 = vmul.f32 %v2690_v3, %v1464_v36  ;;  %v1681_v15 = vmul.f32 %v2690_v3, %v1578_v32  ;;  %v1648_v36 = vadd.f32 1.0, %v1632_v50  ;;  %v1649_v32 = vadd.f32 1.0, %v1633_v12 }
 0x652   : > { %v1704_v8 = vpack.c.bf16 %v1680_v57, %v1678_v33  ;;  %v1705_v16 = vpack.c.bf16 %v1681_v15, %v1679_v9  ;;  %2703 = vrcp.f32 %v1648_v36 }
 0x653   : > { %2705 = vrcp.f32 %v1649_v32 }
 0x654   : > { %1865 = vmatmul.bf16.gmra.mxu2 %v1704_v8  ;;  %1914 = vmatmul.bf16.gmra.mxu3 %v1705_v16 }
 0x657   : > { %v1467_v41 = vpop.f32.mrf.mxu0  ;;  %v1581_v5 = vpop.f32.mrf.mxu1 }
 0x658   : > { %v1682_v34 = vmul.f32 %v2692_v43, %v1467_v41  ;;  %v1683_v19 = vmul.f32 %v2692_v43, %v1581_v5  ;;  %v2704_v52 = vpop.eup %2703  ;;  %v1940_v43 = vld [vmem:[#allocation2 + $0x30] sm:$0xff] }
 0x659   : > { %v2706_v9 = vpop.eup %2705 }
 0x65f   : > { %v1469_v10 = vpop.f32.mrf.mxu0  ;;  %v1583_v59 = vpop.f32.mrf.mxu1 }
 0x660   : > { %v1684_v27 = vmul.f32 %v2694_v26, %v1469_v10  ;;  %v1685_v51 = vmul.f32 %v2694_v26, %v1583_v59 }
 0x662   : > { %v1706_v31 = vpack.c.bf16 %v1684_v27, %v1682_v34  ;;  %v1707_v46 = vpack.c.bf16 %v1685_v51, %v1683_v19 }
 0x664   : > { %1870 = vmatmul.bf16.gmra.mxu2 %v1706_v31  ;;  %1919 = vmatmul.bf16.gmra.mxu3 %v1707_v46  ;;  %v1942_v31 = vld [vmem:[#allocation2 + $0x58] sm:$0xff] }
 0x667   : > { %v1472_v40 = vpop.f32.mrf.mxu0  ;;  %v1586_v54 = vpop.f32.mrf.mxu1 }
 0x668   : > { %v1686_v0 = vmul.f32 %v2696_v39, %v1472_v40  ;;  %v1687_v45 = vmul.f32 %v2696_v39, %v1586_v54  ;;  %v1943_v54 = vld [vmem:[#allocation2 + $0x18] sm:$0xff] }
 0x66f   : > { %v1474_v61 = vpop.f32.mrf.mxu0  ;;  %v1588_v21 = vpop.f32.mrf.mxu1 }
 0x670   : > { %v1688_v48 = vmul.f32 %v2698_v17, %v1474_v61  ;;  %v1689_v55 = vmul.f32 %v2698_v17, %v1588_v21 }
 0x672   : > { %v1708_v4 = vpack.c.bf16 %v1688_v48, %v1686_v0  ;;  %v1709_v62 = vpack.c.bf16 %v1689_v55, %v1687_v45  ;;  %v1945_v45 = vld [vmem:[#allocation2 + $0x68] sm:$0xff] }
 0x674   : > { %1875 = vmatmul.bf16.gmra.mxu2 %v1708_v4  ;;  %1924 = vmatmul.bf16.gmra.mxu3 %v1709_v62 }
 0x677   : > { %v1477_v2 = vpop.f32.mrf.mxu0  ;;  %v1591_v23 = vpop.f32.mrf.mxu1 }
 0x678   : > { %v1690_v58 = vmul.f32 %v2700_v37, %v1477_v2  ;;  %v1691_v20 = vmul.f32 %v2700_v37, %v1591_v23 }
 0x67f   : > { %v1479_v63 = vpop.f32.mrf.mxu0  ;;  %v1593_v6 = vpop.f32.mrf.mxu1 }
 0x680   : > { %v1692_v14 = vmul.f32 %v2702_v13, %v1479_v63  ;;  %v1693_v28 = vmul.f32 %v2702_v13, %v1593_v6  ;;  %v1948_v6 = vld [vmem:[#allocation2 + $0x40] sm:$0xff] }
 0x682   : > { %v1710_v3 = vpack.c.bf16 %v1692_v14, %v1690_v58  ;;  %v1711_v29 = vpack.c.bf16 %v1693_v28, %v1691_v20  ;;  %v1949_v28 = vld [vmem:[#allocation2 + $0x20] sm:$0xff] }
 0x684   : > { %1880 = vmatmul.bf16.gmra.mxu2 %v1710_v3  ;;  %1929 = vmatmul.bf16.gmra.mxu3 %v1711_v29 }
 0x687   : > { %v1482_v56 = vpop.f32.mrf.mxu0  ;;  %v1596_v33 = vpop.f32.mrf.mxu1 }
 0x688   : > { %v1694_v8 = vmul.f32 %v2704_v52, %v1482_v56  ;;  %v1695_v16 = vmul.f32 %v2704_v52, %v1596_v33  ;;  %v1950_v56 = vld [vmem:[#allocation2 + $0x10] sm:$0xff] }
 0x68f   : > { %v1484_v57 = vpop.f32.mrf.mxu0  ;;  %v1598_v15 = vpop.f32.mrf.mxu1 }
 0x690   : > { %v1696_v1 = vmul.f32 %v2706_v9, %v1484_v57  ;;  %v1697_v44 = vmul.f32 %v2706_v9, %v1598_v15  ;;  %v1951_v15 = vld [vmem:[#allocation2 + $0x38] sm:$0xff] }
 0x692   : > { %v1712_v41 = vpack.c.bf16 %v1696_v1, %v1694_v8  ;;  %v1713_v5 = vpack.c.bf16 %v1697_v44, %v1695_v16 }
 0x694   : > { %1885 = vmatmul.bf16.gmra.mxu2 %v1712_v41  ;;  %1934 = vmatmul.bf16.gmra.mxu3 %v1713_v5  ;;  %v1952_v41 = vld [vmem:[#allocation2 + $0x60] sm:$0xff] }
 0x6a7   : > { %v1851_v22 = vpop.f32.mrf.mxu2  ;;  %v1900_v47 = vpop.f32.mrf.mxu3 }
 0x6a8   : > { %v1901_v26 = vadd.f32 %v1900_v47, %v1851_v22 }
 0x6aa   : > { %v1956_v30 = vadd.f32 %v1940_v43, %v1901_v26  ;;  %v1953_v26 = vld [vmem:[#allocation2 + $0x70] sm:$0xff] }
 0x6ac   : > { %1972 = vst [vmem:[#allocation2 + $0x30] sm:$0xff] %v1956_v30 }
 0x6ad   : > { %1988 = vst [vmem:[%s2855_s10] sm:$0xff] %v1956_v30 }
 0x6af   : > { %v1853_v10 = vpop.f32.mrf.mxu2  ;;  %v1902_v59 = vpop.f32.mrf.mxu3 }
 0x6b0   : > { %v1903_v34 = vadd.f32 %v1902_v59, %v1853_v10 }
 0x6b2   : > { %v1957_v19 = vadd.f32 %v1941_v60, %v1903_v34  ;;  %v1954_v34 = vld [vmem:[#allocation2 + $0x78] sm:$0xff] }
 0x6b4   : > { %1973 = vst [vmem:[#allocation2] sm:$0xff] %v1957_v19 }
 0x6b5   : > { %1989 = vst [vmem:[%s2855_s10 + $0x8] sm:$0xff] %v1957_v19 }
 0x6b7   : > { %v1856_v27 = vpop.f32.mrf.mxu2  ;;  %v1905_v51 = vpop.f32.mrf.mxu3 }
 0x6b8   : > { %v1906_v46 = vadd.f32 %v1905_v51, %v1856_v27 }
 0x6ba   : > { %v1958_v38 = vadd.f32 %v1942_v31, %v1906_v46  ;;  %v1955_v46 = vld [vmem:[#allocation2 + $0x28] sm:$0xff] }
 0x6bc   : > { %1974 = vst [vmem:[#allocation2 + $0x58] sm:$0xff] %v1958_v38 }
 0x6bd   : > { %1990 = vst [vmem:[%s2855_s10 + $0x10] sm:$0xff] %v1958_v38 }
 0x6bf   : > { %v1858_v42 = vpop.f32.mrf.mxu2  ;;  %v1907_v40 = vpop.f32.mrf.mxu3 }
 0x6c0   : > { %v1908_v7 = vadd.f32 %v1907_v40, %v1858_v42 }
 0x6c2   : > { %v1959_v18 = vadd.f32 %v1943_v54, %v1908_v7 }
 0x6c4   : > { %1975 = vst [vmem:[#allocation2 + $0x18] sm:$0xff] %v1959_v18 }
 0x6c5   : > { %1991 = vst [vmem:[%s2855_s10 + $0x18] sm:$0xff] %v1959_v18 }
 0x6c7   : > { %v1861_v39 = vpop.f32.mrf.mxu2  ;;  %v1910_v17 = vpop.f32.mrf.mxu3 }
 0x6c8   : > { %v1911_v61 = vadd.f32 %v1910_v17, %v1861_v39 }
 0x6ca   : > { %v1960_v21 = vadd.f32 %v1944_v11, %v1911_v61 }
 0x6cc   : > { %1976 = vst [vmem:[#allocation2 + $0x50] sm:$0xff] %v1960_v21 }
 0x6cd   : > { %1992 = vst [vmem:[%s2855_s10 + $0x20] sm:$0xff] %v1960_v21 }
 0x6cf   : > { %v1863_v24 = vpop.f32.mrf.mxu2  ;;  %v1912_v0 = vpop.f32.mrf.mxu3 }
 0x6d0   : > { %v1913_v48 = vadd.f32 %v1912_v0, %v1863_v24 }
 0x6d2   : > { %v1961_v55 = vadd.f32 %v1945_v45, %v1913_v48 }
 0x6d4   : > { %1977 = vst [vmem:[#allocation2 + $0x68] sm:$0xff] %v1961_v55 }
 0x6d5   : > { %1993 = vst [vmem:[%s2855_s10 + $0x28] sm:$0xff] %v1961_v55 }
 0x6d7   : > { %v1866_v4 = vpop.f32.mrf.mxu2  ;;  %v1915_v62 = vpop.f32.mrf.mxu3 }
 0x6d8   : > { %v1916_v49 = vadd.f32 %v1915_v62, %v1866_v4 }
 0x6da   : > { %v1962_v2 = vadd.f32 %v1946_v35, %v1916_v49 }
 0x6dc   : > { %1978 = vst [vmem:[#allocation2 + $0x8] sm:$0xff] %v1962_v2 }
 0x6dd   : > { %1994 = vst [vmem:[%s2855_s10 + $0x30] sm:$0xff] %v1962_v2 }
 0x6df   : > { %v1868_v23 = vpop.f32.mrf.mxu2  ;;  %v1917_v25 = vpop.f32.mrf.mxu3 }
 0x6e0   : > { %v1918_v37 = vadd.f32 %v1917_v25, %v1868_v23 }
 0x6e2   : > { %v1963_v13 = vadd.f32 %v1947_v53, %v1918_v37 }
 0x6e4   : > { %1979 = vst [vmem:[#allocation2 + $0x48] sm:$0xff] %v1963_v13 }
 0x6e5   : > { %1995 = vst [vmem:[%s2855_s10 + $0x38] sm:$0xff] %v1963_v13 }
 0x6e7   : > { %v1871_v50 = vpop.f32.mrf.mxu2  ;;  %v1920_v63 = vpop.f32.mrf.mxu3 }
 0x6e8   : > { %v1921_v12 = vadd.f32 %v1920_v63, %v1871_v50 }
 0x6ea   : > { %v1964_v58 = vadd.f32 %v1948_v6, %v1921_v12 }
 0x6ec   : > { %1980 = vst [vmem:[#allocation2 + $0x40] sm:$0xff] %v1964_v58 }
 0x6ed   : > { %1996 = vst [vmem:[%s2855_s10 + $0x40] sm:$0xff] %v1964_v58 }
 0x6ef   : > { %v1873_v20 = vpop.f32.mrf.mxu2  ;;  %v1922_v14 = vpop.f32.mrf.mxu3 }
 0x6f0   : > { %v1923_v3 = vadd.f32 %v1922_v14, %v1873_v20 }
 0x6f2   : > { %v1965_v29 = vadd.f32 %v1949_v28, %v1923_v3 }
 0x6f4   : > { %1981 = vst [vmem:[#allocation2 + $0x20] sm:$0xff] %v1965_v29 }
 0x6f5   : > { %1997 = vst [vmem:[%s2855_s10 + $0x48] sm:$0xff] %v1965_v29 }
 0x6f7   : > { %v1876_v36 = vpop.f32.mrf.mxu2  ;;  %v1925_v32 = vpop.f32.mrf.mxu3 }
 0x6f8   : > { %v1926_v33 = vadd.f32 %v1925_v32, %v1876_v36 }
 0x6fa   : > { %v1966_v52 = vadd.f32 %v1950_v56, %v1926_v33 }
 0x6fc   : > { %1982 = vst [vmem:[#allocation2 + $0x10] sm:$0xff] %v1966_v52 }
 0x6fd   : > { %1998 = vst [vmem:[%s2855_s10 + $0x50] sm:$0xff] %v1966_v52 }
 0x6ff   : > { %v1878_v9 = vpop.f32.mrf.mxu2  ;;  %v1927_v57 = vpop.f32.mrf.mxu3 }
 0x700   : > { %v1928_v8 = vadd.f32 %v1927_v57, %v1878_v9 }
 0x702   : > { %v1967_v16 = vadd.f32 %v1951_v15, %v1928_v8 }
 0x704   : > { %1983 = vst [vmem:[#allocation2 + $0x38] sm:$0xff] %v1967_v16 }
 0x705   : > { %1999 = vst [vmem:[%s2855_s10 + $0x58] sm:$0xff] %v1967_v16 }
 0x707   : > { %v1881_v1 = vpop.f32.mrf.mxu2  ;;  %v1930_v44 = vpop.f32.mrf.mxu3 }
 0x708   : > { %v1931_v5 = vadd.f32 %v1930_v44, %v1881_v1 }
 0x70a   : > { %v1968_v22 = vadd.f32 %v1952_v41, %v1931_v5 }
 0x70c   : > { %1984 = vst [vmem:[#allocation2 + $0x60] sm:$0xff] %v1968_v22 }
 0x70d   : > { %2000 = vst [vmem:[%s2855_s10 + $0x60] sm:$0xff] %v1968_v22 }
 0x70f   : > { %v1883_v47 = vpop.f32.mrf.mxu2  ;;  %v1932_v43 = vpop.f32.mrf.mxu3 }
 0x710   : > { %v1933_v30 = vadd.f32 %v1932_v43, %v1883_v47 }
 0x712   : > { %v1969_v10 = vadd.f32 %v1953_v26, %v1933_v30 }
 0x714   : > { %1985 = vst [vmem:[#allocation2 + $0x70] sm:$0xff] %v1969_v10 }
 0x715   : > { %2001 = vst [vmem:[%s2855_s10 + $0x68] sm:$0xff] %v1969_v10 }
 0x717   : > { %v1886_v59 = vpop.f32.mrf.mxu2  ;;  %v1935_v60 = vpop.f32.mrf.mxu3 }
 0x718   : > { %v1936_v19 = vadd.f32 %v1935_v60, %v1886_v59 }
 0x71a   : > { %v1970_v27 = vadd.f32 %v1954_v34, %v1936_v19 }
 0x71c   : > { %1986 = vst [vmem:[#allocation2 + $0x78] sm:$0xff] %v1970_v27 }
 0x71d   : > { %2002 = vst [vmem:[%s2855_s10 + $0x70] sm:$0xff] %v1970_v27 }
 0x71f   : > { %v1888_v51 = vpop.f32.mrf.mxu2  ;;  %v1937_v31 = vpop.f32.mrf.mxu3 }
 0x720   : > { %v1938_v38 = vadd.f32 %v1937_v31, %v1888_v51 }
 0x722   : > { %v1971_v42 = vadd.f32 %v1955_v46, %v1938_v38 }
 0x724   : > { %1987 = vst [vmem:[#allocation2 + $0x28] sm:$0xff] %v1971_v42 }
 0x725   : > { %2003 = vst [vmem:[%s2855_s10 + $0x78] sm:$0xff] %v1971_v42 }
 0x726 PF: > { %s14_s21 = sadd.s32 1, %s2761_s21   ;;  %s3414_s15 = smov %s2749_s18 }
 0x727   : > { %p11_p13 = scmp.ge.s32.totalorder %s14_s21, 10   ;;  %s3415_s16 = smov %s2753_s19 }
 0x728   : > { %s3416_s17 = smov %s2757_s20  ;;  %s3417_s18 = smov %s3421_s22 }
 0x729   : > { %s3418_s19 = smov %s3425_s23  ;;  %s3419_s20 = smov %s3429_s24 }
 0x72a   :  { %13 = sbr.rel (!%p11_p13) target bundleno = 4 (0x4), region = 85 }

</bundles_post_ra>
